<compile_context>
chip_gen: v5e
topology: v5e:2x2
jax: 0.10.0
libtpu: 0.0.40
codegen_flags: <defaults>
</compile_context>

<pallas_src>
import functools

import jax
import jax.numpy as jnp
from jax.experimental import pallas as pl
from jax.experimental.pallas import tpu as pltpu


# ----------------------------------------------------------------------------
# Pallas kernel
# ----------------------------------------------------------------------------
def _lstm_cell_ifog(x_proj, h, c, whh, H):
    """One LSTM step; gate columns ordered [i | f | o | g].

    x_proj already contains x @ W_ih + (b_ih + b_hh)."""
    gates = x_proj + jnp.dot(h, whh, preferred_element_type=jnp.float32)
    ifo = jax.nn.sigmoid(gates[:, :3 * H])       # one wide EUP pass (B, 3H)
    g = jnp.tanh(gates[:, 3 * H:])               # (B, H)
    i = ifo[:, 0 * H:1 * H]
    f = ifo[:, 1 * H:2 * H]
    o = ifo[:, 2 * H:3 * H]
    c_new = f * c + i * g
    h_new = o * jnp.tanh(c_new)
    return h_new, c_new


def lstm_ae_kernel(x_ref,                          # (B, T, D) batch-major input
                   wih_e_ref, whh_e_ref, b_e_ref,  # encoder LSTM ([i|f|o|g])
                   wih_d_ref, whh_d_ref, b_d_ref,  # decoder LSTM ([i|f|o|g])
                   w_head_ref, b_head_ref,         # fused [output | next] head (H, D+1)
                   x_tilde_ref,                    # (B, T*D) lane-dense reconstruction
                   y_hat_ref):                     # (B, 1) next-step prediction
    B, T, D = x_ref.shape
    H = whh_e_ref.shape[0]

    # ---- Encoder -----------------------------------------------------------
    # Hoisted input projection: one (B*T, D) @ (D, 4H) MXU matmul; the
    # recurrent loop below only carries h @ W_hh + gate nonlinearities.
    # (B, T, D) -> (B*T, D) is a contiguous row-major merge (free relayout).
    x_flat = x_ref[...].reshape(B * T, D)
    x_proj = (jnp.dot(x_flat, wih_e_ref[...],
                      preferred_element_type=jnp.float32)
              + b_e_ref[...]).reshape(B, T, 4 * H)

    whh_e = whh_e_ref[...]
    h = jnp.zeros((B, H), jnp.float32)
    c = jnp.zeros((B, H), jnp.float32)
    for t in range(T):                             # fully unrolled (T static)
        # static slice; off the serial dependence chain, schedulable early
        h, c = _lstm_cell_ifog(x_proj[:, t, :], h, c, whh_e, H)
    z = h                                          # (B, H) latent

    # ---- Decoder + streamed reconstruction / prediction head ---------------
    whh_d = whh_d_ref[...]
    w_head = w_head_ref[...]                       # (H, D+1) = [w_out | w_next]
    b_head = b_head_ref[...]                       # (1, D+1)
    # Decoder input is z at every step -> its input projection is constant.
    z_proj = (jnp.dot(z, wih_d_ref[...], preferred_element_type=jnp.float32)
              + b_d_ref[...])

    h = jnp.zeros((B, H), jnp.float32)
    c = jnp.zeros((B, H), jnp.float32)
    for t in range(T):                             # fully unrolled
        h, c = _lstm_cell_ifog(z_proj, h, c, whh_d, H)
        # Fused head on the live-register h (no VMEM scratch round trip).
        # Steps 0..T-2 overlap with later recurrence steps; only the last
        # step's head work is on the tail of the critical path.
        head_t = (jnp.dot(h, w_head, preferred_element_type=jnp.float32)
                  + b_head)                        # (B, D+1)
        x_tilde_ref[:, t * D:(t + 1) * D] = head_t[:, :D].astype(
            x_tilde_ref.dtype)

    # next_step_layer output = the extra head column of the last decoder step.
    y_hat_ref[...] = head_t[:, D:].astype(y_hat_ref.dtype)


# ----------------------------------------------------------------------------
# Wrapper
# ----------------------------------------------------------------------------
def lstm_autoencoder_forward(kparams, x):
    """x: (B, T, D) float32 -> (x_tilde (B, T, D), y_hat (B, 1)).

    `kparams` must come from pack_params_for_kernel (gate columns [i|f|o|g],
    fused head weight).  Best throughput when B is a multiple of 8 (full f32
    sublane tile); other B still runs correctly on partially filled tiles.
    """
    if kparams.get("gate_layout") != "ifog":
        raise ValueError(
            "kernel-layout params required: call pack_params_for_kernel() "
            "on the raw (PyTorch-order) parameters first.")
    B, T, D = x.shape

    vmem = pl.BlockSpec(memory_space=pltpu.MemorySpace.VMEM)
    args = (x,
            kparams["wih_e"], kparams["whh_e"], kparams["b_e"],
            kparams["wih_d"], kparams["whh_d"], kparams["b_d"],
            kparams["w_head"], kparams["b_head"])

    x_tilde_flat, y_hat = pl.pallas_call(
        lstm_ae_kernel,
        out_shape=(jax.ShapeDtypeStruct((B, T * D), x.dtype),
                   jax.ShapeDtypeStruct((B, 1), x.dtype)),
        in_specs=[vmem] * len(args),
        out_specs=(vmem, vmem),
    )(*args)

    # (B, T*D) -> (B, T, D) over contiguous dims is a free bitcast reshape —
    # the only remaining op outside the kernel (no pad/transpose/slice HLOs).
    return x_tilde_flat.reshape(B, T, D), y_hat


# ----------------------------------------------------------------------------
# Parameter init (PyTorch layout: gate order [i|f|g|o], combined b_ih+b_hh,
# stored transposed for right-multiplication) and kernel-layout packing.
# ----------------------------------------------------------------------------
def init_params(key, input_size, hidden_size):
    D, H = input_size, hidden_size
    k = 1.0 / jnp.sqrt(jnp.asarray(H, jnp.float32))
    keys = jax.random.split(key, 12)

    def u(kk, shape, scale):
        return jax.random.uniform(kk, shape, jnp.float32, -scale, scale)

    return {
        # encoder LSTM
        "wih_e": u(keys[0], (D, 4 * H), k),
        "whh_e": u(keys[1], (H, 4 * H), k),
        "b_e":   u(keys[2], (1, 4 * H), k) + u(keys[3], (1, 4 * H), k),
        # decoder LSTM (input dim = H)
        "wih_d": u(keys[4], (H, 4 * H), k),
        "whh_d": u(keys[5], (H, 4 * H), k),
        "b_d":   u(keys[6], (1, 4 * H), k) + u(keys[7], (1, 4 * H), k),
        # output_layer: Linear(H, D)
        "w_out": u(keys[8], (H, D), k),
        "b_out": u(keys[9], (1, D), k),
        # next_step_layer: Linear(H, 1)
        "w_next": u(keys[10], (H, 1), k),
        "b_next": u(keys[11], (1, 1), k),
    }


def _reorder_ifgo_to_ifog(w):
    """Permute gate columns [i|f|g|o] -> [i|f|o|g] (last axis, width 4H)."""
    H = w.shape[-1] // 4
    return jnp.concatenate(
        [w[..., :2 * H], w[..., 3 * H:4 * H], w[..., 2 * H:3 * H]], axis=-1)


def pack_params_for_kernel(params):
    """One-time preprocessing: reorder LSTM gate columns to [i|f|o|g] and fuse
    output_layer / next_step_layer into a single (H, D+1) head weight."""
    p = {}
    for k in ("wih_e", "whh_e", "b_e", "wih_d", "whh_d", "b_d"):
        p[k] = _reorder_ifgo_to_ifog(params[k])
    p["w_head"] = jnp.concatenate([params["w_out"], params["w_next"]], axis=1)
    p["b_head"] = jnp.concatenate([params["b_out"], params["b_next"]], axis=1)
    p["gate_layout"] = "ifog"        # guards against raw (PyTorch-order) params
    return p


# ----------------------------------------------------------------------------
# Pure-JAX reference (PyTorch gate order) for correctness checking
# ----------------------------------------------------------------------------
def reference_forward(params, x):
    B, T, D = x.shape
    H = params["whh_e"].shape[0]

    def cell(x_proj, h, c, whh):
        gates = x_proj + h @ whh
        i = jax.nn.sigmoid(gates[:, 0 * H:1 * H])
        f = jax.nn.sigmoid(gates[:, 1 * H:2 * H])
        g = jnp.tanh(gates[:, 2 * H:3 * H])
        o = jax.nn.sigmoid(gates[:, 3 * H:4 * H])
        c = f * c + i * g
        h = o * jnp.tanh(c)
        return h, c

    h = jnp.zeros((B, H), jnp.float32)
    c = jnp.zeros((B, H), jnp.float32)
    for t in range(T):
        h, c = cell(x[:, t, :] @ params["wih_e"] + params["b_e"],
                    h, c, params["whh_e"])
    z = h

    h = jnp.zeros((B, H), jnp.float32)
    c = jnp.zeros((B, H), jnp.float32)
    z_proj = z @ params["wih_d"] + params["b_d"]
    dec_outs = []
    for _ in range(T):
        h, c = cell(z_proj, h, c, params["whh_d"])
        dec_outs.append(h)
    dec = jnp.stack(dec_outs, axis=1)              # (B, T, H)
    x_tilde = dec @ params["w_out"] + params["b_out"]
    y_hat = dec[:, -1, :] @ params["w_next"] + params["b_next"]
    return x_tilde, y_hat


# ----------------------------------------------------------------------------
if __name__ == "__main__":
    key = jax.random.PRNGKey(0)
    B, T, D, H = 8, 8, 16, 32      # batch (full f32 sublane tile), seq, input, hidden

    params = init_params(key, D, H)
    kparams = pack_params_for_kernel(params)       # one-time layout packing
    x = jax.random.normal(jax.random.fold_in(key, 999), (B, T, D), jnp.float32)

    fwd = jax.jit(functools.partial(lstm_autoencoder_forward, kparams))
    x_tilde, y_hat = fwd(x)
    jax.block_until_ready((x_tilde, y_hat))

    x_tilde_ref, y_hat_ref = reference_forward(params, x)
    assert x_tilde.shape == (B, T, D) and y_hat.shape == (B, 1)
    assert jnp.allclose(x_tilde, x_tilde_ref, atol=1e-4, rtol=1e-4)
    assert jnp.allclose(y_hat, y_hat_ref, atol=1e-4, rtol=1e-4)

    print("KERNEL_OK")
</pallas_src>

<mosaic_0001>
module attributes {stable_mosaic.version = 11 : i64} {
  func.func @lstm_ae_kernel(%arg0: memref<8x8x16xf32, #tpu.memory_space<vmem>>, %arg1: memref<16x128xf32, #tpu.memory_space<vmem>>, %arg2: memref<32x128xf32, #tpu.memory_space<vmem>>, %arg3: memref<1x128xf32, #tpu.memory_space<vmem>>, %arg4: memref<32x128xf32, #tpu.memory_space<vmem>>, %arg5: memref<32x128xf32, #tpu.memory_space<vmem>>, %arg6: memref<1x128xf32, #tpu.memory_space<vmem>>, %arg7: memref<32x17xf32, #tpu.memory_space<vmem>>, %arg8: memref<1x17xf32, #tpu.memory_space<vmem>>, %arg9: memref<8x128xf32, #tpu.memory_space<vmem>>, %arg10: memref<8x1xf32, #tpu.memory_space<vmem>>) attributes {dimension_semantics = [], scalar_prefetch = 0 : i64, scratch_operands = 0 : i64, tpu.core_type = #tpu.core_type<tc>} {
    %c0 = arith.constant 0 : index
    %c0_0 = arith.constant 0 : index
    %c0_1 = arith.constant 0 : index
    %0 = vector.load %arg0[%c0, %c0_0, %c0_1] : memref<8x8x16xf32, #tpu.memory_space<vmem>>, vector<8x8x16xf32>
    %1 = vector.shape_cast %0 : vector<8x8x16xf32> to vector<64x16xf32>
    %c0_2 = arith.constant 0 : index
    %c0_3 = arith.constant 0 : index
    %2 = vector.load %arg1[%c0_2, %c0_3] : memref<16x128xf32, #tpu.memory_space<vmem>>, vector<16x128xf32>
    %cst = arith.constant dense<0.000000e+00> : vector<64x128xf32>
    %3 = tpu.matmul %1, %2, %cst {dimension_numbers = #tpu.dot_dimension_numbers<[1], [0], [0], [1], [0, 0, 1, 1], [], []>} : vector<64x16xf32>, vector<16x128xf32>, vector<64x128xf32> -> vector<64x128xf32>
    %c0_4 = arith.constant 0 : index
    %c0_5 = arith.constant 0 : index
    %4 = vector.load %arg3[%c0_4, %c0_5] : memref<1x128xf32, #tpu.memory_space<vmem>>, vector<1x128xf32>
    %5 = vector.broadcast %4 : vector<1x128xf32> to vector<64x128xf32>
    %6 = arith.addf %3, %5 : vector<64x128xf32>
    %7 = vector.shape_cast %6 : vector<64x128xf32> to vector<8x8x128xf32>
    %c0_6 = arith.constant 0 : index
    %c0_7 = arith.constant 0 : index
    %8 = vector.load %arg2[%c0_6, %c0_7] : memref<32x128xf32, #tpu.memory_space<vmem>>, vector<32x128xf32>
    %cst_8 = arith.constant 0.000000e+00 : f32
    %9 = vector.broadcast %cst_8 : f32 to vector<8x32xf32>
    %cst_9 = arith.constant 0.000000e+00 : f32
    %10 = vector.broadcast %cst_9 : f32 to vector<8x32xf32>
    %11 = vector.extract_strided_slice %7 {offsets = [0, 0, 0], sizes = [8, 1, 128], strides = [1, 1, 1]} : vector<8x8x128xf32> to vector<8x1x128xf32>
    %12 = vector.shape_cast %11 : vector<8x1x128xf32> to vector<8x128xf32>
    %cst_10 = arith.constant dense<0.000000e+00> : vector<8x128xf32>
    %13 = tpu.matmul %9, %8, %cst_10 {dimension_numbers = #tpu.dot_dimension_numbers<[1], [0], [0], [1], [0, 0, 1, 1], [], []>} : vector<8x32xf32>, vector<32x128xf32>, vector<8x128xf32> -> vector<8x128xf32>
    %14 = arith.addf %12, %13 : vector<8x128xf32>
    %15 = vector.extract_strided_slice %14 {offsets = [0, 0], sizes = [8, 96], strides = [1, 1]} : vector<8x128xf32> to vector<8x96xf32>
    %16 = arith.negf %15 : vector<8x96xf32>
    %17 = math.exp %16 : vector<8x96xf32>
    %cst_11 = arith.constant 1.000000e+00 : f32
    %18 = vector.broadcast %cst_11 : f32 to vector<8x96xf32>
    %19 = arith.addf %18, %17 : vector<8x96xf32>
    %20 = arith.divf %18, %19 : vector<8x96xf32>
    %21 = vector.extract_strided_slice %14 {offsets = [0, 96], sizes = [8, 32], strides = [1, 1]} : vector<8x128xf32> to vector<8x32xf32>
    %22 = math.tanh %21 : vector<8x32xf32>
    %23 = vector.extract_strided_slice %20 {offsets = [0, 0], sizes = [8, 32], strides = [1, 1]} : vector<8x96xf32> to vector<8x32xf32>
    %24 = vector.extract_strided_slice %20 {offsets = [0, 32], sizes = [8, 32], strides = [1, 1]} : vector<8x96xf32> to vector<8x32xf32>
    %25 = vector.extract_strided_slice %20 {offsets = [0, 64], sizes = [8, 32], strides = [1, 1]} : vector<8x96xf32> to vector<8x32xf32>
    %26 = arith.mulf %24, %10 : vector<8x32xf32>
    %27 = arith.mulf %23, %22 : vector<8x32xf32>
    %28 = arith.addf %26, %27 : vector<8x32xf32>
    %29 = math.tanh %28 : vector<8x32xf32>
    %30 = arith.mulf %25, %29 : vector<8x32xf32>
    %31 = vector.extract_strided_slice %7 {offsets = [0, 1, 0], sizes = [8, 1, 128], strides = [1, 1, 1]} : vector<8x8x128xf32> to vector<8x1x128xf32>
    %32 = vector.shape_cast %31 : vector<8x1x128xf32> to vector<8x128xf32>
    %cst_12 = arith.constant dense<0.000000e+00> : vector<8x128xf32>
    %33 = tpu.matmul %30, %8, %cst_12 {dimension_numbers = #tpu.dot_dimension_numbers<[1], [0], [0], [1], [0, 0, 1, 1], [], []>} : vector<8x32xf32>, vector<32x128xf32>, vector<8x128xf32> -> vector<8x128xf32>
    %34 = arith.addf %32, %33 : vector<8x128xf32>
    %35 = vector.extract_strided_slice %34 {offsets = [0, 0], sizes = [8, 96], strides = [1, 1]} : vector<8x128xf32> to vector<8x96xf32>
    %36 = arith.negf %35 : vector<8x96xf32>
    %37 = math.exp %36 : vector<8x96xf32>
    %cst_13 = arith.constant 1.000000e+00 : f32
    %38 = vector.broadcast %cst_13 : f32 to vector<8x96xf32>
    %39 = arith.addf %38, %37 : vector<8x96xf32>
    %40 = arith.divf %38, %39 : vector<8x96xf32>
    %41 = vector.extract_strided_slice %34 {offsets = [0, 96], sizes = [8, 32], strides = [1, 1]} : vector<8x128xf32> to vector<8x32xf32>
    %42 = math.tanh %41 : vector<8x32xf32>
    %43 = vector.extract_strided_slice %40 {offsets = [0, 0], sizes = [8, 32], strides = [1, 1]} : vector<8x96xf32> to vector<8x32xf32>
    %44 = vector.extract_strided_slice %40 {offsets = [0, 32], sizes = [8, 32], strides = [1, 1]} : vector<8x96xf32> to vector<8x32xf32>
    %45 = vector.extract_strided_slice %40 {offsets = [0, 64], sizes = [8, 32], strides = [1, 1]} : vector<8x96xf32> to vector<8x32xf32>
    %46 = arith.mulf %44, %28 : vector<8x32xf32>
    %47 = arith.mulf %43, %42 : vector<8x32xf32>
    %48 = arith.addf %46, %47 : vector<8x32xf32>
    %49 = math.tanh %48 : vector<8x32xf32>
    %50 = arith.mulf %45, %49 : vector<8x32xf32>
    %51 = vector.extract_strided_slice %7 {offsets = [0, 2, 0], sizes = [8, 1, 128], strides = [1, 1, 1]} : vector<8x8x128xf32> to vector<8x1x128xf32>
    %52 = vector.shape_cast %51 : vector<8x1x128xf32> to vector<8x128xf32>
    %cst_14 = arith.constant dense<0.000000e+00> : vector<8x128xf32>
    %53 = tpu.matmul %50, %8, %cst_14 {dimension_numbers = #tpu.dot_dimension_numbers<[1], [0], [0], [1], [0, 0, 1, 1], [], []>} : vector<8x32xf32>, vector<32x128xf32>, vector<8x128xf32> -> vector<8x128xf32>
    %54 = arith.addf %52, %53 : vector<8x128xf32>
    %55 = vector.extract_strided_slice %54 {offsets = [0, 0], sizes = [8, 96], strides = [1, 1]} : vector<8x128xf32> to vector<8x96xf32>
    %56 = arith.negf %55 : vector<8x96xf32>
    %57 = math.exp %56 : vector<8x96xf32>
    %cst_15 = arith.constant 1.000000e+00 : f32
    %58 = vector.broadcast %cst_15 : f32 to vector<8x96xf32>
    %59 = arith.addf %58, %57 : vector<8x96xf32>
    %60 = arith.divf %58, %59 : vector<8x96xf32>
    %61 = vector.extract_strided_slice %54 {offsets = [0, 96], sizes = [8, 32], strides = [1, 1]} : vector<8x128xf32> to vector<8x32xf32>
    %62 = math.tanh %61 : vector<8x32xf32>
    %63 = vector.extract_strided_slice %60 {offsets = [0, 0], sizes = [8, 32], strides = [1, 1]} : vector<8x96xf32> to vector<8x32xf32>
    %64 = vector.extract_strided_slice %60 {offsets = [0, 32], sizes = [8, 32], strides = [1, 1]} : vector<8x96xf32> to vector<8x32xf32>
    %65 = vector.extract_strided_slice %60 {offsets = [0, 64], sizes = [8, 32], strides = [1, 1]} : vector<8x96xf32> to vector<8x32xf32>
    %66 = arith.mulf %64, %48 : vector<8x32xf32>
    %67 = arith.mulf %63, %62 : vector<8x32xf32>
    %68 = arith.addf %66, %67 : vector<8x32xf32>
    %69 = math.tanh %68 : vector<8x32xf32>
    %70 = arith.mulf %65, %69 : vector<8x32xf32>
    %71 = vector.extract_strided_slice %7 {offsets = [0, 3, 0], sizes = [8, 1, 128], strides = [1, 1, 1]} : vector<8x8x128xf32> to vector<8x1x128xf32>
    %72 = vector.shape_cast %71 : vector<8x1x128xf32> to vector<8x128xf32>
    %cst_16 = arith.constant dense<0.000000e+00> : vector<8x128xf32>
    %73 = tpu.matmul %70, %8, %cst_16 {dimension_numbers = #tpu.dot_dimension_numbers<[1], [0], [0], [1], [0, 0, 1, 1], [], []>} : vector<8x32xf32>, vector<32x128xf32>, vector<8x128xf32> -> vector<8x128xf32>
    %74 = arith.addf %72, %73 : vector<8x128xf32>
    %75 = vector.extract_strided_slice %74 {offsets = [0, 0], sizes = [8, 96], strides = [1, 1]} : vector<8x128xf32> to vector<8x96xf32>
    %76 = arith.negf %75 : vector<8x96xf32>
    %77 = math.exp %76 : vector<8x96xf32>
    %cst_17 = arith.constant 1.000000e+00 : f32
    %78 = vector.broadcast %cst_17 : f32 to vector<8x96xf32>
    %79 = arith.addf %78, %77 : vector<8x96xf32>
    %80 = arith.divf %78, %79 : vector<8x96xf32>
    %81 = vector.extract_strided_slice %74 {offsets = [0, 96], sizes = [8, 32], strides = [1, 1]} : vector<8x128xf32> to vector<8x32xf32>
    %82 = math.tanh %81 : vector<8x32xf32>
    %83 = vector.extract_strided_slice %80 {offsets = [0, 0], sizes = [8, 32], strides = [1, 1]} : vector<8x96xf32> to vector<8x32xf32>
    %84 = vector.extract_strided_slice %80 {offsets = [0, 32], sizes = [8, 32], strides = [1, 1]} : vector<8x96xf32> to vector<8x32xf32>
    %85 = vector.extract_strided_slice %80 {offsets = [0, 64], sizes = [8, 32], strides = [1, 1]} : vector<8x96xf32> to vector<8x32xf32>
    %86 = arith.mulf %84, %68 : vector<8x32xf32>
    %87 = arith.mulf %83, %82 : vector<8x32xf32>
    %88 = arith.addf %86, %87 : vector<8x32xf32>
    %89 = math.tanh %88 : vector<8x32xf32>
    %90 = arith.mulf %85, %89 : vector<8x32xf32>
    %91 = vector.extract_strided_slice %7 {offsets = [0, 4, 0], sizes = [8, 1, 128], strides = [1, 1, 1]} : vector<8x8x128xf32> to vector<8x1x128xf32>
    %92 = vector.shape_cast %91 : vector<8x1x128xf32> to vector<8x128xf32>
    %cst_18 = arith.constant dense<0.000000e+00> : vector<8x128xf32>
    %93 = tpu.matmul %90, %8, %cst_18 {dimension_numbers = #tpu.dot_dimension_numbers<[1], [0], [0], [1], [0, 0, 1, 1], [], []>} : vector<8x32xf32>, vector<32x128xf32>, vector<8x128xf32> -> vector<8x128xf32>
    %94 = arith.addf %92, %93 : vector<8x128xf32>
    %95 = vector.extract_strided_slice %94 {offsets = [0, 0], sizes = [8, 96], strides = [1, 1]} : vector<8x128xf32> to vector<8x96xf32>
    %96 = arith.negf %95 : vector<8x96xf32>
    %97 = math.exp %96 : vector<8x96xf32>
    %cst_19 = arith.constant 1.000000e+00 : f32
    %98 = vector.broadcast %cst_19 : f32 to vector<8x96xf32>
    %99 = arith.addf %98, %97 : vector<8x96xf32>
    %100 = arith.divf %98, %99 : vector<8x96xf32>
    %101 = vector.extract_strided_slice %94 {offsets = [0, 96], sizes = [8, 32], strides = [1, 1]} : vector<8x128xf32> to vector<8x32xf32>
    %102 = math.tanh %101 : vector<8x32xf32>
    %103 = vector.extract_strided_slice %100 {offsets = [0, 0], sizes = [8, 32], strides = [1, 1]} : vector<8x96xf32> to vector<8x32xf32>
    %104 = vector.extract_strided_slice %100 {offsets = [0, 32], sizes = [8, 32], strides = [1, 1]} : vector<8x96xf32> to vector<8x32xf32>
    %105 = vector.extract_strided_slice %100 {offsets = [0, 64], sizes = [8, 32], strides = [1, 1]} : vector<8x96xf32> to vector<8x32xf32>
    %106 = arith.mulf %104, %88 : vector<8x32xf32>
    %107 = arith.mulf %103, %102 : vector<8x32xf32>
    %108 = arith.addf %106, %107 : vector<8x32xf32>
    %109 = math.tanh %108 : vector<8x32xf32>
    %110 = arith.mulf %105, %109 : vector<8x32xf32>
    %111 = vector.extract_strided_slice %7 {offsets = [0, 5, 0], sizes = [8, 1, 128], strides = [1, 1, 1]} : vector<8x8x128xf32> to vector<8x1x128xf32>
    %112 = vector.shape_cast %111 : vector<8x1x128xf32> to vector<8x128xf32>
    %cst_20 = arith.constant dense<0.000000e+00> : vector<8x128xf32>
    %113 = tpu.matmul %110, %8, %cst_20 {dimension_numbers = #tpu.dot_dimension_numbers<[1], [0], [0], [1], [0, 0, 1, 1], [], []>} : vector<8x32xf32>, vector<32x128xf32>, vector<8x128xf32> -> vector<8x128xf32>
    %114 = arith.addf %112, %113 : vector<8x128xf32>
    %115 = vector.extract_strided_slice %114 {offsets = [0, 0], sizes = [8, 96], strides = [1, 1]} : vector<8x128xf32> to vector<8x96xf32>
    %116 = arith.negf %115 : vector<8x96xf32>
    %117 = math.exp %116 : vector<8x96xf32>
    %cst_21 = arith.constant 1.000000e+00 : f32
    %118 = vector.broadcast %cst_21 : f32 to vector<8x96xf32>
    %119 = arith.addf %118, %117 : vector<8x96xf32>
    %120 = arith.divf %118, %119 : vector<8x96xf32>
    %121 = vector.extract_strided_slice %114 {offsets = [0, 96], sizes = [8, 32], strides = [1, 1]} : vector<8x128xf32> to vector<8x32xf32>
    %122 = math.tanh %121 : vector<8x32xf32>
    %123 = vector.extract_strided_slice %120 {offsets = [0, 0], sizes = [8, 32], strides = [1, 1]} : vector<8x96xf32> to vector<8x32xf32>
    %124 = vector.extract_strided_slice %120 {offsets = [0, 32], sizes = [8, 32], strides = [1, 1]} : vector<8x96xf32> to vector<8x32xf32>
    %125 = vector.extract_strided_slice %120 {offsets = [0, 64], sizes = [8, 32], strides = [1, 1]} : vector<8x96xf32> to vector<8x32xf32>
    %126 = arith.mulf %124, %108 : vector<8x32xf32>
    %127 = arith.mulf %123, %122 : vector<8x32xf32>
    %128 = arith.addf %126, %127 : vector<8x32xf32>
    %129 = math.tanh %128 : vector<8x32xf32>
    %130 = arith.mulf %125, %129 : vector<8x32xf32>
    %131 = vector.extract_strided_slice %7 {offsets = [0, 6, 0], sizes = [8, 1, 128], strides = [1, 1, 1]} : vector<8x8x128xf32> to vector<8x1x128xf32>
    %132 = vector.shape_cast %131 : vector<8x1x128xf32> to vector<8x128xf32>
    %cst_22 = arith.constant dense<0.000000e+00> : vector<8x128xf32>
    %133 = tpu.matmul %130, %8, %cst_22 {dimension_numbers = #tpu.dot_dimension_numbers<[1], [0], [0], [1], [0, 0, 1, 1], [], []>} : vector<8x32xf32>, vector<32x128xf32>, vector<8x128xf32> -> vector<8x128xf32>
    %134 = arith.addf %132, %133 : vector<8x128xf32>
    %135 = vector.extract_strided_slice %134 {offsets = [0, 0], sizes = [8, 96], strides = [1, 1]} : vector<8x128xf32> to vector<8x96xf32>
    %136 = arith.negf %135 : vector<8x96xf32>
    %137 = math.exp %136 : vector<8x96xf32>
    %cst_23 = arith.constant 1.000000e+00 : f32
    %138 = vector.broadcast %cst_23 : f32 to vector<8x96xf32>
    %139 = arith.addf %138, %137 : vector<8x96xf32>
    %140 = arith.divf %138, %139 : vector<8x96xf32>
    %141 = vector.extract_strided_slice %134 {offsets = [0, 96], sizes = [8, 32], strides = [1, 1]} : vector<8x128xf32> to vector<8x32xf32>
    %142 = math.tanh %141 : vector<8x32xf32>
    %143 = vector.extract_strided_slice %140 {offsets = [0, 0], sizes = [8, 32], strides = [1, 1]} : vector<8x96xf32> to vector<8x32xf32>
    %144 = vector.extract_strided_slice %140 {offsets = [0, 32], sizes = [8, 32], strides = [1, 1]} : vector<8x96xf32> to vector<8x32xf32>
    %145 = vector.extract_strided_slice %140 {offsets = [0, 64], sizes = [8, 32], strides = [1, 1]} : vector<8x96xf32> to vector<8x32xf32>
    %146 = arith.mulf %144, %128 : vector<8x32xf32>
    %147 = arith.mulf %143, %142 : vector<8x32xf32>
    %148 = arith.addf %146, %147 : vector<8x32xf32>
    %149 = math.tanh %148 : vector<8x32xf32>
    %150 = arith.mulf %145, %149 : vector<8x32xf32>
    %151 = vector.extract_strided_slice %7 {offsets = [0, 7, 0], sizes = [8, 1, 128], strides = [1, 1, 1]} : vector<8x8x128xf32> to vector<8x1x128xf32>
    %152 = vector.shape_cast %151 : vector<8x1x128xf32> to vector<8x128xf32>
    %cst_24 = arith.constant dense<0.000000e+00> : vector<8x128xf32>
    %153 = tpu.matmul %150, %8, %cst_24 {dimension_numbers = #tpu.dot_dimension_numbers<[1], [0], [0], [1], [0, 0, 1, 1], [], []>} : vector<8x32xf32>, vector<32x128xf32>, vector<8x128xf32> -> vector<8x128xf32>
    %154 = arith.addf %152, %153 : vector<8x128xf32>
    %155 = vector.extract_strided_slice %154 {offsets = [0, 0], sizes = [8, 96], strides = [1, 1]} : vector<8x128xf32> to vector<8x96xf32>
    %156 = arith.negf %155 : vector<8x96xf32>
    %157 = math.exp %156 : vector<8x96xf32>
    %cst_25 = arith.constant 1.000000e+00 : f32
    %158 = vector.broadcast %cst_25 : f32 to vector<8x96xf32>
    %159 = arith.addf %158, %157 : vector<8x96xf32>
    %160 = arith.divf %158, %159 : vector<8x96xf32>
    %161 = vector.extract_strided_slice %154 {offsets = [0, 96], sizes = [8, 32], strides = [1, 1]} : vector<8x128xf32> to vector<8x32xf32>
    %162 = math.tanh %161 : vector<8x32xf32>
    %163 = vector.extract_strided_slice %160 {offsets = [0, 0], sizes = [8, 32], strides = [1, 1]} : vector<8x96xf32> to vector<8x32xf32>
    %164 = vector.extract_strided_slice %160 {offsets = [0, 32], sizes = [8, 32], strides = [1, 1]} : vector<8x96xf32> to vector<8x32xf32>
    %165 = vector.extract_strided_slice %160 {offsets = [0, 64], sizes = [8, 32], strides = [1, 1]} : vector<8x96xf32> to vector<8x32xf32>
    %166 = arith.mulf %164, %148 : vector<8x32xf32>
    %167 = arith.mulf %163, %162 : vector<8x32xf32>
    %168 = arith.addf %166, %167 : vector<8x32xf32>
    %169 = math.tanh %168 : vector<8x32xf32>
    %170 = arith.mulf %165, %169 : vector<8x32xf32>
    %c0_26 = arith.constant 0 : index
    %c0_27 = arith.constant 0 : index
    %171 = vector.load %arg5[%c0_26, %c0_27] : memref<32x128xf32, #tpu.memory_space<vmem>>, vector<32x128xf32>
    %c0_28 = arith.constant 0 : index
    %c0_29 = arith.constant 0 : index
    %172 = vector.load %arg7[%c0_28, %c0_29] : memref<32x17xf32, #tpu.memory_space<vmem>>, vector<32x17xf32>
    %c0_30 = arith.constant 0 : index
    %c0_31 = arith.constant 0 : index
    %173 = vector.load %arg8[%c0_30, %c0_31] : memref<1x17xf32, #tpu.memory_space<vmem>>, vector<1x17xf32>
    %c0_32 = arith.constant 0 : index
    %c0_33 = arith.constant 0 : index
    %174 = vector.load %arg4[%c0_32, %c0_33] : memref<32x128xf32, #tpu.memory_space<vmem>>, vector<32x128xf32>
    %cst_34 = arith.constant dense<0.000000e+00> : vector<8x128xf32>
    %175 = tpu.matmul %170, %174, %cst_34 {dimension_numbers = #tpu.dot_dimension_numbers<[1], [0], [0], [1], [0, 0, 1, 1], [], []>} : vector<8x32xf32>, vector<32x128xf32>, vector<8x128xf32> -> vector<8x128xf32>
    %c0_35 = arith.constant 0 : index
    %c0_36 = arith.constant 0 : index
    %176 = vector.load %arg6[%c0_35, %c0_36] : memref<1x128xf32, #tpu.memory_space<vmem>>, vector<1x128xf32>
    %177 = vector.broadcast %176 : vector<1x128xf32> to vector<8x128xf32>
    %178 = arith.addf %175, %177 : vector<8x128xf32>
    %cst_37 = arith.constant 0.000000e+00 : f32
    %179 = vector.broadcast %cst_37 : f32 to vector<8x32xf32>
    %cst_38 = arith.constant 0.000000e+00 : f32
    %180 = vector.broadcast %cst_38 : f32 to vector<8x32xf32>
    %cst_39 = arith.constant dense<0.000000e+00> : vector<8x128xf32>
    %181 = tpu.matmul %179, %171, %cst_39 {dimension_numbers = #tpu.dot_dimension_numbers<[1], [0], [0], [1], [0, 0, 1, 1], [], []>} : vector<8x32xf32>, vector<32x128xf32>, vector<8x128xf32> -> vector<8x128xf32>
    %182 = arith.addf %178, %181 : vector<8x128xf32>
    %183 = vector.extract_strided_slice %182 {offsets = [0, 0], sizes = [8, 96], strides = [1, 1]} : vector<8x128xf32> to vector<8x96xf32>
    %184 = arith.negf %183 : vector<8x96xf32>
    %185 = math.exp %184 : vector<8x96xf32>
    %cst_40 = arith.constant 1.000000e+00 : f32
    %186 = vector.broadcast %cst_40 : f32 to vector<8x96xf32>
    %187 = arith.addf %186, %185 : vector<8x96xf32>
    %188 = arith.divf %186, %187 : vector<8x96xf32>
    %189 = vector.extract_strided_slice %182 {offsets = [0, 96], sizes = [8, 32], strides = [1, 1]} : vector<8x128xf32> to vector<8x32xf32>
    %190 = math.tanh %189 : vector<8x32xf32>
    %191 = vector.extract_strided_slice %188 {offsets = [0, 0], sizes = [8, 32], strides = [1, 1]} : vector<8x96xf32> to vector<8x32xf32>
    %192 = vector.extract_strided_slice %188 {offsets = [0, 32], sizes = [8, 32], strides = [1, 1]} : vector<8x96xf32> to vector<8x32xf32>
    %193 = vector.extract_strided_slice %188 {offsets = [0, 64], sizes = [8, 32], strides = [1, 1]} : vector<8x96xf32> to vector<8x32xf32>
    %194 = arith.mulf %192, %180 : vector<8x32xf32>
    %195 = arith.mulf %191, %190 : vector<8x32xf32>
    %196 = arith.addf %194, %195 : vector<8x32xf32>
    %197 = math.tanh %196 : vector<8x32xf32>
    %198 = arith.mulf %193, %197 : vector<8x32xf32>
    %cst_41 = arith.constant dense<0.000000e+00> : vector<8x17xf32>
    %199 = tpu.matmul %198, %172, %cst_41 {dimension_numbers = #tpu.dot_dimension_numbers<[1], [0], [0], [1], [0, 0, 1, 1], [], []>} : vector<8x32xf32>, vector<32x17xf32>, vector<8x17xf32> -> vector<8x17xf32>
    %200 = vector.broadcast %173 : vector<1x17xf32> to vector<8x17xf32>
    %201 = arith.addf %199, %200 : vector<8x17xf32>
    %202 = vector.extract_strided_slice %201 {offsets = [0, 0], sizes = [8, 16], strides = [1, 1]} : vector<8x17xf32> to vector<8x16xf32>
    %c0_42 = arith.constant 0 : index
    %c0_43 = arith.constant 0 : index
    %203 = vector.load %arg9[%c0_42, %c0_43] : memref<8x128xf32, #tpu.memory_space<vmem>>, vector<8x16xf32>
    tpu.vector_store %arg9[%c0_42, %c0_43], %202 {strides = array<i32>} : memref<8x128xf32, #tpu.memory_space<vmem>>, vector<8x16xf32>,
    %cst_44 = arith.constant dense<0.000000e+00> : vector<8x128xf32>
    %204 = tpu.matmul %198, %171, %cst_44 {dimension_numbers = #tpu.dot_dimension_numbers<[1], [0], [0], [1], [0, 0, 1, 1], [], []>} : vector<8x32xf32>, vector<32x128xf32>, vector<8x128xf32> -> vector<8x128xf32>
    %205 = arith.addf %178, %204 : vector<8x128xf32>
    %206 = vector.extract_strided_slice %205 {offsets = [0, 0], sizes = [8, 96], strides = [1, 1]} : vector<8x128xf32> to vector<8x96xf32>
    %207 = arith.negf %206 : vector<8x96xf32>
    %208 = math.exp %207 : vector<8x96xf32>
    %cst_45 = arith.constant 1.000000e+00 : f32
    %209 = vector.broadcast %cst_45 : f32 to vector<8x96xf32>
    %210 = arith.addf %209, %208 : vector<8x96xf32>
    %211 = arith.divf %209, %210 : vector<8x96xf32>
    %212 = vector.extract_strided_slice %205 {offsets = [0, 96], sizes = [8, 32], strides = [1, 1]} : vector<8x128xf32> to vector<8x32xf32>
    %213 = math.tanh %212 : vector<8x32xf32>
    %214 = vector.extract_strided_slice %211 {offsets = [0, 0], sizes = [8, 32], strides = [1, 1]} : vector<8x96xf32> to vector<8x32xf32>
    %215 = vector.extract_strided_slice %211 {offsets = [0, 32], sizes = [8, 32], strides = [1, 1]} : vector<8x96xf32> to vector<8x32xf32>
    %216 = vector.extract_strided_slice %211 {offsets = [0, 64], sizes = [8, 32], strides = [1, 1]} : vector<8x96xf32> to vector<8x32xf32>
    %217 = arith.mulf %215, %196 : vector<8x32xf32>
    %218 = arith.mulf %214, %213 : vector<8x32xf32>
    %219 = arith.addf %217, %218 : vector<8x32xf32>
    %220 = math.tanh %219 : vector<8x32xf32>
    %221 = arith.mulf %216, %220 : vector<8x32xf32>
    %cst_46 = arith.constant dense<0.000000e+00> : vector<8x17xf32>
    %222 = tpu.matmul %221, %172, %cst_46 {dimension_numbers = #tpu.dot_dimension_numbers<[1], [0], [0], [1], [0, 0, 1, 1], [], []>} : vector<8x32xf32>, vector<32x17xf32>, vector<8x17xf32> -> vector<8x17xf32>
    %223 = vector.broadcast %173 : vector<1x17xf32> to vector<8x17xf32>
    %224 = arith.addf %222, %223 : vector<8x17xf32>
    %225 = vector.extract_strided_slice %224 {offsets = [0, 0], sizes = [8, 16], strides = [1, 1]} : vector<8x17xf32> to vector<8x16xf32>
    %c0_47 = arith.constant 0 : index
    %c16 = arith.constant 16 : index
    %226 = vector.load %arg9[%c0_47, %c16] : memref<8x128xf32, #tpu.memory_space<vmem>>, vector<8x16xf32>
    tpu.vector_store %arg9[%c0_47, %c16], %225 {strides = array<i32>} : memref<8x128xf32, #tpu.memory_space<vmem>>, vector<8x16xf32>,
    %cst_48 = arith.constant dense<0.000000e+00> : vector<8x128xf32>
    %227 = tpu.matmul %221, %171, %cst_48 {dimension_numbers = #tpu.dot_dimension_numbers<[1], [0], [0], [1], [0, 0, 1, 1], [], []>} : vector<8x32xf32>, vector<32x128xf32>, vector<8x128xf32> -> vector<8x128xf32>
    %228 = arith.addf %178, %227 : vector<8x128xf32>
    %229 = vector.extract_strided_slice %228 {offsets = [0, 0], sizes = [8, 96], strides = [1, 1]} : vector<8x128xf32> to vector<8x96xf32>
    %230 = arith.negf %229 : vector<8x96xf32>
    %231 = math.exp %230 : vector<8x96xf32>
    %cst_49 = arith.constant 1.000000e+00 : f32
    %232 = vector.broadcast %cst_49 : f32 to vector<8x96xf32>
    %233 = arith.addf %232, %231 : vector<8x96xf32>
    %234 = arith.divf %232, %233 : vector<8x96xf32>
    %235 = vector.extract_strided_slice %228 {offsets = [0, 96], sizes = [8, 32], strides = [1, 1]} : vector<8x128xf32> to vector<8x32xf32>
    %236 = math.tanh %235 : vector<8x32xf32>
    %237 = vector.extract_strided_slice %234 {offsets = [0, 0], sizes = [8, 32], strides = [1, 1]} : vector<8x96xf32> to vector<8x32xf32>
    %238 = vector.extract_strided_slice %234 {offsets = [0, 32], sizes = [8, 32], strides = [1, 1]} : vector<8x96xf32> to vector<8x32xf32>
    %239 = vector.extract_strided_slice %234 {offsets = [0, 64], sizes = [8, 32], strides = [1, 1]} : vector<8x96xf32> to vector<8x32xf32>
    %240 = arith.mulf %238, %219 : vector<8x32xf32>
    %241 = arith.mulf %237, %236 : vector<8x32xf32>
    %242 = arith.addf %240, %241 : vector<8x32xf32>
    %243 = math.tanh %242 : vector<8x32xf32>
    %244 = arith.mulf %239, %243 : vector<8x32xf32>
    %cst_50 = arith.constant dense<0.000000e+00> : vector<8x17xf32>
    %245 = tpu.matmul %244, %172, %cst_50 {dimension_numbers = #tpu.dot_dimension_numbers<[1], [0], [0], [1], [0, 0, 1, 1], [], []>} : vector<8x32xf32>, vector<32x17xf32>, vector<8x17xf32> -> vector<8x17xf32>
    %246 = vector.broadcast %173 : vector<1x17xf32> to vector<8x17xf32>
    %247 = arith.addf %245, %246 : vector<8x17xf32>
    %248 = vector.extract_strided_slice %247 {offsets = [0, 0], sizes = [8, 16], strides = [1, 1]} : vector<8x17xf32> to vector<8x16xf32>
    %c0_51 = arith.constant 0 : index
    %c32 = arith.constant 32 : index
    %249 = vector.load %arg9[%c0_51, %c32] : memref<8x128xf32, #tpu.memory_space<vmem>>, vector<8x16xf32>
    tpu.vector_store %arg9[%c0_51, %c32], %248 {strides = array<i32>} : memref<8x128xf32, #tpu.memory_space<vmem>>, vector<8x16xf32>,
    %cst_52 = arith.constant dense<0.000000e+00> : vector<8x128xf32>
    %250 = tpu.matmul %244, %171, %cst_52 {dimension_numbers = #tpu.dot_dimension_numbers<[1], [0], [0], [1], [0, 0, 1, 1], [], []>} : vector<8x32xf32>, vector<32x128xf32>, vector<8x128xf32> -> vector<8x128xf32>
    %251 = arith.addf %178, %250 : vector<8x128xf32>
    %252 = vector.extract_strided_slice %251 {offsets = [0, 0], sizes = [8, 96], strides = [1, 1]} : vector<8x128xf32> to vector<8x96xf32>
    %253 = arith.negf %252 : vector<8x96xf32>
    %254 = math.exp %253 : vector<8x96xf32>
    %cst_53 = arith.constant 1.000000e+00 : f32
    %255 = vector.broadcast %cst_53 : f32 to vector<8x96xf32>
    %256 = arith.addf %255, %254 : vector<8x96xf32>
    %257 = arith.divf %255, %256 : vector<8x96xf32>
    %258 = vector.extract_strided_slice %251 {offsets = [0, 96], sizes = [8, 32], strides = [1, 1]} : vector<8x128xf32> to vector<8x32xf32>
    %259 = math.tanh %258 : vector<8x32xf32>
    %260 = vector.extract_strided_slice %257 {offsets = [0, 0], sizes = [8, 32], strides = [1, 1]} : vector<8x96xf32> to vector<8x32xf32>
    %261 = vector.extract_strided_slice %257 {offsets = [0, 32], sizes = [8, 32], strides = [1, 1]} : vector<8x96xf32> to vector<8x32xf32>
    %262 = vector.extract_strided_slice %257 {offsets = [0, 64], sizes = [8, 32], strides = [1, 1]} : vector<8x96xf32> to vector<8x32xf32>
    %263 = arith.mulf %261, %242 : vector<8x32xf32>
    %264 = arith.mulf %260, %259 : vector<8x32xf32>
    %265 = arith.addf %263, %264 : vector<8x32xf32>
    %266 = math.tanh %265 : vector<8x32xf32>
    %267 = arith.mulf %262, %266 : vector<8x32xf32>
    %cst_54 = arith.constant dense<0.000000e+00> : vector<8x17xf32>
    %268 = tpu.matmul %267, %172, %cst_54 {dimension_numbers = #tpu.dot_dimension_numbers<[1], [0], [0], [1], [0, 0, 1, 1], [], []>} : vector<8x32xf32>, vector<32x17xf32>, vector<8x17xf32> -> vector<8x17xf32>
    %269 = vector.broadcast %173 : vector<1x17xf32> to vector<8x17xf32>
    %270 = arith.addf %268, %269 : vector<8x17xf32>
    %271 = vector.extract_strided_slice %270 {offsets = [0, 0], sizes = [8, 16], strides = [1, 1]} : vector<8x17xf32> to vector<8x16xf32>
    %c0_55 = arith.constant 0 : index
    %c48 = arith.constant 48 : index
    %272 = vector.load %arg9[%c0_55, %c48] : memref<8x128xf32, #tpu.memory_space<vmem>>, vector<8x16xf32>
    tpu.vector_store %arg9[%c0_55, %c48], %271 {strides = array<i32>} : memref<8x128xf32, #tpu.memory_space<vmem>>, vector<8x16xf32>,
    %cst_56 = arith.constant dense<0.000000e+00> : vector<8x128xf32>
    %273 = tpu.matmul %267, %171, %cst_56 {dimension_numbers = #tpu.dot_dimension_numbers<[1], [0], [0], [1], [0, 0, 1, 1], [], []>} : vector<8x32xf32>, vector<32x128xf32>, vector<8x128xf32> -> vector<8x128xf32>
    %274 = arith.addf %178, %273 : vector<8x128xf32>
    %275 = vector.extract_strided_slice %274 {offsets = [0, 0], sizes = [8, 96], strides = [1, 1]} : vector<8x128xf32> to vector<8x96xf32>
    %276 = arith.negf %275 : vector<8x96xf32>
    %277 = math.exp %276 : vector<8x96xf32>
    %cst_57 = arith.constant 1.000000e+00 : f32
    %278 = vector.broadcast %cst_57 : f32 to vector<8x96xf32>
    %279 = arith.addf %278, %277 : vector<8x96xf32>
    %280 = arith.divf %278, %279 : vector<8x96xf32>
    %281 = vector.extract_strided_slice %274 {offsets = [0, 96], sizes = [8, 32], strides = [1, 1]} : vector<8x128xf32> to vector<8x32xf32>
    %282 = math.tanh %281 : vector<8x32xf32>
    %283 = vector.extract_strided_slice %280 {offsets = [0, 0], sizes = [8, 32], strides = [1, 1]} : vector<8x96xf32> to vector<8x32xf32>
    %284 = vector.extract_strided_slice %280 {offsets = [0, 32], sizes = [8, 32], strides = [1, 1]} : vector<8x96xf32> to vector<8x32xf32>
    %285 = vector.extract_strided_slice %280 {offsets = [0, 64], sizes = [8, 32], strides = [1, 1]} : vector<8x96xf32> to vector<8x32xf32>
    %286 = arith.mulf %284, %265 : vector<8x32xf32>
    %287 = arith.mulf %283, %282 : vector<8x32xf32>
    %288 = arith.addf %286, %287 : vector<8x32xf32>
    %289 = math.tanh %288 : vector<8x32xf32>
    %290 = arith.mulf %285, %289 : vector<8x32xf32>
    %cst_58 = arith.constant dense<0.000000e+00> : vector<8x17xf32>
    %291 = tpu.matmul %290, %172, %cst_58 {dimension_numbers = #tpu.dot_dimension_numbers<[1], [0], [0], [1], [0, 0, 1, 1], [], []>} : vector<8x32xf32>, vector<32x17xf32>, vector<8x17xf32> -> vector<8x17xf32>
    %292 = vector.broadcast %173 : vector<1x17xf32> to vector<8x17xf32>
    %293 = arith.addf %291, %292 : vector<8x17xf32>
    %294 = vector.extract_strided_slice %293 {offsets = [0, 0], sizes = [8, 16], strides = [1, 1]} : vector<8x17xf32> to vector<8x16xf32>
    %c0_59 = arith.constant 0 : index
    %c64 = arith.constant 64 : index
    %295 = vector.load %arg9[%c0_59, %c64] : memref<8x128xf32, #tpu.memory_space<vmem>>, vector<8x16xf32>
    tpu.vector_store %arg9[%c0_59, %c64], %294 {strides = array<i32>} : memref<8x128xf32, #tpu.memory_space<vmem>>, vector<8x16xf32>,
    %cst_60 = arith.constant dense<0.000000e+00> : vector<8x128xf32>
    %296 = tpu.matmul %290, %171, %cst_60 {dimension_numbers = #tpu.dot_dimension_numbers<[1], [0], [0], [1], [0, 0, 1, 1], [], []>} : vector<8x32xf32>, vector<32x128xf32>, vector<8x128xf32> -> vector<8x128xf32>
    %297 = arith.addf %178, %296 : vector<8x128xf32>
    %298 = vector.extract_strided_slice %297 {offsets = [0, 0], sizes = [8, 96], strides = [1, 1]} : vector<8x128xf32> to vector<8x96xf32>
    %299 = arith.negf %298 : vector<8x96xf32>
    %300 = math.exp %299 : vector<8x96xf32>
    %cst_61 = arith.constant 1.000000e+00 : f32
    %301 = vector.broadcast %cst_61 : f32 to vector<8x96xf32>
    %302 = arith.addf %301, %300 : vector<8x96xf32>
    %303 = arith.divf %301, %302 : vector<8x96xf32>
    %304 = vector.extract_strided_slice %297 {offsets = [0, 96], sizes = [8, 32], strides = [1, 1]} : vector<8x128xf32> to vector<8x32xf32>
    %305 = math.tanh %304 : vector<8x32xf32>
    %306 = vector.extract_strided_slice %303 {offsets = [0, 0], sizes = [8, 32], strides = [1, 1]} : vector<8x96xf32> to vector<8x32xf32>
    %307 = vector.extract_strided_slice %303 {offsets = [0, 32], sizes = [8, 32], strides = [1, 1]} : vector<8x96xf32> to vector<8x32xf32>
    %308 = vector.extract_strided_slice %303 {offsets = [0, 64], sizes = [8, 32], strides = [1, 1]} : vector<8x96xf32> to vector<8x32xf32>
    %309 = arith.mulf %307, %288 : vector<8x32xf32>
    %310 = arith.mulf %306, %305 : vector<8x32xf32>
    %311 = arith.addf %309, %310 : vector<8x32xf32>
    %312 = math.tanh %311 : vector<8x32xf32>
    %313 = arith.mulf %308, %312 : vector<8x32xf32>
    %cst_62 = arith.constant dense<0.000000e+00> : vector<8x17xf32>
    %314 = tpu.matmul %313, %172, %cst_62 {dimension_numbers = #tpu.dot_dimension_numbers<[1], [0], [0], [1], [0, 0, 1, 1], [], []>} : vector<8x32xf32>, vector<32x17xf32>, vector<8x17xf32> -> vector<8x17xf32>
    %315 = vector.broadcast %173 : vector<1x17xf32> to vector<8x17xf32>
    %316 = arith.addf %314, %315 : vector<8x17xf32>
    %317 = vector.extract_strided_slice %316 {offsets = [0, 0], sizes = [8, 16], strides = [1, 1]} : vector<8x17xf32> to vector<8x16xf32>
    %c0_63 = arith.constant 0 : index
    %c80 = arith.constant 80 : index
    %318 = vector.load %arg9[%c0_63, %c80] : memref<8x128xf32, #tpu.memory_space<vmem>>, vector<8x16xf32>
    tpu.vector_store %arg9[%c0_63, %c80], %317 {strides = array<i32>} : memref<8x128xf32, #tpu.memory_space<vmem>>, vector<8x16xf32>,
    %cst_64 = arith.constant dense<0.000000e+00> : vector<8x128xf32>
    %319 = tpu.matmul %313, %171, %cst_64 {dimension_numbers = #tpu.dot_dimension_numbers<[1], [0], [0], [1], [0, 0, 1, 1], [], []>} : vector<8x32xf32>, vector<32x128xf32>, vector<8x128xf32> -> vector<8x128xf32>
    %320 = arith.addf %178, %319 : vector<8x128xf32>
    %321 = vector.extract_strided_slice %320 {offsets = [0, 0], sizes = [8, 96], strides = [1, 1]} : vector<8x128xf32> to vector<8x96xf32>
    %322 = arith.negf %321 : vector<8x96xf32>
    %323 = math.exp %322 : vector<8x96xf32>
    %cst_65 = arith.constant 1.000000e+00 : f32
    %324 = vector.broadcast %cst_65 : f32 to vector<8x96xf32>
    %325 = arith.addf %324, %323 : vector<8x96xf32>
    %326 = arith.divf %324, %325 : vector<8x96xf32>
    %327 = vector.extract_strided_slice %320 {offsets = [0, 96], sizes = [8, 32], strides = [1, 1]} : vector<8x128xf32> to vector<8x32xf32>
    %328 = math.tanh %327 : vector<8x32xf32>
    %329 = vector.extract_strided_slice %326 {offsets = [0, 0], sizes = [8, 32], strides = [1, 1]} : vector<8x96xf32> to vector<8x32xf32>
    %330 = vector.extract_strided_slice %326 {offsets = [0, 32], sizes = [8, 32], strides = [1, 1]} : vector<8x96xf32> to vector<8x32xf32>
    %331 = vector.extract_strided_slice %326 {offsets = [0, 64], sizes = [8, 32], strides = [1, 1]} : vector<8x96xf32> to vector<8x32xf32>
    %332 = arith.mulf %330, %311 : vector<8x32xf32>
    %333 = arith.mulf %329, %328 : vector<8x32xf32>
    %334 = arith.addf %332, %333 : vector<8x32xf32>
    %335 = math.tanh %334 : vector<8x32xf32>
    %336 = arith.mulf %331, %335 : vector<8x32xf32>
    %cst_66 = arith.constant dense<0.000000e+00> : vector<8x17xf32>
    %337 = tpu.matmul %336, %172, %cst_66 {dimension_numbers = #tpu.dot_dimension_numbers<[1], [0], [0], [1], [0, 0, 1, 1], [], []>} : vector<8x32xf32>, vector<32x17xf32>, vector<8x17xf32> -> vector<8x17xf32>
    %338 = vector.broadcast %173 : vector<1x17xf32> to vector<8x17xf32>
    %339 = arith.addf %337, %338 : vector<8x17xf32>
    %340 = vector.extract_strided_slice %339 {offsets = [0, 0], sizes = [8, 16], strides = [1, 1]} : vector<8x17xf32> to vector<8x16xf32>
    %c0_67 = arith.constant 0 : index
    %c96 = arith.constant 96 : index
    %341 = vector.load %arg9[%c0_67, %c96] : memref<8x128xf32, #tpu.memory_space<vmem>>, vector<8x16xf32>
    tpu.vector_store %arg9[%c0_67, %c96], %340 {strides = array<i32>} : memref<8x128xf32, #tpu.memory_space<vmem>>, vector<8x16xf32>,
    %cst_68 = arith.constant dense<0.000000e+00> : vector<8x128xf32>
    %342 = tpu.matmul %336, %171, %cst_68 {dimension_numbers = #tpu.dot_dimension_numbers<[1], [0], [0], [1], [0, 0, 1, 1], [], []>} : vector<8x32xf32>, vector<32x128xf32>, vector<8x128xf32> -> vector<8x128xf32>
    %343 = arith.addf %178, %342 : vector<8x128xf32>
    %344 = vector.extract_strided_slice %343 {offsets = [0, 0], sizes = [8, 96], strides = [1, 1]} : vector<8x128xf32> to vector<8x96xf32>
    %345 = arith.negf %344 : vector<8x96xf32>
    %346 = math.exp %345 : vector<8x96xf32>
    %cst_69 = arith.constant 1.000000e+00 : f32
    %347 = vector.broadcast %cst_69 : f32 to vector<8x96xf32>
    %348 = arith.addf %347, %346 : vector<8x96xf32>
    %349 = arith.divf %347, %348 : vector<8x96xf32>
    %350 = vector.extract_strided_slice %343 {offsets = [0, 96], sizes = [8, 32], strides = [1, 1]} : vector<8x128xf32> to vector<8x32xf32>
    %351 = math.tanh %350 : vector<8x32xf32>
    %352 = vector.extract_strided_slice %349 {offsets = [0, 0], sizes = [8, 32], strides = [1, 1]} : vector<8x96xf32> to vector<8x32xf32>
    %353 = vector.extract_strided_slice %349 {offsets = [0, 32], sizes = [8, 32], strides = [1, 1]} : vector<8x96xf32> to vector<8x32xf32>
    %354 = vector.extract_strided_slice %349 {offsets = [0, 64], sizes = [8, 32], strides = [1, 1]} : vector<8x96xf32> to vector<8x32xf32>
    %355 = arith.mulf %353, %334 : vector<8x32xf32>
    %356 = arith.mulf %352, %351 : vector<8x32xf32>
    %357 = arith.addf %355, %356 : vector<8x32xf32>
    %358 = math.tanh %357 : vector<8x32xf32>
    %359 = arith.mulf %354, %358 : vector<8x32xf32>
    %cst_70 = arith.constant dense<0.000000e+00> : vector<8x17xf32>
    %360 = tpu.matmul %359, %172, %cst_70 {dimension_numbers = #tpu.dot_dimension_numbers<[1], [0], [0], [1], [0, 0, 1, 1], [], []>} : vector<8x32xf32>, vector<32x17xf32>, vector<8x17xf32> -> vector<8x17xf32>
    %361 = vector.broadcast %173 : vector<1x17xf32> to vector<8x17xf32>
    %362 = arith.addf %360, %361 : vector<8x17xf32>
    %363 = vector.extract_strided_slice %362 {offsets = [0, 0], sizes = [8, 16], strides = [1, 1]} : vector<8x17xf32> to vector<8x16xf32>
    %c0_71 = arith.constant 0 : index
    %c112 = arith.constant 112 : index
    %364 = vector.load %arg9[%c0_71, %c112] : memref<8x128xf32, #tpu.memory_space<vmem>>, vector<8x16xf32>
    tpu.vector_store %arg9[%c0_71, %c112], %363 {strides = array<i32>} : memref<8x128xf32, #tpu.memory_space<vmem>>, vector<8x16xf32>,
    %365 = vector.extract_strided_slice %362 {offsets = [0, 16], sizes = [8, 1], strides = [1, 1]} : vector<8x17xf32> to vector<8x1xf32>
    %c0_72 = arith.constant 0 : index
    %c0_73 = arith.constant 0 : index
    %366 = vector.load %arg10[%c0_72, %c0_73] : memref<8x1xf32, #tpu.memory_space<vmem>>, vector<8x1xf32>
    tpu.vector_store %arg10[%c0_72, %c0_73], %365 {strides = array<i32>} : memref<8x1xf32, #tpu.memory_space<vmem>>, vector<8x1xf32>,
    return
  }
}

</mosaic_0001>

<bundles_post_ra>
// kernel: lstm_autoencoder_forward.1
= control target key start
LH: loop header
LB: loop body
LE: loop exit
PB: predicated region body
PF: predicated region fallthrough
CT: control target
= control target key end

     0   :  { %16 = vsyncpa [#allocation3], 0  ;;  %s6894_s0 = inlined_call_operand.hbm [shape: f32[8,8,16], index: 0, kind: input, shape index: {}]   ;;  %s6895_s1 = inlined_call_operand.hbm [shape: f32[16,128], index: 1, kind: input, shape index: {}]   ;;  %s6896_s2 = inlined_call_operand.hbm [shape: f32[32,128], index: 2, kind: input, shape index: {}]   ;;  %s6897_s3 = inlined_call_operand.hbm [shape: f32[1,128], index: 3, kind: input, shape index: {}]   ;;  %s6898_s4 = inlined_call_operand.hbm [shape: f32[32,128], index: 4, kind: input, shape index: {}]   ;;  %s6899_s5 = inlined_call_operand.hbm [shape: f32[32,128], index: 5, kind: input, shape index: {}]   ;;  %s6900_s6 = inlined_call_operand.vmem [shape: f32[1,128], index: 6, kind: input, shape index: {}]   ;;  %s6901_s7 = inlined_call_operand.hbm [shape: f32[32,17], index: 7, kind: input, shape index: {}]   ;;  %s6902_s8 = inlined_call_operand.vmem [shape: f32[1,17], index: 8, kind: input, shape index: {}]   ;;  %s6903_s9 = inlined_call_operand.vmem [shape: f32[8,128], index: 9, kind: output, shape index: {0}]   ;;  %s6904_s10 = inlined_call_operand.vmem [shape: f32[8,1], index: 10, kind: output, shape index: {1}]  }
   0x1   :  { %17 = vsyncpa [#allocation5], 0 }
   0x2   :  { %18 = vsyncpa [#allocation8], 0 }
   0x3   :  { %19 = vsyncpa [#allocation11], 0  ;;  %s37_s15 = sshll.u32 %s6895_s1, 4  ;;  %s4968_s16 = smov [#allocation4]   ;;  %s38_s15 = int_to_ptr.hbm [resolvable:$true] %s37_s15 }
   0x4   :  { %s39_s17 = sshll.u32 %s4968_s16, 4  ;;  %s64_s20 = sshll.u32 %s6897_s3, 4  ;;  %s40_s17 = int_to_ptr.vmem [resolvable:$true] %s39_s17  ;;  %s65_s20 = int_to_ptr.hbm [resolvable:$true] %s64_s20 }
   0x5   :  { %s4969_s21 = smov 128   ;;  %s4970_s22 = smov 8  }
   0x6   :  { %45 = dma.hbm_to_vmem [thread:$0]  %s38_s15, 256, %s40_s17, [#allocation5], %s4969_s21, %s4969_s21, %s4970_s22  }
   0x7   :  { %s4971_s23 = smov [#allocation7]   ;;  %s87_s1 = sshll.u32 %s6899_s5, 4  ;;  %s88_s1 = int_to_ptr.hbm [resolvable:$true] %s87_s1 }
   0x8   :  { %s66_s24 = sshll.u32 %s4971_s23, 4  ;;  %s24_s3 = sshll.u32 %s6894_s0, 4  ;;  %s67_s24 = int_to_ptr.vmem [resolvable:$true] %s66_s24  ;;  %s25_s3 = int_to_ptr.hbm [resolvable:$true] %s24_s3 }
   0x9   :  { %69 = dma.hbm_to_vmem [thread:$0]  %s65_s20, 16, %s67_s24, [#allocation8]  }
   0xa   :  { %s4972_s29 = smov [#allocation10]   ;;  %s4973_s11 = smov [#allocation2]  }
   0xb   :  { %s89_s30 = sshll.u32 %s4972_s29, 4  ;;  %s26_s12 = sshll.u32 %s4973_s11, 4  ;;  %s90_s30 = int_to_ptr.vmem [resolvable:$true] %s89_s30  ;;  %s27_s12 = int_to_ptr.vmem [resolvable:$true] %s26_s12 }
   0xc   :  { %95 = dma.hbm_to_vmem [thread:$0]  %s88_s1, 512, %s90_s30, [#allocation11], %s4969_s21, %s4969_s21, %s4970_s22  }
   0xd   :  { %s50_s5 = sshll.u32 %s6896_s2, 4  ;;  %s74_s16 = sshll.u32 %s6898_s4, 4  ;;  %s51_s5 = int_to_ptr.hbm [resolvable:$true] %s50_s5  ;;  %s75_s16 = int_to_ptr.hbm [resolvable:$true] %s74_s16 }
   0xe   :  { %32 = dma.hbm_to_vmem [thread:$0]  %s25_s3, 1024, %s27_s12, [#allocation3], %s4969_s21, %s4969_s21, %s4970_s22  }
   0xf   :  { %s4974_s17 = smov [#allocation6]   ;;  %s4975_s19 = smov [#allocation9]  }
  0x10   :  { %s52_s18 = sshll.u32 %s4974_s17, 4  ;;  %s76_s2 = sshll.u32 %s4975_s19, 4  ;;  %s53_s18 = int_to_ptr.vmem [resolvable:$true] %s52_s18  ;;  %s77_s2 = int_to_ptr.vmem [resolvable:$true] %s76_s2 }
  0x11   :  { %58 = dma.hbm_to_vmem [thread:$0]  %s51_s5, 512, %s53_s18, [#allocation5], %s4969_s21, %s4969_s21, %s4970_s22  }
  0x12   :  { %s102_s24 = sshll.u32 %s6901_s7, 4  ;;  %s4976_s4 = smov [#allocation12]   ;;  %s103_s24 = int_to_ptr.hbm [resolvable:$true] %s102_s24 }
  0x13   :  { %82 = dma.hbm_to_vmem [thread:$0]  %s75_s16, 512, %s77_s2, [#allocation8], %s4969_s21, %s4969_s21, %s4970_s22  }
  0x14   :  { %s104_s25 = sshll.u32 %s4976_s4, 4  ;;  %s105_s25 = int_to_ptr.vmem [resolvable:$true] %s104_s25 }
  0x15   :  { %110 = dma.hbm_to_vmem [thread:$0]  %s103_s24, 512, %s105_s25, [#allocation11], %s4969_s21, %s4969_s21, %s4970_s22  }
  0x16   :  { %4960 = dma.done.wait [#allocation3], 1024  }
  0x17   :  { %4961 = vsyncadd [#allocation3], 4294966272 }
  0x18   :  { %4962 = dma.done.wait [#allocation5], 768  }
  0x19   :  { %4963 = vsyncadd [#allocation5], 4294966528 }
  0x1a   :  { %4964 = dma.done.wait [#allocation8], 528  }
  0x1b   :  { %4965 = vsyncadd [#allocation8], 4294966768 }
  0x1c   :  { %4966 = dma.done.wait [#allocation11], 1024  }
  0x1d   :  { %4967 = vsyncadd [#allocation11], 4294966272  ;;  %v150_v0 = vld [vmem:[#allocation4 + $0x8] sm:$0xff]  ;;  %v149_v2 = vld [vmem:[#allocation4] sm:$0xff]  ;;  %vm6905_vm0 = vcmask 130048   ;;  %v4977_v7 = vmov 0.0  }
  0x1e   :  { %v5079_v1 = vld [vmem:[#allocation6 + $0x18] sm:$0xff]  ;;  %194 = vmatpush.msra.mxu0 %v150_v0  ;;  %v5082_v3 = vld [vmem:[#allocation6 + $0x10] sm:$0xff]  ;;  %v5084_v5 = vld [vmem:[#allocation6 + $0x8] sm:$0xff]  ;;  %s4978_s7 = smov 32   ;;  %s4979_s21 = smov 64  }
  0x1f   :  { %241 = vmatpush.msra.mxu1 %v5079_v1  ;;  %v141_v4 = vld [vmem:[#allocation2] sm:$0xff]  ;;  %614 = vmatpush.msra.mxu2 %v5079_v1  ;;  %v5090_v6 = vld [vmem:[#allocation6] sm:$0xff]  ;;  %v142_v8 = vld [vmem:[#allocation2 + $0x8] sm:$0xff]  ;;  %s4981_s30 = smov 80   ;;  %s4982_s13 = smov 48  }
  0x20   :  { %1004 = vmatpush.msra.mxu3 %v5079_v1  ;;  %195 = vmatpush.msra.mxu0 %v149_v2  ;;  %v143_v9 = vld [vmem:[#allocation2 + $0x10] sm:$0xff]  ;;  %v144_v10 = vld [vmem:[#allocation2 + $0x18] sm:$0xff]  ;;  %v145_v11 = vld [vmem:[#allocation2 + $0x20] sm:$0xff]  ;;  %s4983_s14 = smov 96   ;;  %s4984_s20 = smov 112  }
  0x21   :  { %242 = vmatpush.msra.mxu1 %v5082_v3  ;;  %4093 = vmatmul.msk.f32.vlgmr.msra.gmra.mxu0 %vm6905_vm0, %v141_v4  ;;  %v146_v12 = vld [vmem:[#allocation2 + $0x28] sm:$0xff]  ;;  %v147_v13 = vld [vmem:[#allocation2 + $0x30] sm:$0xff]  ;;  %v148_v14 = vld [vmem:[#allocation2 + $0x38] sm:$0xff] }
  0x22   :  { %615 = vmatpush.msra.mxu2 %v5082_v3  ;;  %1005 = vmatpush.msra.mxu3 %v5082_v3  ;;  %v4213_v15 = vld [vmem:[#allocation7] ss:$0 sm:$0xff] }
  0x23   :  { %243 = vmatpush.msra.mxu1 %v5084_v5 }
  0x24   :  { %616 = vmatpush.msra.mxu2 %v5084_v5  ;;  %1006 = vmatpush.msra.mxu3 %v5084_v5 }
  0x25   :  { %244 = vmatpush.msra.mxu1 %v5090_v6 }
  0x26   :  { %245 = vmatmul.f32.vlgmr.msra.gmra.mxu1 %v4977_v7  ;;  %617 = vmatpush.msra.mxu2 %v5090_v6 }
  0x27   :  { %1007 = vmatpush.msra.mxu3 %v5090_v6  ;;  %1394 = vmatpush.msrb.mxu1 %v5079_v1 }
  0x28   :  { %1784 = vmatpush.msrb.mxu2 %v5079_v1 }
  0x29   :  { %2174 = vmatpush.msrb.mxu3 %v5079_v1  ;;  %1395 = vmatpush.msrb.mxu1 %v5082_v3 }
  0x2a   :  { %4094 = vmatmul.msk.f32.gmra.mxu0 %vm6905_vm0, %v142_v8  ;;  %1785 = vmatpush.msrb.mxu2 %v5082_v3 }
  0x2b   :  { %1396 = vmatpush.msrb.mxu1 %v5084_v5  ;;  %2175 = vmatpush.msrb.mxu3 %v5082_v3 }
  0x2c   :  { %1786 = vmatpush.msrb.mxu2 %v5084_v5 }
  0x2d   :  { %1397 = vmatpush.msrb.mxu1 %v5090_v6  ;;  %2176 = vmatpush.msrb.mxu3 %v5084_v5 }
  0x2e   :  { %1787 = vmatpush.msrb.mxu2 %v5090_v6 }
  0x2f   :  { %2564 = vmatpush.msra.mxu1 %v5079_v1  ;;  %2177 = vmatpush.msrb.mxu3 %v5090_v6 }
  0x31   :  { %2565 = vmatpush.msra.mxu1 %v5082_v3 }
  0x32   :  { %4095 = vmatmul.msk.f32.gmra.mxu0 %vm6905_vm0, %v143_v9 }
  0x33   :  { %2566 = vmatpush.msra.mxu1 %v5084_v5 }
  0x35   :  { %2567 = vmatpush.msra.mxu1 %v5090_v6 }
  0x3a   :  { %4096 = vmatmul.msk.f32.gmra.mxu0 %vm6905_vm0, %v144_v10 }
  0x42   :  { %4097 = vmatmul.msk.f32.gmra.mxu0 %vm6905_vm0, %v145_v11 }
  0x4a   :  { %4098 = vmatmul.msk.f32.gmra.mxu0 %vm6905_vm0, %v146_v12 }
  0x52   :  { %4099 = vmatmul.msk.f32.gmra.mxu0 %vm6905_vm0, %v147_v13 }
  0x5a   :  { %4100 = vmatmul.msk.f32.gmra.mxu0 %vm6905_vm0, %v148_v14 }
  0x9e   :  { %v197_v16 = vpop.f32.mrf.mxu0 }
  0x9f   :  { %v5124_v17 = vadd.f32 %v4213_v15, %v197_v16 }
  0xa3   :  { %v246_v18 = vpop.f32.mrf.mxu1 }
  0xa4   :  { %v265_v19 = vadd.f32 %v246_v18, %v5124_v17  ;;  %v250_v20 = vrot.slane %v246_v18, 1  ;;  %v251_v25 = vrot.slane %v246_v18, 2  ;;  %v252_v30 = vrot.slane %v246_v18, 3 }
  0xa5   :  { %v253_v37 = vrot.slane %v246_v18, 4  ;;  %v254_v42 = vrot.slane %v246_v18, 5  ;;  %v255_v47 = vrot.slane %v246_v18, 6  ;;  %v256_v52 = vrot.slane %v246_v18, 7 }
  0xa6   :  { %4216 = vtanh.f32 %v265_v19  ;;  %v4101_v56 = vmul.f32 -1.442695, %v265_v19 }
  0xa7   :  { %v200_v21 = vpop.f32.mrf.mxu0 }
  0xa8   :  { %v5127_v22 = vadd.f32 %v4213_v15, %v200_v21 }
  0xaa   :  { %v266_v23 = vadd.f32 %v250_v20, %v5127_v22 }
  0xac   :  { %v4217_v24 = vpop.eup %4216  ;;  %4218 = vtanh.f32 %v266_v23  ;;  %v4102_v57 = vmul.f32 -1.442695, %v266_v23 }
  0xad   :  { %449 = vrot.lane.b32.xlu1 %v4217_v24, %s4978_s7 }
  0xaf   :  { %v203_v26 = vpop.f32.mrf.mxu0 }
  0xb0   :  { %v5131_v27 = vadd.f32 %v4213_v15, %v203_v26 }
  0xb2   :  { %v4219_v28 = vpop.eup %4218  ;;  %v267_v29 = vadd.f32 %v251_v25, %v5131_v27 }
  0xb3   :  { %451 = vrot.lane.b32.xlu0 %v4219_v28, %s4978_s7 }
  0xb4   :  { %4220 = vtanh.f32 %v267_v29  ;;  %v4103_v60 = vmul.f32 -1.442695, %v267_v29 }
  0xb7   :  { %v206_v31 = vpop.f32.mrf.mxu0 }
  0xb8   :  { %v5135_v32 = vadd.f32 %v4213_v15, %v206_v31 }
  0xba   :  { %v4221_v33 = vpop.eup %4220  ;;  %v268_v34 = vadd.f32 %v252_v30, %v5135_v32 }
  0xbb   :  { %453 = vrot.lane.b32.xlu0 %v4221_v33, %s4978_s7 }
  0xbc   :  { %4222 = vtanh.f32 %v268_v34  ;;  %v4104_v0 = vmul.f32 -1.442695, %v268_v34 }
  0xbf   :  { %v209_v35 = vpop.f32.mrf.mxu0 }
  0xc0   :  { %v5139_v36 = vadd.f32 %v4213_v15, %v209_v35 }
  0xc2   :  { %v4223_v38 = vpop.eup %4222  ;;  %v269_v39 = vadd.f32 %v253_v37, %v5139_v36 }
  0xc3   :  { %455 = vrot.lane.b32.xlu1 %v4223_v38, %s4978_s7 }
  0xc4   :  { %4224 = vtanh.f32 %v269_v39  ;;  %v4105_v4 = vmul.f32 -1.442695, %v269_v39 }
  0xc7   :  { %v212_v40 = vpop.f32.mrf.mxu0 }
  0xc8   :  { %v5143_v41 = vadd.f32 %v4213_v15, %v212_v40 }
  0xca   :  { %v4225_v43 = vpop.eup %4224  ;;  %v270_v44 = vadd.f32 %v254_v42, %v5143_v41 }
  0xcb   :  { %457 = vrot.lane.b32.xlu2 %v4225_v43, %s4978_s7 }
  0xcc   :  { %4226 = vtanh.f32 %v270_v44  ;;  %v4106_v61 = vmul.f32 -1.442695, %v270_v44 }
  0xcf   :  { %v215_v45 = vpop.f32.mrf.mxu0 }
  0xd0   :  { %v5147_v46 = vadd.f32 %v4213_v15, %v215_v45 }
  0xd2   :  { %v4227_v48 = vpop.eup %4226  ;;  %v5150_v49 = vadd.f32 %v255_v47, %v5147_v46 }
  0xd3   :  { %459 = vrot.lane.b32.xlu2 %v4227_v48, %s4978_s7 }
  0xd4   :  { %4228 = vtanh.f32 %v5150_v49  ;;  %v4107_v47 = vmul.f32 -1.442695, %v5150_v49 }
  0xd7   :  { %v218_v50 = vpop.f32.mrf.mxu0 }
  0xd8   :  { %v5154_v51 = vadd.f32 %v4213_v15, %v218_v50 }
  0xda   :  { %v4229_v53 = vpop.eup %4228  ;;  %v5157_v54 = vadd.f32 %v256_v52, %v5154_v51 }
  0xdb   :  { %461 = vrot.lane.b32.xlu0 %v4229_v53, %s4978_s7 }
  0xdc   :  { %4230 = vtanh.f32 %v5157_v54 }
  0xdd   :  { %4232 = vpow2.f32 %v4101_v56 }
  0xde   :  { %4234 = vpow2.f32 %v4102_v57 }
  0xe2   :  { %v4231_v55 = vpop.eup %4230 }
  0xe3   :  { %463 = vrot.lane.b32.xlu1 %v4231_v55, %s4978_s7  ;;  %v4233_v58 = vpop.eup %4232 }
  0xe4   :  { %v297_v59 = vadd.f32 1.0, %v4233_v58  ;;  %v4235_v62 = vpop.eup %4234 }
  0xe5   :  { %v298_v63 = vadd.f32 1.0, %v4235_v62 }
  0xe6   :  { %4236 = vrcp.f32 %v297_v59  ;;  %v316_v28 = vand.u32 2147483648, %v297_v59  ;;  %vm310_vm2 = vweird.f32 %v297_v59  ;;  %v314_v30 = vand.u32 2147483647, %v297_v59 }
  0xe7   :  { %4238 = vpow2.f32 %v4103_v60  ;;  %v331_v45 = vand.u32 2147483648, %v298_v63  ;;  %vm325_vm6 = vweird.f32 %v298_v63  ;;  %v329_v50 = vand.u32 2147483647, %v298_v63 }
  0xe8   :  { %4240 = vpow2.f32 %v4106_v61  ;;  %v317_v35 = vor.u32 1.1754944e-38, %v316_v28  ;;  %vm315_vm4 = vcmp.eq.f32.partialorder %v314_v30, 8.507059e+37 }
  0xe9   :  { %4242 = vrcp.f32 %v298_v63  ;;  %v332_v58 = vor.u32 1.1754944e-38, %v331_v45  ;;  %vm330_vm8 = vcmp.eq.f32.partialorder %v329_v50, 8.507059e+37 }
  0xea   :  { %4244 = vpow2.f32 %v4104_v0 }
  0xeb   :  { %4246 = vpow2.f32 %v4105_v4 }
  0xec   :  { %v4237_v2 = vpop.eup %4236 }
  0xed   :  { %v4239_v8 = vpop.eup %4238  ;;  %v306_v10 = vmul.f32 %v4237_v2, %v297_v59  ;;  %vm311_vm1 = vweird.f32 %v4237_v2 }
  0xee   :  { %v4241_v9 = vpop.eup %4240  ;;  %v5162_v11 = vadd.f32 1.0, %v4239_v8  ;;  %vm312_vm3 = vmor %vm310_vm2, %vm311_vm1 }
  0xef   :  { %v5164_v12 = vadd.f32 1.0, %v4241_v9  ;;  %v4243_v13 = vpop.eup %4242  ;;  %v307_v14 = vsub.f32 1.0, %v306_v10  ;;  %v4108_v9 = vmul.f32 -1.442695, %v5157_v54 }
  0xf0   :  { %4248 = vrcp.f32 %v5162_v11  ;;  %v4245_v15 = vpop.eup %4244  ;;  %v321_v18 = vmul.f32 %v4243_v13, %v298_v63  ;;  %vm326_vm5 = vweird.f32 %v4243_v13  ;;  %vm340_vm11 = vweird.f32 %v5162_v11 }
  0xf1   :  { %4250 = vrcp.f32 %v5164_v12  ;;  %v4247_v16 = vpop.eup %4246  ;;  %v308_v19 = vmul.f32 %v4237_v2, %v307_v14  ;;  %v5168_v20 = vadd.f32 1.0, %v4245_v15  ;;  %vm327_vm7 = vmor %vm325_vm6, %vm326_vm5  ;;  %v391_v4 = vand.u32 2147483648, %v5164_v12 }
  0xf2   :  { %v5170_v21 = vadd.f32 1.0, %v4247_v16  ;;  %v322_v24 = vsub.f32 1.0, %v321_v18  ;;  %v346_v8 = vand.u32 2147483648, %v5162_v11  ;;  %vm385_vm12 = vweird.f32 %v5164_v12 }
  0xf3   :  { %v309_v26 = vadd.f32 %v4237_v2, %v308_v19  ;;  %4252 = vrcp.f32 %v5168_v20  ;;  %v389_v10 = vand.u32 2147483647, %v5164_v12  ;;  %v344_v14 = vand.u32 2147483647, %v5162_v11 }
  0xf4   :  { %4254 = vrcp.f32 %v5170_v21  ;;  %v323_v31 = vmul.f32 %v4243_v13, %v322_v24  ;;  %v392_v24 = vor.u32 1.1754944e-38, %v391_v4  ;;  %vm370_vm5 = vweird.f32 %v5170_v21 }
  0xf5   :  { %v313_v34 = vsel %vm312_vm3, %v4237_v2, %v309_v26  ;;  %4256 = vpow2.f32 %v4107_v47  ;;  %vm390_vm15 = vcmp.eq.f32.partialorder %v389_v10, 8.507059e+37  ;;  %vm345_vm1 = vcmp.eq.f32.partialorder %v344_v14, 8.507059e+37 }
  0xf6   :  { %v5172_v23 = vpop.eup %4248  ;;  %v324_v39 = vadd.f32 %v4243_v13, %v323_v31  ;;  %v5186_v44 = vsel %vm315_vm4, %v317_v35, %v313_v34  ;;  %4258 = vpow2.f32 %v4108_v9  ;;  %v376_v34 = vand.u32 2147483648, %v5170_v21 }
  0xf7   :  { %v5174_v25 = vpop.eup %4250  ;;  %v336_v29 = vmul.f32 %v5172_v23, %v5162_v11  ;;  %vm341_vm9 = vweird.f32 %v5172_v23  ;;  %vm355_vm4 = vweird.f32 %v5168_v20  ;;  %v361_v35 = vand.u32 2147483648, %v5168_v20 }
  0xf8   :  { %v381_v33 = vmul.f32 %v5174_v25, %v5164_v12  ;;  %v328_v56 = vsel %vm327_vm7, %v4243_v13, %v324_v39  ;;  %vm386_vm10 = vweird.f32 %v5174_v25  ;;  %vm5213_vm13 = vmor %vm340_vm11, %vm341_vm9  ;;  %v347_v12 = vor.u32 1.1754944e-38, %v346_v8 }
  0xf9   :  { %v337_v37 = vsub.f32 1.0, %v336_v29  ;;  %v5182_v38 = vpop.eup %4252  ;;  %v5199_v60 = vsel %vm330_vm8, %v332_v58, %v328_v56  ;;  %vm387_vm14 = vmor %vm385_vm12, %vm386_vm10  ;;  %v359_v39 = vand.u32 2147483647, %v5168_v20  ;;  %v377_v47 = vor.u32 1.1754944e-38, %v376_v34 }
  0xfa   :  { %v382_v40 = vsub.f32 1.0, %v381_v33  ;;  %v5184_v42 = vpop.eup %4254  ;;  %v351_v53 = vmul.f32 %v5182_v38, %v5168_v20  ;;  %vm356_vm2 = vweird.f32 %v5182_v38 }
  0xfb   :  { %v338_v52 = vmul.f32 %v5172_v23, %v337_v37  ;;  %v366_v55 = vmul.f32 %v5184_v42, %v5170_v21  ;;  %v4257_v16 = vpop.eup %4256  ;;  %vm371_vm3 = vweird.f32 %v5184_v42  ;;  %v374_v37 = vand.u32 2147483647, %v5170_v21  ;;  %vm357_vm6 = vmor %vm355_vm4, %vm356_vm2 }
  0xfc   :  { %v383_v57 = vmul.f32 %v5174_v25, %v382_v40  ;;  %v352_v62 = vsub.f32 1.0, %v351_v53  ;;  %vm372_vm7 = vmor %vm370_vm5, %vm371_vm3  ;;  %v4259_v40 = vpop.eup %4258  ;;  %vm360_vm9 = vcmp.eq.f32.partialorder %v359_v39, 8.507059e+37  ;;  %vm578_vm3 = vcmask 1041409  }
  0xfd   :  { %v339_v61 = vadd.f32 %v5172_v23, %v338_v52  ;;  %v367_v63 = vsub.f32 1.0, %v366_v55  ;;  %vm375_vm8 = vcmp.eq.f32.partialorder %v374_v37, 8.507059e+37  ;;  %v304_v53 = vadd.f32 1.0, %v4259_v40 }
  0xfe   :  { %v384_v2 = vadd.f32 %v5174_v25, %v383_v57  ;;  %v353_v15 = vmul.f32 %v5182_v38, %v352_v62  ;;  %vm581_vm4 = vcmask 1042434   ;;  %vm584_vm5 = vcmask 1043459  }
  0xff   :  { %v368_v18 = vmul.f32 %v5184_v42, %v367_v63  ;;  %v343_v19 = vsel %vm5213_vm13, %v5172_v23, %v339_v61  ;;  %v421_v14 = vand.u32 2147483648, %v304_v53 }
 0x100   :  { %v388_v54 = vsel %vm387_vm14, %v5174_v25, %v384_v2  ;;  %v5227_v28 = vsel %vm345_vm1, %v347_v12, %v343_v19  ;;  %v354_v30 = vadd.f32 %v5182_v38, %v353_v15  ;;  %v303_v25 = vadd.f32 1.0, %v4257_v16 }
 0x101   :  { %v5225_v11 = vsel %vm390_vm15, %v392_v24, %v388_v54  ;;  %v369_v31 = vadd.f32 %v5184_v42, %v368_v18  ;;  %vm415_vm15 = vweird.f32 %v304_v53  ;;  %v419_v15 = vand.u32 2147483647, %v304_v53 }
 0x102   :  { %4260 = vrcp.f32 %v303_v25  ;;  %v358_v45 = vsel %vm357_vm6, %v5182_v38, %v354_v30  ;;  %v406_v63 = vand.u32 2147483648, %v303_v25  ;;  %vm400_vm11 = vweird.f32 %v303_v25 }
 0x103   :  { %4262 = vrcp.f32 %v304_v53  ;;  %v422_v18 = vor.u32 1.1754944e-38, %v421_v14  ;;  %vm420_vm2 = vcmp.eq.f32.partialorder %v419_v15, 8.507059e+37  ;;  %v434_v12 = vmul.f32 0.0, %v5199_v60 }
 0x104   :  { %v407_v4 = vor.u32 1.1754944e-38, %v406_v63  ;;  %v435_v40 = vmul.f32 0.0, %v5227_v28  ;;  %vm587_vm6 = vcmask 1044484  }
 0x108   :  { %v4261_v56 = vpop.eup %4260 }
 0x109   :  { %v396_v38 = vmul.f32 %v4261_v56, %v303_v25  ;;  %v4263_v57 = vpop.eup %4262  ;;  %vm401_vm10 = vweird.f32 %v4261_v56 }
 0x10a   :  { %vm402_vm12 = vmor %vm400_vm11, %vm401_vm10  ;;  %vm416_vm14 = vweird.f32 %v4263_v57  ;;  %vm225_vm10 = vcmask 261120  }
 0x10b   :  { %vm417_vm1 = vmor %vm415_vm15, %vm416_vm14 }
 0x11f   :  { %v450_v43 = vpop.permute.xlu1 %449 }
 0x120   :  { %v473_v48 = vmul.f32 %v450_v43, %v5186_v44  ;;  %v373_v43 = vsel %vm372_vm7, %v5184_v42, %v369_v31  ;;  %v397_v42 = vsub.f32 1.0, %v396_v38  ;;  %vm590_vm7 = vcmask 1045509  }
 0x121   :  { %v5246_v21 = vsel %vm375_vm8, %v377_v47, %v373_v43  ;;  %v438_v43 = vmul.f32 0.0, %v5225_v11  ;;  %vm593_vm8 = vcmask 1046534  }
 0x122   :  { %489 = vrot.lane.b32.xlu1 %v473_v48, %s4978_s7  ;;  %v362_v48 = vor.u32 1.1754944e-38, %v361_v35  ;;  %v398_v58 = vmul.f32 %v4261_v56, %v397_v42 }
 0x124   :  { %v5248_v50 = vsel %vm360_vm9, %v362_v48, %v358_v45  ;;  %v399_v61 = vadd.f32 %v4261_v56, %v398_v58  ;;  %vm596_vm9 = vcmask 1047559  }
 0x125   :  { %v5197_v49 = vpop.permute.xlu2 %457  ;;  %v452_v59 = vpop.permute.xlu0 %451 }
 0x126   :  { %v474_v0 = vmul.f32 %v452_v59, %v5199_v60  ;;  %v477_v20 = vmul.f32 %v5197_v49, %v5246_v21  ;;  %v411_v59 = vmul.f32 %v4263_v57, %v304_v53  ;;  %v403_v49 = vsel %vm402_vm12, %v4261_v56, %v399_v61 }
 0x127   :  { %v437_v53 = vmul.f32 0.0, %v5246_v21 }
 0x128   :  { %491 = vrot.lane.b32.xlu2 %v474_v0, %s4978_s7  ;;  %v412_v62 = vsub.f32 1.0, %v411_v59  ;;  %v404_v0 = vand.u32 2147483647, %v303_v25  ;;  %v436_v25 = vmul.f32 0.0, %v5248_v50 }
 0x12a   :  { %v413_v2 = vmul.f32 %v4263_v57, %v412_v62  ;;  %vm405_vm13 = vcmp.eq.f32.partialorder %v404_v0, 8.507059e+37 }
 0x12b   :  { %v5255_v8 = vsel %vm405_vm13, %v407_v4, %v403_v49 }
 0x12c   :  { %v414_v13 = vadd.f32 %v4263_v57, %v413_v2 }
 0x12d   :  { %v460_v26 = vpop.permute.xlu2 %459  ;;  %v454_v29 = vpop.permute.xlu0 %453 }
 0x12e   :  { %v478_v23 = vmul.f32 %v460_v26, %v5225_v11  ;;  %v475_v33 = vmul.f32 %v454_v29, %v5227_v28  ;;  %v418_v16 = vsel %vm417_vm1, %v4263_v57, %v414_v13 }
 0x12f   :  { %v5259_v54 = vsel %vm420_vm2, %v422_v18, %v418_v16 }
 0x130   :  { %493 = vrot.lane.b32.xlu0 %v475_v33, %s4978_s7  ;;  %499 = vrot.lane.b32.xlu1 %v478_v23, %s4978_s7  ;;  %v433_v33 = vmul.f32 0.0, %v5186_v44  ;;  %v440_v62 = vmul.f32 0.0, %v5259_v54 }
 0x135   :  { %v456_v52 = vpop.permute.xlu1 %455 }
 0x136   :  { %v476_v55 = vmul.f32 %v456_v52, %v5248_v50 }
 0x138   :  { %497 = vrot.lane.b32.xlu0 %v477_v20, %s4978_s7  ;;  %495 = vrot.lane.b32.xlu2 %v476_v55, %s4978_s7  ;;  %v439_v20 = vmul.f32 0.0, %v5255_v8 }
 0x14d   :  { %v462_v9 = vpop.permute.xlu0 %461 }
 0x14e   :  { %v479_v10 = vmul.f32 %v462_v9, %v5255_v8 }
 0x150   :  { %501 = vrot.lane.b32.xlu2 %v479_v10, %s4978_s7 }
 0x155   :  { %v464_v19 = vpop.permute.xlu1 %463 }
 0x156   :  { %v480_v24 = vmul.f32 %v464_v19, %v5259_v54 }
 0x158   :  { %503 = vrot.lane.b32.xlu0 %v480_v24, %s4978_s7 }
 0x182   :  { %v492_v26 = vpop.permute.xlu2 %491 }
 0x183   :  { %v5264_v29 = vadd.f32 %v492_v26, %v434_v12 }
 0x185   :  { %4264 = vtanh.f32 %v5264_v29 }
 0x18b   :  { %v4265_v30 = vpop.eup %4264 }
 0x18c   :  { %539 = vrot.lane.b32.xlu1 %v4265_v30, %s4978_s7 }
 0x192   :  { %v496_v31 = vpop.permute.xlu2 %495 }
 0x193   :  { %v5269_v23 = vadd.f32 %v496_v31, %v436_v25 }
 0x194   :  { %v490_v34 = vpop.permute.xlu1 %489 }
 0x195   :  { %4266 = vtanh.f32 %v5269_v23  ;;  %v5273_v35 = vadd.f32 %v490_v34, %v433_v33 }
 0x197   :  { %4268 = vtanh.f32 %v5273_v35 }
 0x19b   :  { %v4267_v37 = vpop.eup %4266 }
 0x19c   :  { %543 = vrot.lane.b32.xlu1 %v4267_v37, %s4978_s7 }
 0x19d   :  { %v4269_v39 = vpop.eup %4268 }
 0x19e   :  { %537 = vrot.lane.b32.xlu0 %v4269_v39, %s4978_s7 }
 0x1a2   :  { %v494_v45 = vpop.permute.xlu0 %493  ;;  %v500_v47 = vpop.permute.xlu1 %499 }
 0x1a3   :  { %v5280_v48 = vadd.f32 %v494_v45, %v435_v40  ;;  %v5282_v52 = vadd.f32 %v500_v47, %v438_v43 }
 0x1a5   :  { %4270 = vtanh.f32 %v5280_v48 }
 0x1a6   :  { %4272 = vtanh.f32 %v5282_v52 }
 0x1aa   :  { %v498_v55 = vpop.permute.xlu0 %497  ;;  %v502_v56 = vpop.permute.xlu2 %501 }
 0x1ab   :  { %v4271_v38 = vpop.eup %4270  ;;  %v5288_v42 = vadd.f32 %v498_v55, %v437_v53  ;;  %v5290_v57 = vadd.f32 %v502_v56, %v439_v20 }
 0x1ac   :  { %v4273_v58 = vpop.eup %4272  ;;  %541 = vrot.lane.b32.xlu2 %v4271_v38, %s4978_s7 }
 0x1ad   :  { %4274 = vtanh.f32 %v5288_v42  ;;  %547 = vrot.lane.b32.xlu0 %v4273_v58, %s4978_s7 }
 0x1ae   :  { %4276 = vtanh.f32 %v5290_v57 }
 0x1b3   :  { %v4275_v59 = vpop.eup %4274 }
 0x1b4   :  { %v4277_v61 = vpop.eup %4276  ;;  %545 = vrot.lane.b32.xlu2 %v4275_v59, %s4978_s7 }
 0x1b5   :  { %549 = vrot.lane.b32.xlu1 %v4277_v61, %s4978_s7 }
 0x1ca   :  { %v504_v63 = vpop.permute.xlu0 %503 }
 0x1cb   :  { %v5299_v0 = vadd.f32 %v504_v63, %v440_v62 }
 0x1cd   :  { %4278 = vtanh.f32 %v5299_v0 }
 0x1d3   :  { %v4279_v49 = vpop.eup %4278 }
 0x1d4   :  { %551 = vrot.lane.b32.xlu2 %v4279_v49, %s4978_s7 }
 0x1fe   :  { %v540_v2 = vpop.permute.xlu1 %539 }
 0x1ff   :  { %v562_v13 = vmul.f32 %v540_v2, %v5199_v60 }
 0x201   :  { %v577_v16 = vrot.slane %v562_v13, 7 }
 0x206   :  { %v542_v4 = vpop.permute.xlu2 %541 }
 0x207   :  { %v563_v15 = vmul.f32 %v542_v4, %v5227_v28 }
 0x209   :  { %v580_v30 = vrot.slane %v563_v15, 6 }
 0x20e   :  { %v544_v10 = vpop.permute.xlu1 %543  ;;  %v546_v18 = vpop.permute.xlu2 %545 }
 0x20f   :  { %v564_v24 = vmul.f32 %v544_v10, %v5248_v50  ;;  %v565_v31 = vmul.f32 %v546_v18, %v5246_v21 }
 0x210   :  { %v538_v9 = vpop.permute.xlu0 %537 }
 0x211   :  { %v561_v14 = vmul.f32 %v538_v9, %v5186_v44  ;;  %v583_v28 = vrot.slane %v564_v24, 5  ;;  %v586_v50 = vrot.slane %v565_v31, 4 }
 0x213   :  { %v579_v12 = vsel %vm578_vm3, %v577_v16, %v561_v14 }
 0x214   :  { %v582_v60 = vsel %vm581_vm4, %v580_v30, %v579_v12 }
 0x215   :  { %v585_v34 = vsel %vm584_vm5, %v583_v28, %v582_v60 }
 0x21f   :  { %v548_v19 = vpop.permute.xlu0 %547 }
 0x220   :  { %v566_v25 = vmul.f32 %v548_v19, %v5225_v11  ;;  %v588_v11 = vsel %vm587_vm6, %v586_v50, %v585_v34 }
 0x222   :  { %v589_v33 = vrot.slane %v566_v25, 3 }
 0x224   :  { %v591_v43 = vsel %vm590_vm7, %v589_v33, %v588_v11 }
 0x227   :  { %v550_v26 = vpop.permute.xlu1 %549 }
 0x228   :  { %v567_v44 = vmul.f32 %v550_v26, %v5255_v8 }
 0x22a   :  { %v592_v37 = vrot.slane %v567_v44, 2 }
 0x22c   :  { %v594_v8 = vsel %vm593_vm8, %v592_v37, %v591_v43 }
 0x22e   :  { %v552_v39 = vpop.permute.xlu2 %551 }
 0x22f   :  { %v568_v40 = vmul.f32 %v552_v39, %v5259_v54 }
 0x231   :  { %v595_v21 = vrot.slane %v568_v40, 1 }
 0x233   :  { %v597_v45 = vsel %vm596_vm9, %v595_v21, %v594_v8 }
 0x234   :  { %598 = vrot.lane.b32.xlu0 %v597_v45, %s4979_s21 }
 0x2a6   :  { %v599_v47 = vpop.permute.xlu0 %598 }
 0x2a7   :  { %4109 = vmatmul.msk.f32.vlgmr.msra.gmra.mxu2 %vm225_vm10, %v599_v47 }
 0x2a8   :  { %2954 = vmatpush.msra.mxu2 %v5079_v1 }
 0x2aa   :  { %2955 = vmatpush.msra.mxu2 %v5082_v3 }
 0x2ac   :  { %2956 = vmatpush.msra.mxu2 %v5084_v5 }
 0x2ae   :  { %2957 = vmatpush.msra.mxu2 %v5090_v6 }
 0x32a   :  { %v619_v54 = vpop.f32.mrf.mxu2 }
 0x32b   :  { %v639_v53 = vadd.f32 %v619_v54, %v5127_v22  ;;  %v624_v20 = vrot.slane %v619_v54, 1  ;;  %v623_v55 = vrot.slane %v619_v54, 7  ;;  %v627_v38 = vrot.slane %v619_v54, 4 }
 0x32c   :  { %v626_v59 = vrot.slane %v619_v54, 3  ;;  %v625_v3 = vrot.slane %v619_v54, 2  ;;  %v629_v49 = vrot.slane %v619_v54, 6  ;;  %v628_v2 = vrot.slane %v619_v54, 5 }
 0x32d   :  { %4280 = vtanh.f32 %v639_v53  ;;  %v640_v56 = vadd.f32 %v624_v20, %v5131_v27  ;;  %v638_v58 = vadd.f32 %v623_v55, %v5124_v17  ;;  %v643_v1 = vadd.f32 %v627_v38, %v5143_v41 }
 0x32e   :  { %v642_v6 = vadd.f32 %v626_v59, %v5139_v36  ;;  %v641_v62 = vadd.f32 %v625_v3, %v5135_v32  ;;  %v645_v9 = vadd.f32 %v629_v49, %v5154_v51  ;;  %v644_v13 = vadd.f32 %v628_v2, %v5147_v46 }
 0x32f   :  { %4282 = vtanh.f32 %v640_v56  ;;  %v4112_v18 = vmul.f32 -1.442695, %v640_v56  ;;  %v4111_v25 = vmul.f32 -1.442695, %v639_v53  ;;  %v4110_v28 = vmul.f32 -1.442695, %v638_v58 }
 0x330   :  { %4284 = vtanh.f32 %v638_v58  ;;  %v4114_v19 = vmul.f32 -1.442695, %v642_v6  ;;  %v4117_v26 = vmul.f32 -1.442695, %v645_v9  ;;  %v4115_v34 = vmul.f32 -1.442695, %v643_v1 }
 0x331   :  { %4286 = vtanh.f32 %v643_v1  ;;  %v4113_v11 = vmul.f32 -1.442695, %v641_v62  ;;  %v4116_v38 = vmul.f32 -1.442695, %v644_v13 }
 0x332   :  { %4288 = vtanh.f32 %v642_v6 }
 0x333   :  { %v4281_v5 = vpop.eup %4280  ;;  %4290 = vtanh.f32 %v641_v62 }
 0x334   :  { %848 = vrot.lane.b32.xlu0 %v4281_v5, %s4978_s7  ;;  %4292 = vtanh.f32 %v645_v9 }
 0x335   :  { %v4283_v61 = vpop.eup %4282  ;;  %4294 = vtanh.f32 %v644_v13 }
 0x336   :  { %850 = vrot.lane.b32.xlu2 %v4283_v61, %s4978_s7  ;;  %v4285_v63 = vpop.eup %4284  ;;  %4296 = vpow2.f32 %v4112_v18 }
 0x337   :  { %846 = vrot.lane.b32.xlu1 %v4285_v63, %s4978_s7  ;;  %v4287_v4 = vpop.eup %4286  ;;  %4298 = vpow2.f32 %v4114_v19 }
 0x338   :  { %v4289_v10 = vpop.eup %4288 }
 0x339   :  { %v4291_v14 = vpop.eup %4290 }
 0x33a   :  { %v4293_v15 = vpop.eup %4292 }
 0x33b   :  { %v4295_v16 = vpop.eup %4294 }
 0x33c   :  { %856 = vrot.lane.b32.xlu0 %v4287_v4, %s4978_s7  ;;  %v4297_v24 = vpop.eup %4296 }
 0x33d   :  { %v672_v12 = vadd.f32 1.0, %v4297_v24  ;;  %v4299_v30 = vpop.eup %4298 }
 0x33e   :  { %854 = vrot.lane.b32.xlu2 %v4289_v10, %s4978_s7  ;;  %v5340_v31 = vadd.f32 1.0, %v4299_v30 }
 0x33f   :  { %852 = vrot.lane.b32.xlu1 %v4291_v14, %s4978_s7  ;;  %4300 = vrcp.f32 %v672_v12  ;;  %v719_v55 = vand.u32 2147483648, %v672_v12  ;;  %vm713_vm12 = vweird.f32 %v672_v12  ;;  %v717_v58 = vand.u32 2147483647, %v672_v12 }
 0x340   :  { %4302 = vpow2.f32 %v4117_v26  ;;  %v749_v10 = vand.u32 2147483648, %v5340_v31  ;;  %vm743_vm1 = vweird.f32 %v5340_v31 }
 0x341   :  { %4304 = vpow2.f32 %v4111_v25  ;;  %v720_v61 = vor.u32 1.1754944e-38, %v719_v55  ;;  %vm718_vm14 = vcmp.eq.f32.partialorder %v717_v58, 8.507059e+37 }
 0x342   :  { %4306 = vrcp.f32 %v5340_v31  ;;  %v750_v26 = vor.u32 1.1754944e-38, %v749_v10 }
 0x343   :  { %4308 = vpow2.f32 %v4110_v28 }
 0x344   :  { %4310 = vpow2.f32 %v4115_v34 }
 0x345   :  { %v4301_v60 = vpop.eup %4300 }
 0x346   :  { %860 = vrot.lane.b32.xlu2 %v4293_v15, %s4978_s7  ;;  %v4303_v44 = vpop.eup %4302  ;;  %v709_v33 = vmul.f32 %v4301_v60, %v672_v12  ;;  %vm714_vm11 = vweird.f32 %v4301_v60  ;;  %v747_v15 = vand.u32 2147483647, %v5340_v31 }
 0x347   :  { %858 = vrot.lane.b32.xlu1 %v4295_v16, %s4978_s7  ;;  %v5343_v50 = vadd.f32 1.0, %v4303_v44  ;;  %v4305_v37 = vpop.eup %4304  ;;  %vm715_vm13 = vmor %vm713_vm12, %vm714_vm11 }
 0x348   :  { %v710_v39 = vsub.f32 1.0, %v709_v33  ;;  %v4307_v40 = vpop.eup %4306  ;;  %v5347_v8 = vadd.f32 1.0, %v4305_v37  ;;  %vm748_vm11 = vcmp.eq.f32.partialorder %v747_v15, 8.507059e+37 }
 0x349   :  { %4312 = vrcp.f32 %v5343_v50  ;;  %v739_v43 = vmul.f32 %v4307_v40, %v5340_v31  ;;  %v4309_v45 = vpop.eup %4308  ;;  %vm744_vm15 = vweird.f32 %v4307_v40  ;;  %v794_v33 = vand.u32 2147483648, %v5343_v50 }
 0x34a   :  { %v711_v21 = vmul.f32 %v4301_v60, %v710_v39  ;;  %4314 = vpow2.f32 %v4113_v11  ;;  %v4311_v47 = vpop.eup %4310  ;;  %v5352_v56 = vadd.f32 1.0, %v4309_v45  ;;  %vm745_vm2 = vmor %vm743_vm1, %vm744_vm15 }
 0x34b   :  { %v740_v53 = vsub.f32 1.0, %v739_v43  ;;  %4316 = vrcp.f32 %v5347_v8  ;;  %v5354_v59 = vadd.f32 1.0, %v4311_v47  ;;  %v795_v45 = vor.u32 1.1754944e-38, %v794_v33 }
 0x34c   :  { %v712_v54 = vadd.f32 %v4301_v60, %v711_v21  ;;  %4318 = vrcp.f32 %v5352_v56 }
 0x34d   :  { %v741_v3 = vmul.f32 %v4307_v40, %v740_v53  ;;  %4320 = vpow2.f32 %v4116_v38  ;;  %v704_v53 = vand.u32 2147483648, %v5347_v8  ;;  %v764_v15 = vand.u32 2147483648, %v5354_v59 }
 0x34e   :  { %v716_v1 = vsel %vm715_vm13, %v4301_v60, %v712_v54  ;;  %4322 = vrcp.f32 %v5354_v59  ;;  %vm788_vm13 = vweird.f32 %v5343_v50 }
 0x34f   :  { %v5350_v20 = vpop.eup %4312  ;;  %v5361_v49 = vsel %vm718_vm14, %v720_v61, %v716_v1  ;;  %v742_v4 = vadd.f32 %v4307_v40, %v741_v3 }
 0x350   :  { %v784_v5 = vmul.f32 %v5350_v20, %v5343_v50  ;;  %v4315_v6 = vpop.eup %4314  ;;  %vm789_vm12 = vweird.f32 %v5350_v20 }
 0x351   :  { %v5359_v62 = vpop.eup %4316  ;;  %v5368_v14 = vadd.f32 1.0, %v4315_v6  ;;  %v746_v19 = vsel %vm745_vm2, %v4307_v40, %v742_v4  ;;  %v792_v40 = vand.u32 2147483647, %v5343_v50  ;;  %vm790_vm14 = vmor %vm788_vm13, %vm789_vm12  ;;  %vm698_vm2 = vweird.f32 %v5347_v8 }
 0x352   :  { %v785_v9 = vsub.f32 1.0, %v784_v5  ;;  %v694_v13 = vmul.f32 %v5359_v62, %v5347_v8  ;;  %v5373_v16 = vpop.eup %4318  ;;  %v5381_v60 = vsel %vm748_vm11, %v750_v26, %v746_v19  ;;  %vm699_vm15 = vweird.f32 %v5359_v62 }
 0x353   :  { %v4321_v18 = vpop.eup %4320  ;;  %4324 = vrcp.f32 %v5368_v14  ;;  %v679_v25 = vmul.f32 %v5373_v16, %v5352_v56  ;;  %vm793_vm1 = vcmp.eq.f32.partialorder %v792_v40, 8.507059e+37  ;;  %vm700_vm11 = vmor %vm698_vm2, %vm699_vm15  ;;  %v705_v6 = vor.u32 1.1754944e-38, %v704_v53 }
 0x354   :  { %v786_v24 = vmul.f32 %v5350_v20, %v785_v9  ;;  %v5376_v12 = vpop.eup %4322  ;;  %v695_v30 = vsub.f32 1.0, %v694_v13  ;;  %v5390_v39 = vadd.f32 1.0, %v4321_v18  ;;  %vm684_vm12 = vweird.f32 %v5373_v16 }
 0x355   :  { %v754_v37 = vmul.f32 %v5376_v12, %v5354_v59  ;;  %v680_v11 = vsub.f32 1.0, %v679_v25  ;;  %v689_v4 = vand.u32 2147483648, %v5352_v56  ;;  %vm758_vm2 = vweird.f32 %v5354_v59 }
 0x356   :  { %v787_v28 = vadd.f32 %v5350_v20, %v786_v24  ;;  %v696_v34 = vmul.f32 %v5359_v62, %v695_v30  ;;  %4326 = vrcp.f32 %v5390_v39 }
 0x357   :  { %v755_v54 = vsub.f32 1.0, %v754_v37  ;;  %v681_v55 = vmul.f32 %v5373_v16, %v680_v11  ;;  %v690_v26 = vor.u32 1.1754944e-38, %v689_v4 }
 0x358   :  { %v791_v43 = vsel %vm790_vm14, %v5350_v20, %v787_v28  ;;  %v697_v47 = vadd.f32 %v5359_v62, %v696_v34  ;;  %v702_v20 = vand.u32 2147483647, %v5347_v8  ;;  %vm683_vm14 = vweird.f32 %v5352_v56 }
 0x359   :  { %v5395_v21 = vpop.eup %4324  ;;  %v5405_v38 = vsel %vm793_vm1, %v795_v45, %v791_v43  ;;  %v756_v5 = vmul.f32 %v5376_v12, %v755_v54  ;;  %v682_v61 = vadd.f32 %v5373_v16, %v681_v55  ;;  %vm685_vm15 = vmor %vm683_vm14, %vm684_vm12  ;;  %vm759_vm1 = vweird.f32 %v5376_v12 }
 0x35a   :  { %v724_v50 = vmul.f32 %v5395_v21, %v5368_v14  ;;  %v701_v3 = vsel %vm700_vm11, %v5359_v62, %v697_v47  ;;  %vm703_vm13 = vcmp.eq.f32.partialorder %v702_v20, 8.507059e+37  ;;  %v687_v62 = vand.u32 2147483647, %v5352_v56  ;;  %vm760_vm12 = vmor %vm758_vm2, %vm759_vm1 }
 0x35b   :  { %v5416_v9 = vsel %vm703_vm13, %v705_v6, %v701_v3  ;;  %v757_v13 = vadd.f32 %v5376_v12, %v756_v5  ;;  %v686_v18 = vsel %vm685_vm15, %v5373_v16, %v682_v61  ;;  %v762_v56 = vand.u32 2147483647, %v5354_v59 }
 0x35c   :  { %vm688_vm11 = vcmp.eq.f32.partialorder %v687_v62, 8.507059e+37  ;;  %vm729_vm13 = vweird.f32 %v5395_v21  ;;  %v734_v34 = vand.u32 2147483648, %v5368_v14  ;;  %vm728_vm15 = vweird.f32 %v5368_v14 }
 0x35d   :  { %v5430_v25 = vsel %vm688_vm11, %v690_v26, %v686_v18  ;;  %vm763_vm14 = vcmp.eq.f32.partialorder %v762_v56, 8.507059e+37  ;;  %vm730_vm1 = vmor %vm728_vm15, %vm729_vm13  ;;  %v815_v5 = vrot.slane %v5264_v29, 7  ;;  %v816_v61 = vrot.slane %v5280_v48, 7 }
 0x35e   :  { %v735_v45 = vor.u32 1.1754944e-38, %v734_v34  ;;  %v819_v62 = vrot.slane %v5282_v52, 7  ;;  %v821_v52 = vrot.slane %v5299_v0, 7 }
 0x35f   :  { %v831_v6 = vmul.f32 %v815_v5, %v5416_v9 }
 0x360   :  { %v837_v56 = vmul.f32 %v821_v52, %v5405_v38 }
 0x390   :  { %v851_v63 = vpop.permute.xlu2 %850 }
 0x391   :  { %v872_v2 = vmul.f32 %v851_v63, %v5361_v49  ;;  %v725_v63 = vsub.f32 1.0, %v724_v50  ;;  %v779_v50 = vand.u32 2147483648, %v5390_v39 }
 0x393   :  { %890 = vrot.lane.b32.xlu1 %v872_v2, %s4978_s7  ;;  %v4327_v2 = vpop.eup %4326  ;;  %v726_v19 = vmul.f32 %v5395_v21, %v725_v63 }
 0x394   :  { %v769_v24 = vmul.f32 %v4327_v2, %v5390_v39  ;;  %vm774_vm11 = vweird.f32 %v4327_v2 }
 0x395   :  { %v727_v28 = vadd.f32 %v5395_v21, %v726_v19 }
 0x396   :  { %v770_v33 = vsub.f32 1.0, %v769_v24 }
 0x397   :  { %v731_v11 = vsel %vm730_vm1, %v5395_v21, %v727_v28 }
 0x398   :  { %v855_v31 = vpop.permute.xlu2 %854  ;;  %v771_v43 = vmul.f32 %v4327_v2, %v770_v33 }
 0x399   :  { %v874_v44 = vmul.f32 %v855_v31, %v5381_v60  ;;  %v761_v31 = vsel %vm760_vm12, %v5376_v12, %v757_v13  ;;  %v732_v12 = vand.u32 2147483647, %v5368_v14  ;;  %vm773_vm12 = vweird.f32 %v5390_v39 }
 0x39a   :  { %v772_v55 = vadd.f32 %v4327_v2, %v771_v43  ;;  %v777_v14 = vand.u32 2147483647, %v5390_v39  ;;  %vm775_vm13 = vmor %vm773_vm12, %vm774_vm11  ;;  %v832_v39 = vmul.f32 %v816_v61, %v5361_v49 }
 0x39b   :  { %894 = vrot.lane.b32.xlu1 %v874_v44, %s4978_s7  ;;  %v765_v44 = vor.u32 1.1754944e-38, %v764_v15  ;;  %vm733_vm2 = vcmp.eq.f32.partialorder %v732_v12, 8.507059e+37 }
 0x39c   :  { %v5445_v47 = vsel %vm733_vm2, %v735_v45, %v731_v11  ;;  %v776_v21 = vsel %vm775_vm13, %v4327_v2, %v772_v55 }
 0x39d   :  { %v5438_v37 = vsel %vm763_vm14, %v765_v44, %v761_v31  ;;  %vm778_vm14 = vcmp.eq.f32.partialorder %v777_v14, 8.507059e+37 }
 0x39e   :  { %v835_v29 = vmul.f32 %v819_v62, %v5438_v37 }
 0x3a0   :  { %v861_v58 = vpop.permute.xlu2 %860 }
 0x3a1   :  { %v877_v1 = vmul.f32 %v861_v58, %v5405_v38  ;;  %v780_v58 = vor.u32 1.1754944e-38, %v779_v50 }
 0x3a3   :  { %900 = vrot.lane.b32.xlu1 %v877_v1, %s4978_s7  ;;  %v5452_v20 = vsel %vm778_vm14, %v780_v58, %v776_v21 }
 0x3a6   :  { %v849_v8 = vpop.permute.xlu0 %848 }
 0x3a7   :  { %v871_v10 = vmul.f32 %v849_v8, %v5416_v9 }
 0x3a9   :  { %888 = vrot.lane.b32.xlu2 %v871_v10, %s4978_s7  ;;  %v847_v30 = vpop.permute.xlu1 %846  ;;  %v818_v10 = vrot.slane %v5288_v42, 7 }
 0x3aa   :  { %v870_v16 = vmul.f32 %v847_v30, %v5430_v25 }
 0x3ab   :  { %v834_v18 = vmul.f32 %v818_v10, %v5381_v60 }
 0x3ac   :  { %886 = vrot.lane.b32.xlu0 %v870_v16, %s4978_s7  ;;  %v814_v16 = vrot.slane %v5273_v35, 7  ;;  %v820_v35 = vrot.slane %v5290_v57, 7 }
 0x3ae   :  { %v857_v59 = vpop.permute.xlu0 %856  ;;  %v830_v33 = vmul.f32 %v814_v16, %v5430_v25  ;;  %v836_v45 = vmul.f32 %v820_v35, %v5452_v20 }
 0x3af   :  { %v875_v40 = vmul.f32 %v857_v59, %v5438_v37  ;;  %v817_v59 = vrot.slane %v5269_v23, 7 }
 0x3b1   :  { %896 = vrot.lane.b32.xlu2 %v875_v40, %s4978_s7  ;;  %v853_v54 = vpop.permute.xlu1 %852  ;;  %v833_v12 = vmul.f32 %v817_v59, %v5445_v47 }
 0x3b2   :  { %v873_v53 = vmul.f32 %v853_v54, %v5445_v47 }
 0x3b4   :  { %892 = vrot.lane.b32.xlu0 %v873_v53, %s4978_s7 }
 0x3b9   :  { %v859_v1 = vpop.permute.xlu1 %858 }
 0x3ba   :  { %v876_v3 = vmul.f32 %v859_v1, %v5452_v20 }
 0x3bc   :  { %898 = vrot.lane.b32.xlu0 %v876_v3, %s4978_s7 }
 0x403   :  { %v889_v63 = vpop.permute.xlu2 %888 }
 0x404   :  { %v5459_v4 = vadd.f32 %v889_v63, %v831_v6 }
 0x405   :  { %v891_v2 = vpop.permute.xlu1 %890 }
 0x406   :  { %4328 = vtanh.f32 %v5459_v4  ;;  %v5463_v8 = vadd.f32 %v891_v2, %v832_v39 }
 0x408   :  { %4330 = vtanh.f32 %v5463_v8 }
 0x40b   :  { %v897_v13 = vpop.permute.xlu2 %896 }
 0x40c   :  { %v4329_v48 = vpop.eup %4328  ;;  %v5469_v15 = vadd.f32 %v897_v13, %v835_v29 }
 0x40d   :  { %936 = vrot.lane.b32.xlu1 %v4329_v48, %s4978_s7  ;;  %v895_v19 = vpop.permute.xlu1 %894 }
 0x40e   :  { %4332 = vtanh.f32 %v5469_v15  ;;  %v4331_v24 = vpop.eup %4330  ;;  %v5474_v26 = vadd.f32 %v895_v19, %v834_v18 }
 0x40f   :  { %938 = vrot.lane.b32.xlu0 %v4331_v24, %s4978_s7 }
 0x410   :  { %4334 = vtanh.f32 %v5474_v26 }
 0x414   :  { %v4333_v42 = vpop.eup %4332 }
 0x415   :  { %944 = vrot.lane.b32.xlu1 %v4333_v42, %s4978_s7  ;;  %v901_v30 = vpop.permute.xlu1 %900 }
 0x416   :  { %v4335_v31 = vpop.eup %4334  ;;  %v5481_v44 = vadd.f32 %v901_v30, %v837_v56 }
 0x417   :  { %942 = vrot.lane.b32.xlu0 %v4335_v31, %s4978_s7 }
 0x418   :  { %4336 = vtanh.f32 %v5481_v44 }
 0x41e   :  { %v4337_v28 = vpop.eup %4336  ;;  %v887_v34 = vpop.permute.xlu0 %886 }
 0x41f   :  { %948 = vrot.lane.b32.xlu0 %v4337_v28, %s4978_s7  ;;  %v5488_v0 = vadd.f32 %v887_v34, %v830_v33 }
 0x421   :  { %4338 = vtanh.f32 %v5488_v0 }
 0x426   :  { %v893_v40 = vpop.permute.xlu0 %892 }
 0x427   :  { %v4339_v11 = vpop.eup %4338  ;;  %v5493_v43 = vadd.f32 %v893_v40, %v833_v12 }
 0x428   :  { %934 = vrot.lane.b32.xlu2 %v4339_v11, %s4978_s7 }
 0x429   :  { %4340 = vtanh.f32 %v5493_v43 }
 0x42e   :  { %v899_v54 = vpop.permute.xlu0 %898 }
 0x42f   :  { %v4341_v53 = vpop.eup %4340  ;;  %v5499_v55 = vadd.f32 %v899_v54, %v836_v45 }
 0x430   :  { %940 = vrot.lane.b32.xlu2 %v4341_v53, %s4978_s7 }
 0x431   :  { %4342 = vtanh.f32 %v5499_v55 }
 0x437   :  { %v4343_v23 = vpop.eup %4342 }
 0x438   :  { %946 = vrot.lane.b32.xlu2 %v4343_v23, %s4978_s7 }
 0x47f   :  { %v937_v21 = vpop.permute.xlu1 %936 }
 0x480   :  { %v959_v5 = vmul.f32 %v937_v21, %v5416_v9 }
 0x481   :  { %v939_v50 = vpop.permute.xlu0 %938 }
 0x482   :  { %v935_v14 = vpop.permute.xlu2 %934  ;;  %v960_v57 = vmul.f32 %v939_v50, %v5361_v49 }
 0x483   :  { %v958_v58 = vmul.f32 %v935_v14, %v5430_v25 }
 0x484   :  { %v976_v61 = vrot.slane %v960_v57, 7 }
 0x485   :  { %v974_v1 = vrot.slane %v958_v58, 1 }
 0x487   :  { %v975_v2 = vsel %vm578_vm3, %v959_v5, %v974_v1  ;;  %v945_v62 = vpop.permute.xlu1 %944 }
 0x488   :  { %v977_v13 = vsel %vm581_vm4, %v976_v61, %v975_v2  ;;  %v963_v25 = vmul.f32 %v945_v62, %v5438_v37 }
 0x489   :  { %v943_v3 = vpop.permute.xlu0 %942 }
 0x48a   :  { %v941_v6 = vpop.permute.xlu2 %940  ;;  %v962_v63 = vmul.f32 %v943_v3, %v5381_v60 }
 0x48b   :  { %v961_v39 = vmul.f32 %v941_v6, %v5445_v47  ;;  %v982_v47 = vrot.slane %v963_v25, 4 }
 0x48c   :  { %v980_v10 = vrot.slane %v962_v63, 5 }
 0x48d   :  { %v978_v29 = vrot.slane %v961_v39, 6 }
 0x48f   :  { %v979_v49 = vsel %vm584_vm5, %v978_v29, %v977_v13 }
 0x490   :  { %v981_v60 = vsel %vm587_vm6, %v980_v10, %v979_v49 }
 0x491   :  { %v949_v48 = vpop.permute.xlu0 %948  ;;  %v983_v42 = vsel %vm590_vm7, %v982_v47, %v981_v60 }
 0x492   :  { %v965_v9 = vmul.f32 %v949_v48, %v5405_v38  ;;  %v947_v18 = vpop.permute.xlu2 %946 }
 0x493   :  { %v964_v19 = vmul.f32 %v947_v18, %v5452_v20 }
 0x494   :  { %v986_v24 = vrot.slane %v965_v9, 2 }
 0x495   :  { %v984_v52 = vrot.slane %v964_v19, 3 }
 0x497   :  { %v985_v56 = vsel %vm593_vm8, %v984_v52, %v983_v42 }
 0x498   :  { %v987_v30 = vsel %vm596_vm9, %v986_v24, %v985_v56 }
 0x499   :  { %988 = vrot.lane.b32.xlu1 %v987_v30, %s4979_s21 }
 0x50b   :  { %v989_v37 = vpop.permute.xlu1 %988 }
 0x50c   :  { %4118 = vmatmul.msk.f32.vlgmr.msra.gmra.mxu3 %vm225_vm10, %v989_v37 }
 0x58f   :  { %v1009_v38 = vpop.f32.mrf.mxu3 }
 0x590   :  { %v1030_v31 = vadd.f32 %v1009_v38, %v5131_v27  ;;  %v1015_v20 = vrot.slane %v1009_v38, 1  ;;  %v1014_v16 = vrot.slane %v1009_v38, 7  ;;  %v1013_v33 = vrot.slane %v1009_v38, 6 }
 0x591   :  { %v1017_v59 = vrot.slane %v1009_v38, 3  ;;  %v1016_v40 = vrot.slane %v1009_v38, 2  ;;  %v1018_v45 = vrot.slane %v1009_v38, 4  ;;  %v1019_v14 = vrot.slane %v1009_v38, 5 }
 0x592   :  { %4344 = vtanh.f32 %v1030_v31  ;;  %v1031_v28 = vadd.f32 %v1015_v20, %v5135_v32  ;;  %v1029_v34 = vadd.f32 %v1014_v16, %v5127_v22  ;;  %v1028_v12 = vadd.f32 %v1013_v33, %v5124_v17 }
 0x593   :  { %v1033_v35 = vadd.f32 %v1017_v59, %v5143_v41  ;;  %v1032_v53 = vadd.f32 %v1016_v40, %v5139_v36  ;;  %v1034_v50 = vadd.f32 %v1018_v45, %v5147_v46  ;;  %v1035_v57 = vadd.f32 %v1019_v14, %v5154_v51 }
 0x594   :  { %4346 = vtanh.f32 %v1031_v28  ;;  %v4121_v6 = vmul.f32 -1.442695, %v1030_v31  ;;  %v4119_v61 = vmul.f32 -1.442695, %v1028_v12  ;;  %v4122_v49 = vmul.f32 -1.442695, %v1031_v28 }
 0x595   :  { %4348 = vtanh.f32 %v1029_v34  ;;  %v4125_v2 = vmul.f32 -1.442695, %v1034_v50  ;;  %v4120_v48 = vmul.f32 -1.442695, %v1029_v34  ;;  %v4124_v24 = vmul.f32 -1.442695, %v1033_v35 }
 0x596   :  { %4350 = vtanh.f32 %v1028_v12  ;;  %v4123_v42 = vmul.f32 -1.442695, %v1032_v53 }
 0x597   :  { %4352 = vtanh.f32 %v1033_v35 }
 0x598   :  { %v4345_v11 = vpop.eup %4344  ;;  %4354 = vtanh.f32 %v1032_v53 }
 0x599   :  { %1240 = vrot.lane.b32.xlu2 %v4345_v11, %s4978_s7  ;;  %4356 = vtanh.f32 %v1034_v50  ;;  %v4126_v11 = vmul.f32 -1.442695, %v1035_v57 }
 0x59a   :  { %v4347_v54 = vpop.eup %4346  ;;  %4358 = vtanh.f32 %v1035_v57 }
 0x59b   :  { %1242 = vrot.lane.b32.xlu1 %v4347_v54, %s4978_s7  ;;  %v4349_v23 = vpop.eup %4348  ;;  %4360 = vpow2.f32 %v4121_v6 }
 0x59c   :  { %1238 = vrot.lane.b32.xlu0 %v4349_v23, %s4978_s7  ;;  %v4351_v21 = vpop.eup %4350  ;;  %4362 = vpow2.f32 %v4119_v61 }
 0x59d   :  { %v4353_v58 = vpop.eup %4352 }
 0x59e   :  { %v4355_v1 = vpop.eup %4354 }
 0x59f   :  { %v4357_v3 = vpop.eup %4356 }
 0x5a0   :  { %v4359_v5 = vpop.eup %4358 }
 0x5a1   :  { %1236 = vrot.lane.b32.xlu2 %v4351_v21, %s4978_s7  ;;  %v4361_v63 = vpop.eup %4360 }
 0x5a2   :  { %v1062_v39 = vadd.f32 1.0, %v4361_v63  ;;  %v4363_v62 = vpop.eup %4362 }
 0x5a3   :  { %1246 = vrot.lane.b32.xlu1 %v4353_v58, %s4978_s7  ;;  %v1060_v29 = vadd.f32 1.0, %v4363_v62 }
 0x5a4   :  { %1244 = vrot.lane.b32.xlu0 %v4355_v1, %s4978_s7  ;;  %4364 = vrcp.f32 %v1062_v39  ;;  %v1109_v31 = vand.u32 2147483648, %v1062_v39  ;;  %vm1103_vm1 = vweird.f32 %v1062_v39  ;;  %v1107_v20 = vand.u32 2147483647, %v1062_v39 }
 0x5a5   :  { %4366 = vpow2.f32 %v4125_v2  ;;  %v1079_v14 = vand.u32 2147483648, %v1060_v29  ;;  %vm1073_vm13 = vweird.f32 %v1060_v29  ;;  %v1077_v21 = vand.u32 2147483647, %v1060_v29 }
 0x5a6   :  { %4368 = vrcp.f32 %v1060_v29  ;;  %v1110_v12 = vor.u32 1.1754944e-38, %v1109_v31  ;;  %vm1108_vm11 = vcmp.eq.f32.partialorder %v1107_v20, 8.507059e+37 }
 0x5a7   :  { %4370 = vpow2.f32 %v4122_v49  ;;  %v1080_v61 = vor.u32 1.1754944e-38, %v1079_v14 }
 0x5a8   :  { %4372 = vpow2.f32 %v4120_v48 }
 0x5a9   :  { %1248 = vrot.lane.b32.xlu2 %v4357_v3, %s4978_s7 }
 0x5aa   :  { %v4365_v10 = vpop.eup %4364 }
 0x5ab   :  { %v4367_v13 = vpop.eup %4366  ;;  %v1099_v25 = vmul.f32 %v4365_v10, %v1062_v39  ;;  %vm1104_vm15 = vweird.f32 %v4365_v10 }
 0x5ac   :  { %1250 = vrot.lane.b32.xlu0 %v4359_v5, %s4978_s7  ;;  %v5537_v9 = vadd.f32 1.0, %v4367_v13  ;;  %v4369_v19 = vpop.eup %4368  ;;  %vm1105_vm2 = vmor %vm1103_vm1, %vm1104_vm15  ;;  %vm1078_vm15 = vcmp.eq.f32.partialorder %v1077_v21, 8.507059e+37 }
 0x5ad   :  { %v1100_v18 = vsub.f32 1.0, %v1099_v25  ;;  %v1069_v47 = vmul.f32 %v4369_v19, %v1060_v29  ;;  %v4371_v52 = vpop.eup %4370  ;;  %vm1074_vm12 = vweird.f32 %v4369_v19 }
 0x5ae   :  { %4374 = vrcp.f32 %v5537_v9  ;;  %v4373_v56 = vpop.eup %4372  ;;  %v5542_v16 = vadd.f32 1.0, %v4371_v52  ;;  %vm1075_vm14 = vmor %vm1073_vm13, %vm1074_vm12  ;;  %v1169_v13 = vand.u32 2147483648, %v5537_v9  ;;  %v1167_v49 = vand.u32 2147483647, %v5537_v9 }
 0x5af   :  { %v1101_v60 = vmul.f32 %v4365_v10, %v1100_v18  ;;  %v1070_v37 = vsub.f32 1.0, %v1069_v47  ;;  %4376 = vpow2.f32 %v4124_v24  ;;  %v5544_v28 = vadd.f32 1.0, %v4373_v56 }
 0x5b0   :  { %4378 = vpow2.f32 %v4123_v42  ;;  %v1170_v47 = vor.u32 1.1754944e-38, %v1169_v13  ;;  %vm1168_vm12 = vcmp.eq.f32.partialorder %v1167_v49, 8.507059e+37 }
 0x5b1   :  { %v1102_v30 = vadd.f32 %v4365_v10, %v1101_v60  ;;  %v1071_v34 = vmul.f32 %v4369_v19, %v1070_v37  ;;  %4380 = vrcp.f32 %v5542_v16 }
 0x5b2   :  { %4382 = vrcp.f32 %v5544_v28 }
 0x5b3   :  { %v1106_v33 = vsel %vm1105_vm2, %v4365_v10, %v1102_v30  ;;  %v1072_v53 = vadd.f32 %v4369_v19, %v1071_v34  ;;  %4384 = vpow2.f32 %v4126_v11  ;;  %vm1163_vm2 = vweird.f32 %v5537_v9 }
 0x5b4   :  { %v5540_v38 = vpop.eup %4374  ;;  %v5549_v45 = vsel %vm1108_vm11, %v1110_v12, %v1106_v33  ;;  %v1124_v34 = vand.u32 2147483648, %v5542_v16 }
 0x5b5   :  { %v1159_v59 = vmul.f32 %v5540_v38, %v5537_v9  ;;  %v4377_v40 = vpop.eup %4376  ;;  %v1076_v1 = vsel %vm1075_vm14, %v4369_v19, %v1072_v53  ;;  %vm1164_vm1 = vweird.f32 %v5540_v38  ;;  %vm1118_vm14 = vweird.f32 %v5542_v16 }
 0x5b6   :  { %v4379_v50 = vpop.eup %4378  ;;  %v5554_v58 = vadd.f32 1.0, %v4377_v40  ;;  %v5564_v39 = vsel %vm1078_vm15, %v1080_v61, %v1076_v1  ;;  %vm1165_vm11 = vmor %vm1163_vm2, %vm1164_vm1  ;;  %vm1088_vm2 = vweird.f32 %v5544_v28  ;;  %v1092_v53 = vand.u32 2147483647, %v5544_v28 }
 0x5b7   :  { %v1160_v23 = vsub.f32 1.0, %v1159_v59  ;;  %v5556_v57 = vpop.eup %4380  ;;  %v5559_v5 = vadd.f32 1.0, %v4379_v50  ;;  %v1122_v59 = vand.u32 2147483647, %v5542_v16  ;;  %v1125_v50 = vor.u32 1.1754944e-38, %v1124_v34 }
 0x5b8   :  { %v5561_v6 = vpop.eup %4382  ;;  %4386 = vrcp.f32 %v5554_v58  ;;  %v1114_v2 = vmul.f32 %v5556_v57, %v5542_v16  ;;  %vm1119_vm13 = vweird.f32 %v5556_v57 }
 0x5b9   :  { %v1161_v3 = vmul.f32 %v5540_v38, %v1160_v23  ;;  %4388 = vrcp.f32 %v5559_v5  ;;  %v4385_v10 = vpop.eup %4384  ;;  %v1084_v25 = vmul.f32 %v5561_v6, %v5544_v28  ;;  %vm1089_vm15 = vweird.f32 %v5561_v6  ;;  %vm1120_vm1 = vmor %vm1118_vm14, %vm1119_vm13 }
 0x5ba   :  { %v1115_v48 = vsub.f32 1.0, %v1114_v2  ;;  %v5581_v60 = vadd.f32 1.0, %v4385_v10  ;;  %vm1093_vm13 = vcmp.eq.f32.partialorder %v1092_v53, 8.507059e+37 }
 0x5bb   :  { %v1162_v29 = vadd.f32 %v5540_v38, %v1161_v3  ;;  %v1085_v24 = vsub.f32 1.0, %v1084_v25  ;;  %v1139_v25 = vand.u32 2147483648, %v5559_v5 }
 0x5bc   :  { %v1116_v30 = vmul.f32 %v5556_v57, %v1115_v48  ;;  %4390 = vrcp.f32 %v5581_v60 }
 0x5bd   :  { %v1166_v19 = vsel %vm1165_vm11, %v5540_v38, %v1162_v29  ;;  %v1086_v38 = vmul.f32 %v5561_v6, %v1085_v24  ;;  %vm1090_vm11 = vmor %vm1088_vm2, %vm1089_vm15  ;;  %vm1148_vm15 = vweird.f32 %v5554_v58 }
 0x5be   :  { %v5578_v18 = vpop.eup %4386  ;;  %v5585_v42 = vsel %vm1168_vm12, %v1170_v47, %v1166_v19  ;;  %v1117_v20 = vadd.f32 %v5556_v57, %v1116_v30  ;;  %vm1123_vm12 = vcmp.eq.f32.partialorder %v1122_v59, 8.507059e+37  ;;  %v1140_v30 = vor.u32 1.1754944e-38, %v1139_v25 }
 0x5bf   :  { %v5583_v52 = vpop.eup %4388  ;;  %v1144_v9 = vmul.f32 %v5578_v18, %v5554_v58  ;;  %v1087_v12 = vadd.f32 %v5561_v6, %v1086_v38  ;;  %vm1149_vm14 = vweird.f32 %v5578_v18 }
 0x5c0   :  { %v1129_v31 = vmul.f32 %v5583_v52, %v5559_v5  ;;  %vm1150_vm2 = vmor %vm1148_vm15, %vm1149_vm14 }
 0x5c1   :  { %v1145_v33 = vsub.f32 1.0, %v1144_v9  ;;  %v1091_v16 = vsel %vm1090_vm11, %v5561_v6, %v1087_v12  ;;  %v1152_v6 = vand.u32 2147483647, %v5554_v58  ;;  %vm1133_vm11 = vweird.f32 %v5559_v5 }
 0x5c2   :  { %v1130_v40 = vsub.f32 1.0, %v1129_v31  ;;  %v4391_v11 = vpop.eup %4390  ;;  %v1184_v31 = vand.u32 2147483648, %v5581_v60 }
 0x5c3   :  { %v1146_v23 = vmul.f32 %v5578_v18, %v1145_v33  ;;  %v1174_v21 = vmul.f32 %v4391_v11, %v5581_v60  ;;  %vm1179_vm15 = vweird.f32 %v4391_v11 }
 0x5c4   :  { %v1131_v14 = vmul.f32 %v5583_v52, %v1130_v40  ;;  %v1185_v33 = vor.u32 1.1754944e-38, %v1184_v31  ;;  %v1206_v40 = vrot.slane %v5463_v8, 7 }
 0x5c5   :  { %v1175_v13 = vsub.f32 1.0, %v1174_v21 }
 0x5c6   :  { %v1132_v10 = vadd.f32 %v5583_v52, %v1131_v14 }
 0x5c7   :  { %v1176_v47 = vmul.f32 %v4391_v11, %v1175_v13 }
 0x5f3   :  { %v1241_v35 = vpop.permute.xlu2 %1240 }
 0x5f4   :  { %v1262_v54 = vmul.f32 %v1241_v35, %v5549_v45  ;;  %v1094_v35 = vand.u32 2147483648, %v5544_v28  ;;  %v1147_v28 = vadd.f32 %v5578_v18, %v1146_v23  ;;  %v1204_v23 = vrot.slane %v5488_v0, 7 }
 0x5f5   :  { %v1210_v0 = vrot.slane %v5499_v55, 7 }
 0x5f6   :  { %1280 = vrot.lane.b32.xlu1 %v1262_v54, %s4978_s7  ;;  %v1121_v54 = vsel %vm1120_vm1, %v5556_v57, %v1117_v20  ;;  %v1095_v61 = vor.u32 1.1754944e-38, %v1094_v35  ;;  %vm1134_vm1 = vweird.f32 %v5583_v52  ;;  %v1151_v49 = vsel %vm1150_vm2, %v5578_v18, %v1147_v28 }
 0x5f7   :  { %v5611_v3 = vsel %vm1123_vm12, %v1125_v50, %v1121_v54  ;;  %vm1135_vm12 = vmor %vm1133_vm11, %vm1134_vm1  ;;  %vm1178_vm1 = vweird.f32 %v5581_v60  ;;  %v1222_v35 = vmul.f32 %v1206_v40, %v5549_v45  ;;  %v1220_v14 = vmul.f32 %v1204_v23, %v5564_v39 }
 0x5f8   :  { %v5616_v2 = vsel %vm1093_vm13, %v1095_v61, %v1091_v16  ;;  %vm1153_vm13 = vcmp.eq.f32.partialorder %v1152_v6, 8.507059e+37  ;;  %v1136_v19 = vsel %vm1135_vm12, %v5583_v52, %v1132_v10  ;;  %v1182_v52 = vand.u32 2147483647, %v5581_v60  ;;  %vm1180_vm2 = vmor %vm1178_vm1, %vm1179_vm15 }
 0x5f9   :  { %v1205_v60 = vrot.slane %v5459_v4, 7  ;;  %v1208_v61 = vrot.slane %v5474_v26, 7  ;;  %v1226_v6 = vmul.f32 %v1210_v0, %v5585_v42  ;;  %v1211_v10 = vrot.slane %v5481_v44, 7 }
 0x5fa   :  { %vm1183_vm11 = vcmp.eq.f32.partialorder %v1182_v52, 8.507059e+37 }
 0x5fb   :  { %v1237_v63 = vpop.permute.xlu2 %1236 }
 0x5fc   :  { %v1260_v62 = vmul.f32 %v1237_v63, %v5564_v39 }
 0x5fe   :  { %1276 = vrot.lane.b32.xlu1 %v1260_v62, %s4978_s7  ;;  %v1154_v62 = vand.u32 2147483648, %v5554_v58  ;;  %v1137_v58 = vand.u32 2147483647, %v5559_v5  ;;  %v1177_v5 = vadd.f32 %v4391_v11, %v1176_v47 }
 0x600   :  { %v1155_v48 = vor.u32 1.1754944e-38, %v1154_v62  ;;  %vm1138_vm14 = vcmp.eq.f32.partialorder %v1137_v58, 8.507059e+37  ;;  %v1181_v20 = vsel %vm1180_vm2, %v4391_v11, %v1177_v5  ;;  %v1221_v11 = vmul.f32 %v1205_v60, %v5616_v2 }
 0x601   :  { %v5642_v34 = vsel %vm1183_vm11, %v1185_v33, %v1181_v20  ;;  %v1207_v58 = vrot.slane %v5493_v43, 7 }
 0x602   :  { %v5631_v24 = vsel %vm1153_vm13, %v1155_v48, %v1151_v49  ;;  %v1227_v55 = vmul.f32 %v1211_v10, %v5642_v34 }
 0x603   :  { %v1249_v56 = vpop.permute.xlu2 %1248 }
 0x604   :  { %v1266_v37 = vmul.f32 %v1249_v56, %v5585_v42 }
 0x606   :  { %1288 = vrot.lane.b32.xlu1 %v1266_v37, %s4978_s7  ;;  %v5634_v37 = vsel %vm1138_vm14, %v1140_v30, %v1136_v19  ;;  %v1223_v19 = vmul.f32 %v1207_v58, %v5611_v3  ;;  %v1209_v30 = vrot.slane %v5469_v15, 7 }
 0x607   :  { %v1224_v4 = vmul.f32 %v1208_v61, %v5634_v37 }
 0x60d   :  { %v1243_v1 = vpop.permute.xlu1 %1242 }
 0x60e   :  { %v1263_v57 = vmul.f32 %v1243_v1, %v5611_v3  ;;  %v1239_v63 = vpop.permute.xlu0 %1238 }
 0x60f   :  { %v1261_v29 = vmul.f32 %v1239_v63, %v5616_v2 }
 0x610   :  { %1282 = vrot.lane.b32.xlu0 %v1263_v57, %s4978_s7 }
 0x611   :  { %1278 = vrot.lane.b32.xlu2 %v1261_v29, %s4978_s7 }
 0x615   :  { %v1247_v56 = vpop.permute.xlu1 %1246 }
 0x616   :  { %v1265_v9 = vmul.f32 %v1247_v56, %v5631_v24  ;;  %v1245_v18 = vpop.permute.xlu0 %1244 }
 0x617   :  { %v1264_v38 = vmul.f32 %v1245_v18, %v5634_v37 }
 0x618   :  { %1286 = vrot.lane.b32.xlu0 %v1265_v9, %s4978_s7  ;;  %v1225_v9 = vmul.f32 %v1209_v30, %v5631_v24 }
 0x619   :  { %1284 = vrot.lane.b32.xlu2 %v1264_v38, %s4978_s7 }
 0x61e   :  { %v1251_v59 = vpop.permute.xlu0 %1250 }
 0x61f   :  { %v1267_v12 = vmul.f32 %v1251_v59, %v5642_v34 }
 0x621   :  { %1290 = vrot.lane.b32.xlu2 %v1267_v12, %s4978_s7 }
 0x668   :  { %v1281_v54 = vpop.permute.xlu1 %1280 }
 0x669   :  { %v5648_v53 = vadd.f32 %v1281_v54, %v1222_v35 }
 0x66b   :  { %4392 = vtanh.f32 %v5648_v53  ;;  %v1279_v50 = vpop.permute.xlu2 %1278 }
 0x66c   :  { %v5654_v16 = vadd.f32 %v1279_v50, %v1221_v11 }
 0x66e   :  { %4394 = vtanh.f32 %v5654_v16 }
 0x670   :  { %v1277_v8 = vpop.permute.xlu1 %1276 }
 0x671   :  { %v4393_v21 = vpop.eup %4392  ;;  %v5658_v1 = vadd.f32 %v1277_v8, %v1220_v14 }
 0x672   :  { %1328 = vrot.lane.b32.xlu0 %v4393_v21, %s4978_s7 }
 0x673   :  { %4396 = vtanh.f32 %v5658_v1  ;;  %v1285_v57 = vpop.permute.xlu2 %1284 }
 0x674   :  { %v4395_v28 = vpop.eup %4394  ;;  %v5665_v63 = vadd.f32 %v1285_v57, %v1224_v4 }
 0x675   :  { %1326 = vrot.lane.b32.xlu1 %v4395_v28, %s4978_s7 }
 0x676   :  { %4398 = vtanh.f32 %v5665_v63 }
 0x678   :  { %v1289_v62 = vpop.permute.xlu1 %1288 }
 0x679   :  { %v4397_v26 = vpop.eup %4396  ;;  %v5670_v29 = vadd.f32 %v1289_v62, %v1226_v6 }
 0x67a   :  { %1324 = vrot.lane.b32.xlu0 %v4397_v26, %s4978_s7 }
 0x67b   :  { %4400 = vtanh.f32 %v5670_v29  ;;  %v1291_v13 = vpop.permute.xlu2 %1290 }
 0x67c   :  { %v4399_v25 = vpop.eup %4398  ;;  %v5676_v49 = vadd.f32 %v1291_v13, %v1227_v55 }
 0x67d   :  { %1332 = vrot.lane.b32.xlu1 %v4399_v25, %s4978_s7 }
 0x67e   :  { %4402 = vtanh.f32 %v5676_v49 }
 0x681   :  { %v4401_v48 = vpop.eup %4400 }
 0x682   :  { %1336 = vrot.lane.b32.xlu0 %v4401_v48, %s4978_s7  ;;  %v1283_v44 = vpop.permute.xlu0 %1282 }
 0x683   :  { %v5683_v47 = vadd.f32 %v1283_v44, %v1223_v19 }
 0x684   :  { %v4403_v56 = vpop.eup %4402 }
 0x685   :  { %4404 = vtanh.f32 %v5683_v47  ;;  %1338 = vrot.lane.b32.xlu1 %v4403_v56, %s4978_s7 }
 0x68a   :  { %v1287_v43 = vpop.permute.xlu0 %1286 }
 0x68b   :  { %v4405_v18 = vpop.eup %4404  ;;  %v5689_v38 = vadd.f32 %v1287_v43, %v1225_v9 }
 0x68c   :  { %1330 = vrot.lane.b32.xlu2 %v4405_v18, %s4978_s7 }
 0x68d   :  { %4406 = vtanh.f32 %v5689_v38 }
 0x693   :  { %v4407_v5 = vpop.eup %4406 }
 0x694   :  { %1334 = vrot.lane.b32.xlu2 %v4407_v5, %s4978_s7 }
 0x6e4   :  { %v1329_v31 = vpop.permute.xlu0 %1328 }
 0x6e5   :  { %v1350_v54 = vmul.f32 %v1329_v31, %v5549_v45 }
 0x6e6   :  { %v1331_v52 = vpop.permute.xlu2 %1330 }
 0x6e7   :  { %v1327_v20 = vpop.permute.xlu1 %1326  ;;  %v1351_v12 = vmul.f32 %v1331_v52, %v5611_v3 }
 0x6e8   :  { %v1349_v33 = vmul.f32 %v1327_v20, %v5616_v2 }
 0x6e9   :  { %v1368_v50 = vrot.slane %v1351_v12, 7 }
 0x6ea   :  { %v1365_v40 = vrot.slane %v1349_v33, 1 }
 0x6ec   :  { %v1325_v59 = vpop.permute.xlu0 %1324 }
 0x6ed   :  { %v1348_v15 = vmul.f32 %v1325_v59, %v5564_v39 }
 0x6ee   :  { %v1335_v11 = vpop.permute.xlu2 %1334 }
 0x6ef   :  { %v1364_v35 = vrot.slane %v1348_v15, 2  ;;  %v1333_v23 = vpop.permute.xlu1 %1332  ;;  %v1353_v2 = vmul.f32 %v1335_v11, %v5631_v24 }
 0x6f0   :  { %v1352_v8 = vmul.f32 %v1333_v23, %v5634_v37 }
 0x6f1   :  { %v1366_v60 = vsel %vm578_vm3, %v1365_v40, %v1364_v35  ;;  %v1372_v0 = vrot.slane %v1353_v2, 5 }
 0x6f2   :  { %v1367_v14 = vsel %vm581_vm4, %v1350_v54, %v1366_v60  ;;  %v1370_v39 = vrot.slane %v1352_v8, 6 }
 0x6f3   :  { %v1369_v21 = vsel %vm584_vm5, %v1368_v50, %v1367_v14 }
 0x6f4   :  { %v1337_v61 = vpop.permute.xlu0 %1336  ;;  %v1371_v4 = vsel %vm587_vm6, %v1370_v39, %v1369_v21 }
 0x6f5   :  { %v1354_v3 = vmul.f32 %v1337_v61, %v5585_v42  ;;  %v1373_v6 = vsel %vm590_vm7, %v1372_v0, %v1371_v4 }
 0x6f7   :  { %v1374_v45 = vrot.slane %v1354_v3, 4  ;;  %v1339_v57 = vpop.permute.xlu1 %1338 }
 0x6f8   :  { %v1355_v28 = vmul.f32 %v1339_v57, %v5642_v34 }
 0x6f9   :  { %v1375_v62 = vsel %vm593_vm8, %v1374_v45, %v1373_v6 }
 0x6fa   :  { %v1376_v37 = vrot.slane %v1355_v28, 3 }
 0x6fc   :  { %v1377_v24 = vsel %vm596_vm9, %v1376_v37, %v1375_v62 }
 0x6fd   :  { %1378 = vrot.lane.b32.xlu2 %v1377_v24, %s4979_s21 }
 0x757   :  { %v1379_v26 = vpop.permute.xlu2 %1378 }
 0x758   :  { %4127 = vmatmul.msk.f32.vlgmr.msrb.gmra.mxu1 %vm225_vm10, %v1379_v26 }
 0x7d5   :  { %v1399_v42 = vpop.f32.mrf.mxu1 }
 0x7d6   :  { %v1421_v10 = vadd.f32 %v1399_v42, %v5135_v32  ;;  %v1405_v55 = vrot.slane %v1399_v42, 7  ;;  %v1403_v13 = vrot.slane %v1399_v42, 5  ;;  %v1404_v25 = vrot.slane %v1399_v42, 6 }
 0x7d7   :  { %v1407_v48 = vrot.slane %v1399_v42, 2  ;;  %v1406_v44 = vrot.slane %v1399_v42, 1  ;;  %v1409_v9 = vrot.slane %v1399_v42, 4  ;;  %v1408_v52 = vrot.slane %v1399_v42, 3 }
 0x7d8   :  { %4408 = vtanh.f32 %v1421_v10  ;;  %v1420_v34 = vadd.f32 %v1405_v55, %v5131_v27  ;;  %v1418_v58 = vadd.f32 %v1403_v13, %v5124_v17  ;;  %v1419_v19 = vadd.f32 %v1404_v25, %v5127_v22 }
 0x7d9   :  { %v1423_v30 = vadd.f32 %v1407_v48, %v5143_v41  ;;  %v1422_v18 = vadd.f32 %v1406_v44, %v5139_v36  ;;  %v1425_v31 = vadd.f32 %v1409_v9, %v5154_v51  ;;  %v1424_v59 = vadd.f32 %v1408_v52, %v5147_v46 }
 0x7da   :  { %4410 = vtanh.f32 %v1420_v34  ;;  %v4130_v35 = vmul.f32 -1.442695, %v1420_v34  ;;  %v4131_v50 = vmul.f32 -1.442695, %v1421_v10  ;;  %v4128_v2 = vmul.f32 -1.442695, %v1418_v58 }
 0x7db   :  { %4412 = vtanh.f32 %v1418_v58  ;;  %v4133_v54 = vmul.f32 -1.442695, %v1423_v30  ;;  %v4129_v39 = vmul.f32 -1.442695, %v1419_v19  ;;  %v4132_v45 = vmul.f32 -1.442695, %v1422_v18 }
 0x7dc   :  { %4414 = vtanh.f32 %v1419_v19  ;;  %v4135_v62 = vmul.f32 -1.442695, %v1425_v31  ;;  %v4134_v13 = vmul.f32 -1.442695, %v1424_v59 }
 0x7dd   :  { %4416 = vtanh.f32 %v1423_v30 }
 0x7de   :  { %v4409_v56 = vpop.eup %4408  ;;  %4418 = vtanh.f32 %v1422_v18 }
 0x7df   :  { %1632 = vrot.lane.b32.xlu1 %v4409_v56, %s4978_s7  ;;  %4420 = vtanh.f32 %v1425_v31 }
 0x7e0   :  { %v4411_v43 = vpop.eup %4410  ;;  %4422 = vtanh.f32 %v1424_v59 }
 0x7e1   :  { %1630 = vrot.lane.b32.xlu2 %v4411_v43, %s4978_s7  ;;  %v4413_v5 = vpop.eup %4412  ;;  %4424 = vpow2.f32 %v4130_v35 }
 0x7e2   :  { %1626 = vrot.lane.b32.xlu0 %v4413_v5, %s4978_s7  ;;  %v4415_v20 = vpop.eup %4414  ;;  %4426 = vpow2.f32 %v4133_v54 }
 0x7e3   :  { %v4417_v33 = vpop.eup %4416 }
 0x7e4   :  { %v4419_v15 = vpop.eup %4418 }
 0x7e5   :  { %v4421_v12 = vpop.eup %4420 }
 0x7e6   :  { %v4423_v40 = vpop.eup %4422 }
 0x7e7   :  { %1628 = vrot.lane.b32.xlu1 %v4415_v20, %s4978_s7  ;;  %v4425_v60 = vpop.eup %4424 }
 0x7e8   :  { %v1452_v11 = vadd.f32 1.0, %v4425_v60  ;;  %v4427_v23 = vpop.eup %4426 }
 0x7e9   :  { %1636 = vrot.lane.b32.xlu2 %v4417_v33, %s4978_s7  ;;  %v1455_v14 = vadd.f32 1.0, %v4427_v23 }
 0x7ea   :  { %1634 = vrot.lane.b32.xlu0 %v4419_v15, %s4978_s7  ;;  %4428 = vrcp.f32 %v1452_v11  ;;  %v1499_v42 = vand.u32 2147483648, %v1452_v11  ;;  %vm1493_vm13 = vweird.f32 %v1452_v11  ;;  %v1497_v55 = vand.u32 2147483647, %v1452_v11 }
 0x7eb   :  { %4430 = vpow2.f32 %v4131_v50  ;;  %v1544_v5 = vand.u32 2147483648, %v1455_v14  ;;  %vm1538_vm2 = vweird.f32 %v1455_v14  ;;  %v1542_v20 = vand.u32 2147483647, %v1455_v14 }
 0x7ec   :  { %4432 = vrcp.f32 %v1455_v14  ;;  %v1500_v19 = vor.u32 1.1754944e-38, %v1499_v42  ;;  %vm1498_vm15 = vcmp.eq.f32.partialorder %v1497_v55, 8.507059e+37 }
 0x7ed   :  { %4434 = vpow2.f32 %v4128_v2 }
 0x7ee   :  { %4436 = vpow2.f32 %v4129_v39 }
 0x7ef   :  { %1640 = vrot.lane.b32.xlu1 %v4421_v12, %s4978_s7  ;;  %4438 = vpow2.f32 %v4132_v45 }
 0x7f0   :  { %v4429_v8 = vpop.eup %4428 }
 0x7f1   :  { %v1489_v21 = vmul.f32 %v4429_v8, %v1452_v11  ;;  %v4431_v61 = vpop.eup %4430  ;;  %vm1494_vm12 = vweird.f32 %v4429_v8 }
 0x7f2   :  { %1638 = vrot.lane.b32.xlu0 %v4423_v40, %s4978_s7  ;;  %v4433_v4 = vpop.eup %4432  ;;  %v5727_v28 = vadd.f32 1.0, %v4431_v61  ;;  %vm1495_vm14 = vmor %vm1493_vm13, %vm1494_vm12  ;;  %v1545_v40 = vor.u32 1.1754944e-38, %v1544_v5  ;;  %vm1543_vm12 = vcmp.eq.f32.partialorder %v1542_v20, 8.507059e+37 }
 0x7f3   :  { %v1490_v3 = vsub.f32 1.0, %v1489_v21  ;;  %v1534_v57 = vmul.f32 %v4433_v4, %v1455_v14  ;;  %v4435_v6 = vpop.eup %4434  ;;  %vm1539_vm1 = vweird.f32 %v4433_v4 }
 0x7f4   :  { %4440 = vrcp.f32 %v5727_v28  ;;  %v4437_v26 = vpop.eup %4436  ;;  %v5730_v10 = vadd.f32 1.0, %v4435_v6  ;;  %vm1540_vm11 = vmor %vm1538_vm2, %vm1539_vm1  ;;  %v1514_v45 = vand.u32 2147483648, %v5727_v28  ;;  %v1512_v6 = vand.u32 2147483647, %v5727_v28 }
 0x7f5   :  { %v1491_v0 = vmul.f32 %v4429_v8, %v1490_v3  ;;  %v1535_v24 = vsub.f32 1.0, %v1534_v57  ;;  %4442 = vpow2.f32 %v4135_v62  ;;  %v5732_v58 = vadd.f32 1.0, %v4437_v26  ;;  %v4439_v48 = vpop.eup %4438 }
 0x7f6   :  { %4444 = vrcp.f32 %v5730_v10  ;;  %v5740_v52 = vadd.f32 1.0, %v4439_v48  ;;  %v1515_v26 = vor.u32 1.1754944e-38, %v1514_v45  ;;  %vm1513_vm2 = vcmp.eq.f32.partialorder %v1512_v6, 8.507059e+37 }
 0x7f7   :  { %v1492_v37 = vadd.f32 %v4429_v8, %v1491_v0  ;;  %v1536_v25 = vmul.f32 %v4433_v4, %v1535_v24  ;;  %4446 = vpow2.f32 %v4134_v13  ;;  %v1467_v48 = vand.u32 2147483647, %v5730_v10 }
 0x7f8   :  { %4448 = vrcp.f32 %v5732_v58 }
 0x7f9   :  { %v1496_v34 = vsel %vm1495_vm14, %v4429_v8, %v1492_v37  ;;  %v1537_v43 = vadd.f32 %v4433_v4, %v1536_v25  ;;  %4450 = vrcp.f32 %v5740_v52  ;;  %vm1508_vm14 = vweird.f32 %v5727_v28 }
 0x7fa   :  { %v4441_v44 = vpop.eup %4440  ;;  %v5735_v30 = vsel %vm1498_vm15, %v1500_v19, %v1496_v34  ;;  %v1469_v34 = vand.u32 2147483648, %v5730_v10  ;;  %v1484_v19 = vand.u32 2147483648, %v5732_v58 }
 0x7fb   :  { %v4443_v18 = vpop.eup %4442  ;;  %v1504_v31 = vmul.f32 %v4441_v44, %v5727_v28  ;;  %v1541_v59 = vsel %vm1540_vm11, %v4433_v4, %v1537_v43  ;;  %vm1509_vm13 = vweird.f32 %v4441_v44  ;;  %vm1463_vm11 = vweird.f32 %v5730_v10 }
 0x7fc   :  { %v5743_v33 = vpop.eup %4444  ;;  %v5745_v15 = vadd.f32 1.0, %v4443_v18  ;;  %v5752_v11 = vsel %vm1543_vm12, %v1545_v40, %v1541_v59  ;;  %vm1510_vm15 = vmor %vm1508_vm14, %vm1509_vm13  ;;  %vm1478_vm14 = vweird.f32 %v5732_v58 }
 0x7fd   :  { %v4447_v12 = vpop.eup %4446  ;;  %v1505_v35 = vsub.f32 1.0, %v1504_v31  ;;  %v1459_v60 = vmul.f32 %v5743_v33, %v5730_v10  ;;  %vm1464_vm1 = vweird.f32 %v5743_v33  ;;  %v1470_v31 = vor.u32 1.1754944e-38, %v1469_v34 }
 0x7fe   :  { %v5748_v54 = vpop.eup %4448  ;;  %4452 = vrcp.f32 %v5745_v15  ;;  %v5758_v2 = vadd.f32 1.0, %v4447_v12  ;;  %vm1465_vm12 = vmor %vm1463_vm11, %vm1464_vm1  ;;  %v1482_v10 = vand.u32 2147483647, %v5732_v58 }
 0x7ff   :  { %v1506_v14 = vmul.f32 %v4441_v44, %v1505_v35  ;;  %v1474_v8 = vmul.f32 %v5748_v54, %v5732_v58  ;;  %v1460_v21 = vsub.f32 1.0, %v1459_v60  ;;  %v5761_v39 = vpop.eup %4450  ;;  %vm1479_vm13 = vweird.f32 %v5748_v54 }
 0x800   :  { %4454 = vrcp.f32 %v5758_v2  ;;  %v1519_v57 = vmul.f32 %v5761_v39, %v5740_v52  ;;  %vm1480_vm1 = vmor %vm1478_vm14, %vm1479_vm13  ;;  %vm1483_vm11 = vcmp.eq.f32.partialorder %v1482_v10, 8.507059e+37  ;;  %v1529_v58 = vand.u32 2147483648, %v5740_v52 }
 0x801   :  { %v1507_v61 = vadd.f32 %v4441_v44, %v1506_v14  ;;  %v1475_v3 = vsub.f32 1.0, %v1474_v8  ;;  %v1461_v0 = vmul.f32 %v5743_v33, %v1460_v21  ;;  %v1599_v10 = vrot.slane %v5689_v38, 7 }
 0x802   :  { %v1520_v55 = vsub.f32 1.0, %v1519_v57 }
 0x803   :  { %v1511_v62 = vsel %vm1510_vm15, %v4441_v44, %v1507_v61  ;;  %v1476_v37 = vmul.f32 %v5748_v54, %v1475_v3  ;;  %v1462_v42 = vadd.f32 %v5743_v33, %v1461_v0  ;;  %vm1468_vm15 = vcmp.eq.f32.partialorder %v1467_v48, 8.507059e+37 }
 0x804   :  { %v5764_v4 = vpop.eup %4452  ;;  %v5780_v28 = vsel %vm1513_vm2, %v1515_v26, %v1511_v62  ;;  %v1521_v18 = vmul.f32 %v5761_v39, %v1520_v55  ;;  %vm1524_vm2 = vweird.f32 %v5761_v39  ;;  %v1574_v3 = vand.u32 2147483648, %v5745_v15 }
 0x805   :  { %v1564_v24 = vmul.f32 %v5764_v4, %v5745_v15  ;;  %v1466_v43 = vsel %vm1465_vm12, %v5743_v33, %v1462_v42  ;;  %v1485_v33 = vor.u32 1.1754944e-38, %v1484_v19  ;;  %vm1523_vm12 = vweird.f32 %v5740_v52 }
 0x806   :  { %v5777_v13 = vpop.eup %4454  ;;  %v5795_v59 = vsel %vm1468_vm15, %v1470_v31, %v1466_v43  ;;  %v1522_v60 = vadd.f32 %v5761_v39, %v1521_v18  ;;  %vm1525_vm13 = vmor %vm1523_vm12, %vm1524_vm2  ;;  %vm1569_vm14 = vweird.f32 %v5764_v4  ;;  %v1530_v0 = vor.u32 1.1754944e-38, %v1529_v58 }
 0x807   :  { %v1549_v5 = vmul.f32 %v5777_v13, %v5758_v2  ;;  %vm1568_vm15 = vweird.f32 %v5745_v15  ;;  %vm1554_vm2 = vweird.f32 %v5777_v13  ;;  %v1559_v26 = vand.u32 2147483648, %v5758_v2 }
 0x808   :  { %v1526_v61 = vsel %vm1525_vm13, %v5761_v39, %v1522_v60  ;;  %vm1553_vm13 = vweird.f32 %v5758_v2  ;;  %v1557_v55 = vand.u32 2147483647, %v5758_v2  ;;  %v1594_v2 = vrot.slane %v5658_v1, 7 }
 0x809   :  { %v1615_v1 = vmul.f32 %v1599_v10, %v5752_v11 }
 0x83b   :  { %v1631_v56 = vpop.permute.xlu2 %1630 }
 0x83c   :  { %v1652_v9 = vmul.f32 %v1631_v56, %v5735_v30  ;;  %v1477_v56 = vadd.f32 %v5748_v54, %v1476_v37  ;;  %v1575_v37 = vor.u32 1.1754944e-38, %v1574_v3 }
 0x83e   :  { %1670 = vrot.lane.b32.xlu1 %v1652_v9, %s4978_s7  ;;  %v1565_v9 = vsub.f32 1.0, %v1564_v24  ;;  %v1481_v12 = vsel %vm1480_vm1, %v5748_v54, %v1477_v56  ;;  %v1527_v54 = vand.u32 2147483647, %v5740_v52  ;;  %v1572_v52 = vand.u32 2147483647, %v5745_v15 }
 0x83f   :  { %v5804_v14 = vsel %vm1483_vm11, %v1485_v33, %v1481_v12  ;;  %vm1570_vm11 = vmor %vm1568_vm15, %vm1569_vm14  ;;  %vm1558_vm15 = vcmp.eq.f32.partialorder %v1557_v55, 8.507059e+37  ;;  %v1596_v56 = vrot.slane %v5648_v53, 7  ;;  %v1598_v53 = vrot.slane %v5665_v63, 7 }
 0x840   :  { %v1566_v40 = vmul.f32 %v5764_v4, %v1565_v9  ;;  %vm1528_vm1 = vcmp.eq.f32.partialorder %v1527_v54, 8.507059e+37  ;;  %vm1573_vm12 = vcmp.eq.f32.partialorder %v1572_v52, 8.507059e+37  ;;  %vm1555_vm14 = vmor %vm1553_vm13, %vm1554_vm2  ;;  %v1600_v63 = vrot.slane %v5670_v29, 7 }
 0x841   :  { %v5817_v57 = vsel %vm1528_vm1, %v1530_v0, %v1526_v61  ;;  %v1612_v9 = vmul.f32 %v1596_v56, %v5735_v30  ;;  %v1595_v29 = vrot.slane %v5654_v16, 7 }
 0x842   :  { %v1567_v21 = vadd.f32 %v5764_v4, %v1566_v40  ;;  %v1614_v40 = vmul.f32 %v1598_v53, %v5817_v57 }
 0x843   :  { %v1637_v23 = vpop.permute.xlu2 %1636  ;;  %v1611_v0 = vmul.f32 %v1595_v29, %v5804_v14 }
 0x844   :  { %v1655_v50 = vmul.f32 %v1637_v23, %v5752_v11  ;;  %v1550_v23 = vsub.f32 1.0, %v1549_v5  ;;  %v1571_v62 = vsel %vm1570_vm11, %v5764_v4, %v1567_v21 }
 0x845   :  { %v5825_v15 = vsel %vm1573_vm12, %v1575_v37, %v1571_v62 }
 0x846   :  { %1676 = vrot.lane.b32.xlu1 %v1655_v50, %s4978_s7  ;;  %v1551_v45 = vmul.f32 %v5777_v13, %v1550_v23 }
 0x848   :  { %v1552_v24 = vadd.f32 %v5777_v13, %v1551_v45 }
 0x84a   :  { %v1556_v34 = vsel %vm1555_vm14, %v5777_v13, %v1552_v24  ;;  %v1610_v13 = vmul.f32 %v1594_v2, %v5795_v59 }
 0x851   :  { %v1633_v25 = vpop.permute.xlu1 %1632 }
 0x852   :  { %v1653_v44 = vmul.f32 %v1633_v25, %v5780_v28  ;;  %v1560_v25 = vor.u32 1.1754944e-38, %v1559_v26 }
 0x854   :  { %1672 = vrot.lane.b32.xlu0 %v1653_v44, %s4978_s7  ;;  %v1627_v20 = vpop.permute.xlu0 %1626  ;;  %v5832_v48 = vsel %vm1558_vm15, %v1560_v25, %v1556_v34 }
 0x855   :  { %v1650_v35 = vmul.f32 %v1627_v20, %v5795_v59  ;;  %v1616_v58 = vmul.f32 %v1600_v63, %v5832_v48 }
 0x857   :  { %1666 = vrot.lane.b32.xlu2 %v1650_v35, %s4978_s7 }
 0x859   :  { %v1629_v50 = vpop.permute.xlu1 %1628 }
 0x85a   :  { %v1651_v8 = vmul.f32 %v1629_v50, %v5804_v14  ;;  %v1597_v50 = vrot.slane %v5683_v47, 7 }
 0x85c   :  { %1668 = vrot.lane.b32.xlu0 %v1651_v8, %s4978_s7  ;;  %v1635_v6 = vpop.permute.xlu0 %1634  ;;  %v1613_v61 = vmul.f32 %v1597_v50, %v5780_v28 }
 0x85d   :  { %v1654_v39 = vmul.f32 %v1635_v6, %v5817_v57 }
 0x85f   :  { %1674 = vrot.lane.b32.xlu2 %v1654_v39, %s4978_s7  ;;  %v1601_v39 = vrot.slane %v5676_v49, 7 }
 0x861   :  { %v1641_v42 = vpop.permute.xlu1 %1640  ;;  %v1617_v37 = vmul.f32 %v1601_v39, %v5825_v15 }
 0x862   :  { %v1657_v4 = vmul.f32 %v1641_v42, %v5825_v15 }
 0x864   :  { %1680 = vrot.lane.b32.xlu0 %v1657_v4, %s4978_s7  ;;  %v1639_v19 = vpop.permute.xlu0 %1638 }
 0x865   :  { %v1656_v44 = vmul.f32 %v1639_v19, %v5832_v48 }
 0x867   :  { %1678 = vrot.lane.b32.xlu2 %v1656_v44, %s4978_s7 }
 0x8b0   :  { %v1671_v43 = vpop.permute.xlu1 %1670 }
 0x8b1   :  { %v5839_v18 = vadd.f32 %v1671_v43, %v1612_v9  ;;  %v1667_v5 = vpop.permute.xlu2 %1666 }
 0x8b2   :  { %v5843_v31 = vadd.f32 %v1667_v5, %v1610_v13 }
 0x8b3   :  { %4456 = vtanh.f32 %v5839_v18 }
 0x8b4   :  { %4458 = vtanh.f32 %v5843_v31 }
 0x8b8   :  { %v1677_v20 = vpop.permute.xlu1 %1676 }
 0x8b9   :  { %v4457_v12 = vpop.eup %4456  ;;  %v5849_v33 = vadd.f32 %v1677_v20, %v1615_v1  ;;  %v1675_v35 = vpop.permute.xlu2 %1674 }
 0x8ba   :  { %1718 = vrot.lane.b32.xlu0 %v4457_v12, %s4978_s7  ;;  %v4459_v60 = vpop.eup %4458  ;;  %v5854_v23 = vadd.f32 %v1675_v35, %v1614_v40 }
 0x8bb   :  { %4460 = vtanh.f32 %v5849_v33  ;;  %1714 = vrot.lane.b32.xlu1 %v4459_v60, %s4978_s7 }
 0x8bc   :  { %4462 = vtanh.f32 %v5854_v23 }
 0x8c1   :  { %v4461_v38 = vpop.eup %4460  ;;  %v1679_v54 = vpop.permute.xlu2 %1678 }
 0x8c2   :  { %1724 = vrot.lane.b32.xlu0 %v4461_v38, %s4978_s7  ;;  %v4463_v8 = vpop.eup %4462  ;;  %v5862_v21 = vadd.f32 %v1679_v54, %v1616_v58 }
 0x8c3   :  { %1722 = vrot.lane.b32.xlu1 %v4463_v8, %s4978_s7 }
 0x8c4   :  { %4464 = vtanh.f32 %v5862_v21 }
 0x8c6   :  { %v1673_v3 = vpop.permute.xlu0 %1672 }
 0x8c7   :  { %v5867_v45 = vadd.f32 %v1673_v3, %v1613_v61 }
 0x8c9   :  { %4466 = vtanh.f32 %v5867_v45 }
 0x8ca   :  { %v4465_v47 = vpop.eup %4464 }
 0x8cb   :  { %1726 = vrot.lane.b32.xlu1 %v4465_v47, %s4978_s7 }
 0x8ce   :  { %v1669_v52 = vpop.permute.xlu0 %1668 }
 0x8cf   :  { %v4467_v6 = vpop.eup %4466  ;;  %v5873_v62 = vadd.f32 %v1669_v52, %v1611_v0 }
 0x8d0   :  { %1720 = vrot.lane.b32.xlu2 %v4467_v6, %s4978_s7 }
 0x8d1   :  { %4468 = vtanh.f32 %v5873_v62 }
 0x8d6   :  { %v1681_v24 = vpop.permute.xlu0 %1680 }
 0x8d7   :  { %v4469_v26 = vpop.eup %4468  ;;  %v5879_v16 = vadd.f32 %v1681_v24, %v1617_v37 }
 0x8d8   :  { %1716 = vrot.lane.b32.xlu2 %v4469_v26, %s4978_s7 }
 0x8d9   :  { %4470 = vtanh.f32 %v5879_v16 }
 0x8df   :  { %v4471_v42 = vpop.eup %4470 }
 0x8e0   :  { %1728 = vrot.lane.b32.xlu2 %v4471_v42, %s4978_s7 }
 0x92a   :  { %v1721_v55 = vpop.permute.xlu2 %1720 }
 0x92b   :  { %v1741_v1 = vmul.f32 %v1721_v55, %v5780_v28 }
 0x92c   :  { %v1719_v34 = vpop.permute.xlu0 %1718 }
 0x92d   :  { %v1715_v4 = vpop.permute.xlu1 %1714  ;;  %v1740_v44 = vmul.f32 %v1719_v34, %v5735_v30 }
 0x92e   :  { %v1738_v25 = vmul.f32 %v1715_v4, %v5795_v59 }
 0x92f   :  { %v1757_v13 = vrot.slane %v1740_v44, 1 }
 0x930   :  { %v1754_v56 = vrot.slane %v1738_v25, 3 }
 0x932   :  { %v1717_v19 = vpop.permute.xlu2 %1716 }
 0x933   :  { %v1739_v49 = vmul.f32 %v1717_v19, %v5804_v14 }
 0x934   :  { %v1725_v53 = vpop.permute.xlu0 %1724 }
 0x935   :  { %v1755_v2 = vrot.slane %v1739_v49, 2  ;;  %v1723_v43 = vpop.permute.xlu1 %1722  ;;  %v1743_v12 = vmul.f32 %v1725_v53, %v5752_v11 }
 0x936   :  { %v1742_v5 = vmul.f32 %v1723_v43, %v5817_v57 }
 0x937   :  { %v1756_v9 = vsel %vm578_vm3, %v1755_v2, %v1754_v56  ;;  %v1762_v63 = vrot.slane %v1743_v12, 6 }
 0x938   :  { %v1758_v10 = vsel %vm581_vm4, %v1757_v13, %v1756_v9  ;;  %v1760_v20 = vrot.slane %v1742_v5, 7 }
 0x939   :  { %v1759_v14 = vsel %vm584_vm5, %v1741_v1, %v1758_v10 }
 0x93a   :  { %v1729_v59 = vpop.permute.xlu2 %1728  ;;  %v1761_v35 = vsel %vm587_vm6, %v1760_v20, %v1759_v14 }
 0x93b   :  { %v1745_v30 = vmul.f32 %v1729_v59, %v5825_v15  ;;  %v1763_v58 = vsel %vm590_vm7, %v1762_v63, %v1761_v35 }
 0x93d   :  { %v1727_v40 = vpop.permute.xlu1 %1726  ;;  %v1766_v38 = vrot.slane %v1745_v30, 4 }
 0x93e   :  { %v1744_v60 = vmul.f32 %v1727_v40, %v5832_v48 }
 0x940   :  { %v1764_v57 = vrot.slane %v1744_v60, 5 }
 0x942   :  { %v1765_v28 = vsel %vm593_vm8, %v1764_v57, %v1763_v58 }
 0x943   :  { %v1767_v50 = vsel %vm596_vm9, %v1766_v38, %v1765_v28 }
 0x944   :  { %1768 = vrot.lane.b32.xlu0 %v1767_v50, %s4979_s21 }
 0x9b6   :  { %v1769_v11 = vpop.permute.xlu0 %1768 }
 0x9b7   :  { %4136 = vmatmul.msk.f32.vlgmr.msrb.gmra.mxu2 %vm225_vm10, %v1769_v11 }
 0xa3a   :  { %v1789_v15 = vpop.f32.mrf.mxu2 }
 0xa3b   :  { %v1795_v54 = vrot.slane %v1789_v15, 6  ;;  %v1794_v8 = vrot.slane %v1789_v15, 5  ;;  %v1793_v61 = vrot.slane %v1789_v15, 4  ;;  %v1797_v47 = vrot.slane %v1789_v15, 1 }
 0xa3c   :  { %v1796_v0 = vrot.slane %v1789_v15, 7  ;;  %v1812_v52 = vadd.f32 %v1789_v15, %v5139_v36  ;;  %v1799_v42 = vrot.slane %v1789_v15, 3  ;;  %v1798_v55 = vrot.slane %v1789_v15, 2 }
 0xa3d   :  { %v1810_v48 = vadd.f32 %v1795_v54, %v5131_v27  ;;  %v1809_v3 = vadd.f32 %v1794_v8, %v5127_v22  ;;  %v1808_v29 = vadd.f32 %v1793_v61, %v5124_v17  ;;  %v1813_v6 = vadd.f32 %v1797_v47, %v5143_v41 }
 0xa3e   :  { %v1811_v37 = vadd.f32 %v1796_v0, %v5135_v32  ;;  %v1815_v4 = vadd.f32 %v1799_v42, %v5154_v51  ;;  %v1814_v25 = vadd.f32 %v1798_v55, %v5147_v46  ;;  %v4141_v60 = vmul.f32 -1.442695, %v1812_v52 }
 0xa3f   :  { %4472 = vtanh.f32 %v1810_v48  ;;  %v4138_v2 = vmul.f32 -1.442695, %v1809_v3  ;;  %v4142_v9 = vmul.f32 -1.442695, %v1813_v6  ;;  %v4139_v20 = vmul.f32 -1.442695, %v1810_v48 }
 0xa40   :  { %4474 = vtanh.f32 %v1809_v3  ;;  %v4144_v5 = vmul.f32 -1.442695, %v1815_v4  ;;  %v4137_v59 = vmul.f32 -1.442695, %v1808_v29  ;;  %v4140_v57 = vmul.f32 -1.442695, %v1811_v37 }
 0xa41   :  { %4476 = vtanh.f32 %v1808_v29  ;;  %v4143_v29 = vmul.f32 -1.442695, %v1814_v25 }
 0xa42   :  { %4478 = vtanh.f32 %v1812_v52 }
 0xa43   :  { %4480 = vtanh.f32 %v1813_v6 }
 0xa44   :  { %4482 = vtanh.f32 %v1811_v37 }
 0xa45   :  { %v4473_v39 = vpop.eup %4472  ;;  %4484 = vtanh.f32 %v1815_v4 }
 0xa46   :  { %v4475_v24 = vpop.eup %4474  ;;  %2020 = vrot.lane.b32.xlu0 %v4473_v39, %s4978_s7  ;;  %4486 = vtanh.f32 %v1814_v25 }
 0xa47   :  { %v4477_v26 = vpop.eup %4476  ;;  %2018 = vrot.lane.b32.xlu2 %v4475_v24, %s4978_s7  ;;  %4488 = vpow2.f32 %v4138_v2 }
 0xa48   :  { %2016 = vrot.lane.b32.xlu1 %v4477_v26, %s4978_s7  ;;  %v4479_v34 = vpop.eup %4478  ;;  %4490 = vpow2.f32 %v4142_v9 }
 0xa49   :  { %v4481_v19 = vpop.eup %4480 }
 0xa4a   :  { %v4483_v49 = vpop.eup %4482 }
 0xa4b   :  { %v4485_v44 = vpop.eup %4484 }
 0xa4c   :  { %v4487_v56 = vpop.eup %4486 }
 0xa4d   :  { %v4489_v43 = vpop.eup %4488 }
 0xa4e   :  { %2024 = vrot.lane.b32.xlu0 %v4479_v34, %s4978_s7  ;;  %v1841_v13 = vadd.f32 1.0, %v4489_v43  ;;  %v4491_v10 = vpop.eup %4490 }
 0xa4f   :  { %2026 = vrot.lane.b32.xlu2 %v4481_v19, %s4978_s7  ;;  %v5917_v53 = vadd.f32 1.0, %v4491_v10 }
 0xa50   :  { %2022 = vrot.lane.b32.xlu1 %v4483_v49, %s4978_s7  ;;  %4492 = vrcp.f32 %v1841_v13  ;;  %v1874_v61 = vand.u32 2147483648, %v1841_v13  ;;  %vm1868_vm11 = vweird.f32 %v1841_v13  ;;  %v1872_v48 = vand.u32 2147483647, %v1841_v13 }
 0xa51   :  { %4494 = vpow2.f32 %v4144_v5  ;;  %v1934_v19 = vand.u32 2147483648, %v5917_v53  ;;  %vm1928_vm14 = vweird.f32 %v5917_v53 }
 0xa52   :  { %4496 = vrcp.f32 %v5917_v53  ;;  %v1875_v39 = vor.u32 1.1754944e-38, %v1874_v61  ;;  %vm1873_vm12 = vcmp.eq.f32.partialorder %v1872_v48, 8.507059e+37 }
 0xa53   :  { %4498 = vpow2.f32 %v4139_v20 }
 0xa54   :  { %4500 = vpow2.f32 %v4137_v59 }
 0xa56   :  { %v4493_v1 = vpop.eup %4492 }
 0xa57   :  { %2030 = vrot.lane.b32.xlu2 %v4485_v44, %s4978_s7  ;;  %v4495_v12 = vpop.eup %4494  ;;  %v1864_v14 = vmul.f32 %v4493_v1, %v1841_v13  ;;  %vm1869_vm1 = vweird.f32 %v4493_v1  ;;  %v1932_v44 = vand.u32 2147483647, %v5917_v53  ;;  %v1935_v13 = vor.u32 1.1754944e-38, %v1934_v19 }
 0xa58   :  { %2028 = vrot.lane.b32.xlu1 %v4487_v56, %s4978_s7  ;;  %v5920_v30 = vadd.f32 1.0, %v4495_v12  ;;  %v4497_v35 = vpop.eup %4496  ;;  %vm1870_vm2 = vmor %vm1868_vm11, %vm1869_vm1 }
 0xa59   :  { %v1865_v40 = vsub.f32 1.0, %v1864_v14  ;;  %v4499_v63 = vpop.eup %4498  ;;  %v1924_v58 = vmul.f32 %v4497_v35, %v5917_v53  ;;  %vm1929_vm13 = vweird.f32 %v4497_v35  ;;  %vm1933_vm1 = vcmp.eq.f32.partialorder %v1932_v44, 8.507059e+37 }
 0xa5a   :  { %4502 = vrcp.f32 %v5920_v30  ;;  %v4501_v28 = vpop.eup %4500  ;;  %v5924_v50 = vadd.f32 1.0, %v4499_v63  ;;  %vm1930_vm15 = vmor %vm1928_vm14, %vm1929_vm13  ;;  %v1962_v63 = vand.u32 2147483647, %v5920_v30 }
 0xa5b   :  { %v1866_v38 = vmul.f32 %v4493_v1, %v1865_v40  ;;  %4504 = vpow2.f32 %v4141_v60  ;;  %v1925_v15 = vsub.f32 1.0, %v1924_v58  ;;  %v5926_v54 = vadd.f32 1.0, %v4501_v28 }
 0xa5c   :  { %4506 = vpow2.f32 %v4140_v57  ;;  %v1964_v40 = vand.u32 2147483648, %v5920_v30  ;;  %vm1963_vm13 = vcmp.eq.f32.partialorder %v1962_v63, 8.507059e+37 }
 0xa5d   :  { %v1867_v11 = vadd.f32 %v4493_v1, %v1866_v38  ;;  %4508 = vrcp.f32 %v5924_v50  ;;  %v1926_v0 = vmul.f32 %v4497_v35, %v1925_v15 }
 0xa5e   :  { %4510 = vrcp.f32 %v5926_v54  ;;  %v1965_v28 = vor.u32 1.1754944e-38, %v1964_v40 }
 0xa5f   :  { %v1871_v47 = vsel %vm1870_vm2, %v4493_v1, %v1867_v11  ;;  %4512 = vpow2.f32 %v4143_v29  ;;  %v1927_v4 = vadd.f32 %v4497_v35, %v1926_v0  ;;  %vm1958_vm2 = vweird.f32 %v5920_v30 }
 0xa60   :  { %v5928_v8 = vpop.eup %4502  ;;  %v5936_v26 = vsel %vm1873_vm12, %v1875_v39, %v1871_v47  ;;  %v1887_v47 = vand.u32 2147483647, %v5924_v50  ;;  %v1859_v39 = vand.u32 2147483648, %v5926_v54 }
 0xa61   :  { %v4505_v3 = vpop.eup %4504  ;;  %v1954_v52 = vmul.f32 %v5928_v8, %v5920_v30  ;;  %v1931_v2 = vsel %vm1930_vm15, %v4497_v35, %v1927_v4  ;;  %vm1959_vm11 = vweird.f32 %v5928_v8  ;;  %vm1883_vm15 = vweird.f32 %v5924_v50 }
 0xa62   :  { %v4507_v6 = vpop.eup %4506  ;;  %v5934_v37 = vadd.f32 1.0, %v4505_v3  ;;  %v5956_v10 = vsel %vm1933_vm1, %v1935_v13, %v1931_v2  ;;  %vm1960_vm12 = vmor %vm1958_vm2, %vm1959_vm11  ;;  %vm1853_vm2 = vweird.f32 %v5926_v54 }
 0xa63   :  { %v5938_v42 = vpop.eup %4508  ;;  %v1955_v34 = vsub.f32 1.0, %v1954_v52  ;;  %v5941_v25 = vadd.f32 1.0, %v4507_v6 }
 0xa64   :  { %v5944_v49 = vpop.eup %4510  ;;  %4514 = vrcp.f32 %v5934_v37  ;;  %v1879_v56 = vmul.f32 %v5938_v42, %v5924_v50  ;;  %vm1884_vm14 = vweird.f32 %v5938_v42 }
 0xa65   :  { %v1956_v9 = vmul.f32 %v5928_v8, %v1955_v34  ;;  %4516 = vrcp.f32 %v5941_v25  ;;  %v4513_v43 = vpop.eup %4512  ;;  %v1849_v5 = vmul.f32 %v5944_v49, %v5926_v54  ;;  %vm1854_vm1 = vweird.f32 %v5944_v49  ;;  %vm1885_vm11 = vmor %vm1883_vm15, %vm1884_vm14 }
 0xa66   :  { %v1880_v1 = vsub.f32 1.0, %v1879_v56  ;;  %v5963_v14 = vadd.f32 1.0, %v4513_v43 }
 0xa67   :  { %v1957_v12 = vadd.f32 %v5928_v8, %v1956_v9  ;;  %v1850_v35 = vsub.f32 1.0, %v1849_v5  ;;  %v1919_v5 = vand.u32 2147483648, %v5934_v37 }
 0xa68   :  { %v1881_v57 = vmul.f32 %v5938_v42, %v1880_v1  ;;  %4518 = vrcp.f32 %v5963_v14 }
 0xa69   :  { %v1961_v58 = vsel %vm1960_vm12, %v5928_v8, %v1957_v12  ;;  %v1851_v11 = vmul.f32 %v5944_v49, %v1850_v35  ;;  %v1889_v8 = vand.u32 2147483648, %v5924_v50  ;;  %vm1855_vm12 = vmor %vm1853_vm2, %vm1854_vm1  ;;  %vm1913_vm1 = vweird.f32 %v5934_v37 }
 0xa6a   :  { %v5958_v20 = vpop.eup %4514  ;;  %v5979_v61 = vsel %vm1963_vm13, %v1965_v28, %v1961_v58  ;;  %v1882_v48 = vadd.f32 %v5938_v42, %v1881_v57  ;;  %vm1888_vm13 = vcmp.eq.f32.partialorder %v1887_v47, 8.507059e+37  ;;  %v1904_v12 = vand.u32 2147483648, %v5941_v25 }
 0xa6b   :  { %v5966_v60 = vpop.eup %4516  ;;  %v1909_v38 = vmul.f32 %v5958_v20, %v5934_v37  ;;  %v1852_v0 = vadd.f32 %v5944_v49, %v1851_v11  ;;  %v1890_v4 = vor.u32 1.1754944e-38, %v1889_v8  ;;  %vm1914_vm15 = vweird.f32 %v5958_v20 }
 0xa6c   :  { %v1894_v15 = vmul.f32 %v5966_v60, %v5941_v25  ;;  %vm1915_vm2 = vmor %vm1913_vm1, %vm1914_vm15  ;;  %v1920_v35 = vor.u32 1.1754944e-38, %v1919_v5  ;;  %v1905_v28 = vor.u32 1.1754944e-38, %v1904_v12 }
 0xa6d   :  { %v1910_v3 = vsub.f32 1.0, %v1909_v38  ;;  %v1856_v34 = vsel %vm1855_vm12, %v5944_v49, %v1852_v0  ;;  %v1917_v49 = vand.u32 2147483647, %v5934_v37  ;;  %vm1898_vm12 = vweird.f32 %v5941_v25 }
 0xa6e   :  { %v1895_v52 = vsub.f32 1.0, %v1894_v15  ;;  %v5989_v6 = vpop.eup %4518  ;;  %v1902_v37 = vand.u32 2147483647, %v5941_v25 }
 0xa6f   :  { %v1911_v50 = vmul.f32 %v5958_v20, %v1910_v3  ;;  %v1939_v44 = vmul.f32 %v5989_v6, %v5963_v14  ;;  %vm1944_vm1 = vweird.f32 %v5989_v6 }
 0xa70   :  { %v1896_v19 = vmul.f32 %v5966_v60, %v1895_v52  ;;  %vm1903_vm15 = vcmp.eq.f32.partialorder %v1902_v37, 8.507059e+37  ;;  %v1986_v52 = vrot.slane %v5839_v18, 7  ;;  %v1989_v18 = vrot.slane %v5849_v33, 7 }
 0xa71   :  { %v1991_v33 = vrot.slane %v5879_v16, 7 }
 0xa72   :  { %v1897_v1 = vadd.f32 %v5966_v60, %v1896_v19 }
 0xaa1   :  { %v2019_v24 = vpop.permute.xlu2 %2018 }
 0xaa2   :  { %v2041_v55 = vmul.f32 %v2019_v24, %v5936_v26  ;;  %v1886_v24 = vsel %vm1885_vm11, %v5938_v42, %v1882_v48  ;;  %v1860_v42 = vor.u32 1.1754944e-38, %v1859_v39  ;;  %vm1899_vm11 = vweird.f32 %v5966_v60 }
 0xaa3   :  { %v6001_v2 = vsel %vm1888_vm13, %v1890_v4, %v1886_v24  ;;  %vm1900_vm13 = vmor %vm1898_vm12, %vm1899_vm11  ;;  %vm1943_vm11 = vweird.f32 %v5963_v14  ;;  %v1947_v48 = vand.u32 2147483647, %v5963_v14  ;;  %v1985_v39 = vrot.slane %v5873_v62, 7 }
 0xaa4   :  { %2058 = vrot.lane.b32.xlu1 %v2041_v55, %s4978_s7  ;;  %v1857_v55 = vand.u32 2147483647, %v5926_v54  ;;  %v1912_v54 = vadd.f32 %v5958_v20, %v1911_v50  ;;  %v1901_v63 = vsel %vm1900_vm13, %v5966_v60, %v1897_v1  ;;  %v1949_v60 = vand.u32 2147483648, %v5963_v14 }
 0xaa5   :  { %v6025_v15 = vsel %vm1903_vm15, %v1905_v28, %v1901_v63  ;;  %vm1948_vm12 = vcmp.eq.f32.partialorder %v1947_v48, 8.507059e+37  ;;  %v2002_v24 = vmul.f32 %v1986_v52, %v6001_v2  ;;  %v2001_v14 = vmul.f32 %v1985_v39, %v5936_v26 }
 0xaa6   :  { %vm1858_vm14 = vcmp.eq.f32.partialorder %v1857_v55, 8.507059e+37  ;;  %v1916_v40 = vsel %vm1915_vm2, %v5958_v20, %v1912_v54  ;;  %vm1945_vm2 = vmor %vm1943_vm11, %vm1944_vm1 }
 0xaa7   :  { %v6006_v13 = vsel %vm1858_vm14, %v1860_v42, %v1856_v34  ;;  %vm1918_vm14 = vcmp.eq.f32.partialorder %v1917_v49, 8.507059e+37  ;;  %v1988_v34 = vrot.slane %v5854_v23, 7  ;;  %v2007_v23 = vmul.f32 %v1991_v33, %v5979_v61 }
 0xaa8   :  { %v6022_v38 = vsel %vm1918_vm14, %v1920_v35, %v1916_v40  ;;  %v1987_v35 = vrot.slane %v5867_v45, 7 }
 0xaa9   :  { %v2027_v53 = vpop.permute.xlu2 %2026  ;;  %v2004_v62 = vmul.f32 %v1988_v34, %v6022_v38 }
 0xaaa   :  { %v2045_v59 = vmul.f32 %v2027_v53, %v5956_v10  ;;  %v2003_v63 = vmul.f32 %v1987_v35, %v6025_v15 }
 0xaac   :  { %2066 = vrot.lane.b32.xlu1 %v2045_v59, %s4978_s7  ;;  %v1940_v59 = vsub.f32 1.0, %v1939_v44  ;;  %v2005_v44 = vmul.f32 %v1989_v18, %v5956_v10 }
 0xaae   :  { %v1941_v57 = vmul.f32 %v5989_v6, %v1940_v59  ;;  %v1984_v59 = vrot.slane %v5843_v31, 7  ;;  %v1990_v31 = vrot.slane %v5862_v21, 7 }
 0xab0   :  { %v1942_v25 = vadd.f32 %v5989_v6, %v1941_v57  ;;  %v2000_v12 = vmul.f32 %v1984_v59, %v6006_v13 }
 0xab1   :  { %v2031_v30 = vpop.permute.xlu2 %2030 }
 0xab2   :  { %v2047_v29 = vmul.f32 %v2031_v30, %v5979_v61  ;;  %v1946_v3 = vsel %vm1945_vm2, %v5989_v6, %v1942_v25 }
 0xab4   :  { %2070 = vrot.lane.b32.xlu1 %v2047_v29, %s4978_s7  ;;  %v1950_v29 = vor.u32 1.1754944e-38, %v1949_v60 }
 0xab6   :  { %v6036_v8 = vsel %vm1948_vm12, %v1950_v29, %v1946_v3 }
 0xab8   :  { %v2021_v56 = vpop.permute.xlu0 %2020 }
 0xab9   :  { %v2042_v9 = vmul.f32 %v2021_v56, %v6001_v2 }
 0xaba   :  { %v2017_v43 = vpop.permute.xlu1 %2016 }
 0xabb   :  { %v2040_v53 = vmul.f32 %v2017_v43, %v6006_v13  ;;  %2060 = vrot.lane.b32.xlu2 %v2042_v9, %s4978_s7 }
 0xabd   :  { %2056 = vrot.lane.b32.xlu0 %v2040_v53, %s4978_s7 }
 0xac0   :  { %v2025_v58 = vpop.permute.xlu0 %2024 }
 0xac1   :  { %v2044_v11 = vmul.f32 %v2025_v58, %v6022_v38 }
 0xac2   :  { %v2023_v20 = vpop.permute.xlu1 %2022 }
 0xac3   :  { %v2043_v30 = vmul.f32 %v2023_v20, %v6025_v15  ;;  %2064 = vrot.lane.b32.xlu2 %v2044_v11, %s4978_s7  ;;  %v2006_v11 = vmul.f32 %v1990_v31, %v6036_v8 }
 0xac5   :  { %2062 = vrot.lane.b32.xlu0 %v2043_v30, %s4978_s7 }
 0xaca   :  { %v2029_v47 = vpop.permute.xlu1 %2028 }
 0xacb   :  { %v2046_v0 = vmul.f32 %v2029_v47, %v6036_v8 }
 0xacd   :  { %2068 = vrot.lane.b32.xlu0 %v2046_v0, %s4978_s7 }
 0xb15   :  { %v2061_v55 = vpop.permute.xlu2 %2060 }
 0xb16   :  { %v6044_v50 = vadd.f32 %v2061_v55, %v2002_v24  ;;  %v2059_v6 = vpop.permute.xlu1 %2058 }
 0xb17   :  { %v6046_v4 = vadd.f32 %v2059_v6, %v2001_v14 }
 0xb18   :  { %4520 = vtanh.f32 %v6044_v50 }
 0xb19   :  { %4522 = vtanh.f32 %v6046_v4 }
 0xb1d   :  { %v2065_v19 = vpop.permute.xlu2 %2064 }
 0xb1e   :  { %v4521_v56 = vpop.eup %4520  ;;  %v6054_v42 = vadd.f32 %v2065_v19, %v2004_v62  ;;  %v2067_v9 = vpop.permute.xlu1 %2066 }
 0xb1f   :  { %v4523_v54 = vpop.eup %4522  ;;  %v6056_v43 = vadd.f32 %v2067_v9, %v2005_v44  ;;  %2108 = vrot.lane.b32.xlu1 %v4521_v56, %s4978_s7 }
 0xb20   :  { %4524 = vtanh.f32 %v6054_v42  ;;  %2106 = vrot.lane.b32.xlu0 %v4523_v54, %s4978_s7 }
 0xb21   :  { %4526 = vtanh.f32 %v6056_v43 }
 0xb26   :  { %v4525_v49 = vpop.eup %4524  ;;  %v2071_v5 = vpop.permute.xlu1 %2070 }
 0xb27   :  { %v4527_v53 = vpop.eup %4526  ;;  %v6064_v1 = vadd.f32 %v2071_v5, %v2007_v23  ;;  %2112 = vrot.lane.b32.xlu1 %v4525_v49, %s4978_s7 }
 0xb28   :  { %2114 = vrot.lane.b32.xlu0 %v4527_v53, %s4978_s7 }
 0xb29   :  { %4528 = vtanh.f32 %v6064_v1 }
 0xb2f   :  { %v4529_v40 = vpop.eup %4528  ;;  %v2057_v37 = vpop.permute.xlu0 %2056 }
 0xb30   :  { %v6071_v16 = vadd.f32 %v2057_v37, %v2000_v12  ;;  %2118 = vrot.lane.b32.xlu0 %v4529_v40, %s4978_s7 }
 0xb32   :  { %4530 = vtanh.f32 %v6071_v16 }
 0xb37   :  { %v2063_v57 = vpop.permute.xlu0 %2062 }
 0xb38   :  { %v4531_v58 = vpop.eup %4530  ;;  %v6077_v28 = vadd.f32 %v2063_v57, %v2003_v63 }
 0xb39   :  { %2104 = vrot.lane.b32.xlu2 %v4531_v58, %s4978_s7 }
 0xb3a   :  { %4532 = vtanh.f32 %v6077_v28 }
 0xb3f   :  { %v2069_v20 = vpop.permute.xlu0 %2068 }
 0xb40   :  { %v4533_v30 = vpop.eup %4532  ;;  %v6083_v25 = vadd.f32 %v2069_v20, %v2006_v11 }
 0xb41   :  { %2110 = vrot.lane.b32.xlu2 %v4533_v30, %s4978_s7 }
 0xb42   :  { %4534 = vtanh.f32 %v6083_v25 }
 0xb48   :  { %v4535_v45 = vpop.eup %4534 }
 0xb49   :  { %2116 = vrot.lane.b32.xlu2 %v4535_v45, %s4978_s7 }
 0xb91   :  { %v2109_v3 = vpop.permute.xlu1 %2108 }
 0xb92   :  { %v2107_v60 = vpop.permute.xlu0 %2106  ;;  %v2130_v47 = vmul.f32 %v2109_v3, %v6001_v2 }
 0xb93   :  { %v2105_v48 = vpop.permute.xlu2 %2104  ;;  %v2129_v29 = vmul.f32 %v2107_v60, %v5936_v26 }
 0xb94   :  { %v2128_v21 = vmul.f32 %v2105_v48, %v6006_v13  ;;  %v2147_v55 = vrot.slane %v2130_v47, 2 }
 0xb95   :  { %v2145_v0 = vrot.slane %v2129_v29, 3 }
 0xb96   :  { %v2144_v52 = vrot.slane %v2128_v21, 4 }
 0xb98   :  { %v2146_v6 = vsel %vm578_vm3, %v2145_v0, %v2144_v52 }
 0xb99   :  { %v2113_v18 = vpop.permute.xlu1 %2112  ;;  %v2148_v62 = vsel %vm581_vm4, %v2147_v55, %v2146_v6 }
 0xb9a   :  { %v2115_v39 = vpop.permute.xlu0 %2114  ;;  %v2132_v13 = vmul.f32 %v2113_v18, %v6022_v38 }
 0xb9b   :  { %v2111_v24 = vpop.permute.xlu2 %2110  ;;  %v2133_v19 = vmul.f32 %v2115_v39, %v5956_v10 }
 0xb9c   :  { %v2131_v14 = vmul.f32 %v2111_v24, %v6025_v15 }
 0xb9d   :  { %v2152_v54 = vrot.slane %v2133_v19, 7 }
 0xb9e   :  { %v2149_v34 = vrot.slane %v2131_v14, 1 }
 0xba0   :  { %v2150_v26 = vsel %vm584_vm5, %v2149_v34, %v2148_v62 }
 0xba1   :  { %v2151_v9 = vsel %vm587_vm6, %v2132_v13, %v2150_v26 }
 0xba2   :  { %v2119_v2 = vpop.permute.xlu0 %2118  ;;  %v2153_v49 = vsel %vm590_vm7, %v2152_v54, %v2151_v9 }
 0xba3   :  { %v2135_v44 = vmul.f32 %v2119_v2, %v5979_v61  ;;  %v2117_v56 = vpop.permute.xlu2 %2116 }
 0xba4   :  { %v2134_v15 = vmul.f32 %v2117_v56, %v6036_v8 }
 0xba5   :  { %v2156_v33 = vrot.slane %v2135_v44, 5 }
 0xba6   :  { %v2154_v23 = vrot.slane %v2134_v15, 6 }
 0xba8   :  { %v2155_v5 = vsel %vm593_vm8, %v2154_v23, %v2153_v49 }
 0xba9   :  { %v2157_v10 = vsel %vm596_vm9, %v2156_v33, %v2155_v5 }
 0xbaa   :  { %2158 = vrot.lane.b32.xlu1 %v2157_v10, %s4979_s21 }
 0xc1c   :  { %v2159_v38 = vpop.permute.xlu1 %2158 }
 0xc1d   :  { %4145 = vmatmul.msk.f32.vlgmr.msrb.gmra.mxu3 %vm225_vm10, %v2159_v38 }
 0xca0   :  { %v2179_v61 = vpop.f32.mrf.mxu3 }
 0xca1   :  { %v2185_v53 = vrot.slane %v2179_v61, 5  ;;  %v2184_v59 = vrot.slane %v2179_v61, 4  ;;  %v2183_v12 = vrot.slane %v2179_v61, 3  ;;  %v2188_v35 = vrot.slane %v2179_v61, 1 }
 0xca2   :  { %v2187_v63 = vrot.slane %v2179_v61, 7  ;;  %v2186_v57 = vrot.slane %v2179_v61, 6  ;;  %v2189_v60 = vrot.slane %v2179_v61, 2  ;;  %v2203_v29 = vadd.f32 %v2179_v61, %v5143_v41 }
 0xca3   :  { %v2200_v8 = vadd.f32 %v2185_v53, %v5131_v27  ;;  %v2199_v40 = vadd.f32 %v2184_v59, %v5127_v22  ;;  %v2198_v37 = vadd.f32 %v2183_v12, %v5124_v17  ;;  %v2204_v58 = vadd.f32 %v2188_v35, %v5147_v46 }
 0xca4   :  { %v2202_v31 = vadd.f32 %v2187_v63, %v5139_v36  ;;  %v2201_v20 = vadd.f32 %v2186_v57, %v5135_v32  ;;  %v2205_v48 = vadd.f32 %v2189_v60, %v5154_v51  ;;  %v4151_v6 = vmul.f32 -1.442695, %v2203_v29 }
 0xca5   :  { %4536 = vtanh.f32 %v2200_v8  ;;  %v4146_v39 = vmul.f32 -1.442695, %v2198_v37  ;;  %v4148_v62 = vmul.f32 -1.442695, %v2200_v8  ;;  %v4147_v26 = vmul.f32 -1.442695, %v2199_v40 }
 0xca6   :  { %4538 = vtanh.f32 %v2199_v40  ;;  %v4149_v24 = vmul.f32 -1.442695, %v2201_v20  ;;  %v4152_v56 = vmul.f32 -1.442695, %v2204_v58  ;;  %v4150_v54 = vmul.f32 -1.442695, %v2202_v31 }
 0xca7   :  { %4540 = vtanh.f32 %v2198_v37  ;;  %v4153_v12 = vmul.f32 -1.442695, %v2205_v48 }
 0xca8   :  { %4542 = vtanh.f32 %v2204_v58 }
 0xca9   :  { %4544 = vtanh.f32 %v2202_v31 }
 0xcaa   :  { %4546 = vtanh.f32 %v2201_v20 }
 0xcab   :  { %v4537_v11 = vpop.eup %4536  ;;  %4548 = vtanh.f32 %v2205_v48 }
 0xcac   :  { %v4539_v30 = vpop.eup %4538  ;;  %2410 = vrot.lane.b32.xlu1 %v4537_v11, %s4978_s7  ;;  %4550 = vtanh.f32 %v2203_v29 }
 0xcad   :  { %v4541_v45 = vpop.eup %4540  ;;  %2408 = vrot.lane.b32.xlu0 %v4539_v30, %s4978_s7  ;;  %4552 = vpow2.f32 %v4146_v39 }
 0xcae   :  { %2406 = vrot.lane.b32.xlu2 %v4541_v45, %s4978_s7  ;;  %v4543_v3 = vpop.eup %4542  ;;  %4554 = vpow2.f32 %v4149_v24 }
 0xcaf   :  { %v4545_v21 = vpop.eup %4544 }
 0xcb0   :  { %v4547_v47 = vpop.eup %4546 }
 0xcb1   :  { %v4549_v0 = vpop.eup %4548 }
 0xcb2   :  { %v4551_v52 = vpop.eup %4550 }
 0xcb3   :  { %v4553_v55 = vpop.eup %4552 }
 0xcb4   :  { %2418 = vrot.lane.b32.xlu1 %v4543_v3, %s4978_s7  ;;  %v2230_v14 = vadd.f32 1.0, %v4553_v55  ;;  %v4555_v34 = vpop.eup %4554 }
 0xcb5   :  { %2414 = vrot.lane.b32.xlu0 %v4545_v21, %s4978_s7  ;;  %v6121_v18 = vadd.f32 1.0, %v4555_v34 }
 0xcb6   :  { %2412 = vrot.lane.b32.xlu2 %v4547_v47, %s4978_s7  ;;  %4556 = vrcp.f32 %v2230_v14  ;;  %v2249_v8 = vand.u32 2147483648, %v2230_v14  ;;  %vm2243_vm14 = vweird.f32 %v2230_v14  ;;  %v2247_v37 = vand.u32 2147483647, %v2230_v14 }
 0xcb7   :  { %4558 = vpow2.f32 %v4151_v6  ;;  %v2294_v47 = vand.u32 2147483648, %v6121_v18  ;;  %vm2288_vm2 = vweird.f32 %v6121_v18 }
 0xcb8   :  { %4560 = vrcp.f32 %v6121_v18  ;;  %v2250_v31 = vor.u32 1.1754944e-38, %v2249_v8  ;;  %vm2248_vm1 = vcmp.eq.f32.partialorder %v2247_v37, 8.507059e+37 }
 0xcb9   :  { %4562 = vpow2.f32 %v4148_v62  ;;  %v2295_v6 = vor.u32 1.1754944e-38, %v2294_v47 }
 0xcba   :  { %4564 = vpow2.f32 %v4147_v26 }
 0xcbc   :  { %v4557_v19 = vpop.eup %4556 }
 0xcbd   :  { %2420 = vrot.lane.b32.xlu0 %v4549_v0, %s4978_s7  ;;  %v4559_v13 = vpop.eup %4558  ;;  %v2239_v2 = vmul.f32 %v4557_v19, %v2230_v14  ;;  %vm2244_vm13 = vweird.f32 %v4557_v19  ;;  %v2292_v0 = vand.u32 2147483647, %v6121_v18 }
 0xcbe   :  { %2416 = vrot.lane.b32.xlu2 %v4551_v52, %s4978_s7  ;;  %v6124_v44 = vadd.f32 1.0, %v4559_v13  ;;  %v4561_v15 = vpop.eup %4560  ;;  %vm2245_vm15 = vmor %vm2243_vm14, %vm2244_vm13 }
 0xcbf   :  { %v2240_v9 = vsub.f32 1.0, %v2239_v2  ;;  %v4563_v33 = vpop.eup %4562  ;;  %v2284_v5 = vmul.f32 %v4561_v15, %v6121_v18  ;;  %vm2289_vm11 = vweird.f32 %v4561_v15  ;;  %vm2293_vm13 = vcmp.eq.f32.partialorder %v2292_v0, 8.507059e+37 }
 0xcc0   :  { %v4565_v23 = vpop.eup %4564  ;;  %4566 = vrcp.f32 %v6124_v44  ;;  %v6128_v10 = vadd.f32 1.0, %v4563_v33  ;;  %vm2290_vm12 = vmor %vm2288_vm2, %vm2289_vm11 }
 0xcc1   :  { %v2241_v49 = vmul.f32 %v4557_v19, %v2240_v9  ;;  %4568 = vpow2.f32 %v4152_v56  ;;  %v6130_v38 = vadd.f32 1.0, %v4565_v23  ;;  %v2285_v53 = vsub.f32 1.0, %v2284_v5 }
 0xcc2   :  { %4570 = vpow2.f32 %v4150_v54  ;;  %v2322_v54 = vand.u32 2147483647, %v6124_v44 }
 0xcc3   :  { %v2242_v61 = vadd.f32 %v4557_v19, %v2241_v49  ;;  %4572 = vrcp.f32 %v6128_v10  ;;  %v2286_v57 = vmul.f32 %v4561_v15, %v2285_v53 }
 0xcc4   :  { %4574 = vrcp.f32 %v6130_v38  ;;  %vm2323_vm11 = vcmp.eq.f32.partialorder %v2322_v54, 8.507059e+37 }
 0xcc5   :  { %v2246_v63 = vsel %vm2245_vm15, %v4557_v19, %v2242_v61  ;;  %4576 = vpow2.f32 %v4153_v12  ;;  %v2287_v29 = vadd.f32 %v4561_v15, %v2286_v57  ;;  %vm2318_vm15 = vweird.f32 %v6124_v44 }
 0xcc6   :  { %v6132_v59 = vpop.eup %4566  ;;  %v6144_v60 = vsel %vm2248_vm1, %v2250_v31, %v2246_v63  ;;  %v2279_v12 = vand.u32 2147483648, %v6128_v10  ;;  %v2264_v31 = vand.u32 2147483648, %v6130_v38 }
 0xcc7   :  { %v4569_v40 = vpop.eup %4568  ;;  %v2314_v58 = vmul.f32 %v6132_v59, %v6124_v44  ;;  %v2291_v55 = vsel %vm2290_vm12, %v4561_v15, %v2287_v29  ;;  %vm2319_vm14 = vweird.f32 %v6132_v59  ;;  %v2324_v15 = vand.u32 2147483648, %v6124_v44 }
 0xcc8   :  { %v4571_v35 = vpop.eup %4570  ;;  %v6138_v11 = vadd.f32 1.0, %v4569_v40  ;;  %v6164_v18 = vsel %vm2293_vm13, %v2295_v6, %v2291_v55  ;;  %vm2320_vm1 = vmor %vm2318_vm15, %vm2319_vm14  ;;  %vm2273_vm13 = vweird.f32 %v6128_v10  ;;  %vm2258_vm15 = vweird.f32 %v6130_v38 }
 0xcc9   :  { %v6140_v20 = vadd.f32 1.0, %v4571_v35  ;;  %v6142_v30 = vpop.eup %4572  ;;  %v2315_v21 = vsub.f32 1.0, %v2314_v58  ;;  %v2325_v53 = vor.u32 1.1754944e-38, %v2324_v15  ;;  %v2277_v58 = vand.u32 2147483647, %v6128_v10 }
 0xcca   :  { %v6146_v48 = vpop.eup %4574  ;;  %4578 = vrcp.f32 %v6138_v11  ;;  %v2269_v52 = vmul.f32 %v6142_v30, %v6128_v10  ;;  %vm2274_vm2 = vweird.f32 %v6142_v30 }
 0xccb   :  { %4580 = vrcp.f32 %v6140_v20  ;;  %v4577_v39 = vpop.eup %4576  ;;  %v2254_v24 = vmul.f32 %v6146_v48, %v6130_v38  ;;  %v2316_v14 = vmul.f32 %v6132_v59, %v2315_v21  ;;  %vm2259_vm12 = vweird.f32 %v6146_v48  ;;  %vm2275_vm14 = vmor %vm2273_vm13, %vm2274_vm2 }
 0xccc   :  { %v2270_v34 = vsub.f32 1.0, %v2269_v52  ;;  %v6160_v62 = vadd.f32 1.0, %v4577_v39  ;;  %v2280_v21 = vor.u32 1.1754944e-38, %v2279_v12  ;;  %v2265_v52 = vor.u32 1.1754944e-38, %v2264_v31 }
 0xccd   :  { %v2255_v13 = vsub.f32 1.0, %v2254_v24  ;;  %v2317_v9 = vadd.f32 %v6132_v59, %v2316_v14  ;;  %v2374_v31 = vrot.slane %v6071_v16, 7 }
 0xcce   :  { %v2271_v33 = vmul.f32 %v6142_v30, %v2270_v34  ;;  %4582 = vrcp.f32 %v6160_v62 }
 0xccf   :  { %v2256_v49 = vmul.f32 %v6146_v48, %v2255_v13  ;;  %v2321_v61 = vsel %vm2320_vm1, %v6132_v59, %v2317_v9  ;;  %vm2260_vm1 = vmor %vm2258_vm15, %vm2259_vm12  ;;  %v2337_v13 = vand.u32 2147483647, %v6138_v11  ;;  %v2307_v9 = vand.u32 2147483647, %v6140_v20 }
 0xcd0   :  { %v6162_v19 = vpop.eup %4578  ;;  %v2272_v44 = vadd.f32 %v6142_v30, %v2271_v33  ;;  %v6186_v40 = vsel %vm2323_vm11, %v2325_v53, %v2321_v61  ;;  %vm2278_vm11 = vcmp.eq.f32.partialorder %v2277_v58, 8.507059e+37  ;;  %v2375_v58 = vrot.slane %v6046_v4, 7 }
 0xcd1   :  { %v6166_v2 = vpop.eup %4580  ;;  %v2329_v23 = vmul.f32 %v6162_v19, %v6138_v11  ;;  %v2257_v35 = vadd.f32 %v6146_v48, %v2256_v49  ;;  %vm2334_vm12 = vweird.f32 %v6162_v19  ;;  %vm2308_vm0 = vcmp.eq.f32.partialorder %v2307_v9, 8.507059e+37 }
 0xcd2   :  { %v2299_v5 = vmul.f32 %v6166_v2, %v6140_v20  ;;  %vm2304_vm13 = vweird.f32 %v6166_v2  ;;  %v2377_v4 = vrot.slane %v6077_v28, 7  ;;  %v2379_v28 = vrot.slane %v6056_v43, 7 }
 0xcd3   :  { %v2330_v8 = vsub.f32 1.0, %v2329_v23  ;;  %v2261_v47 = vsel %vm2260_vm1, %v6146_v48, %v2257_v35  ;;  %vm2303_vm1 = vweird.f32 %v6140_v20  ;;  %v2376_v43 = vrot.slane %v6044_v50, 7 }
 0xcd4   :  { %v2300_v63 = vsub.f32 1.0, %v2299_v5  ;;  %v6190_v57 = vpop.eup %4582 }
 0xcd5   :  { %v2331_v29 = vmul.f32 %v6162_v19, %v2330_v8  ;;  %v2344_v10 = vmul.f32 %v6190_v57, %v6160_v62 }
 0xcd6   :  { %v2301_v0 = vmul.f32 %v6166_v2, %v2300_v63 }
 0xcd7   :  { %v2332_v48 = vadd.f32 %v6162_v19, %v2331_v29 }
 0xcd8   :  { %v2302_v34 = vadd.f32 %v6166_v2, %v2301_v0 }
 0xd08   :  { %v2407_v45 = vpop.permute.xlu2 %2406 }
 0xd09   :  { %v2430_v3 = vmul.f32 %v2407_v45, %v6144_v60  ;;  %v2262_v45 = vand.u32 2147483647, %v6130_v38  ;;  %v2339_v38 = vand.u32 2147483648, %v6138_v11 }
 0xd0b   :  { %2446 = vrot.lane.b32.xlu1 %v2430_v3, %s4978_s7  ;;  %v2276_v3 = vsel %vm2275_vm14, %v6142_v30, %v2272_v44  ;;  %vm2263_vm2 = vcmp.eq.f32.partialorder %v2262_v45, 8.507059e+37  ;;  %vm2333_vm14 = vweird.f32 %v6138_v11  ;;  %v2340_v54 = vor.u32 1.1754944e-38, %v2339_v38 }
 0xd0c   :  { %v6205_v24 = vsel %vm2278_vm11, %v2280_v21, %v2276_v3  ;;  %v6209_v14 = vsel %vm2263_vm2, %v2265_v52, %v2261_v47  ;;  %vm2335_vm15 = vmor %vm2333_vm14, %vm2334_vm12  ;;  %vm2338_vm2 = vcmp.eq.f32.partialorder %v2337_v13, 8.507059e+37  ;;  %vm2349_vm12 = vweird.f32 %v6190_v57 }
 0xd0d   :  { %v2336_v15 = vsel %vm2335_vm15, %v6162_v19, %v2332_v48  ;;  %vm2305_vm11 = vmor %vm2303_vm1, %vm2304_vm13  ;;  %vm2348_vm13 = vweird.f32 %v6160_v62  ;;  %v2352_v44 = vand.u32 2147483647, %v6160_v62  ;;  %v2391_v45 = vmul.f32 %v2375_v58, %v6209_v14 }
 0xd0e   :  { %v2306_v33 = vsel %vm2305_vm11, %v6166_v2, %v2302_v34  ;;  %v6226_v11 = vsel %vm2338_vm2, %v2340_v54, %v2336_v15  ;;  %v2354_v2 = vand.u32 2147483648, %v6160_v62  ;;  %vm2350_vm14 = vmor %vm2348_vm13, %vm2349_vm12  ;;  %v2390_v62 = vmul.f32 %v2374_v31, %v6144_v60 }
 0xd0f   :  { %v2378_v47 = vrot.slane %v6054_v42, 7  ;;  %v2381_v42 = vrot.slane %v6064_v1, 7  ;;  %v2395_v34 = vmul.f32 %v2379_v28, %v6186_v40  ;;  %v2392_v1 = vmul.f32 %v2376_v43, %v6205_v24 }
 0xd10   :  { %v2413_v26 = vpop.permute.xlu2 %2412 }
 0xd11   :  { %v2433_v56 = vmul.f32 %v2413_v26, %v6164_v18  ;;  %v2345_v26 = vsub.f32 1.0, %v2344_v10  ;;  %v2393_v10 = vmul.f32 %v2377_v4, %v6164_v18 }
 0xd13   :  { %2452 = vrot.lane.b32.xlu1 %v2433_v56, %s4978_s7  ;;  %v2309_v56 = vand.u32 2147483648, %v6140_v20  ;;  %v2346_v23 = vmul.f32 %v6190_v57, %v2345_v26 }
 0xd15   :  { %v2310_v49 = vor.u32 1.1754944e-38, %v2309_v56  ;;  %v2347_v19 = vadd.f32 %v6190_v57, %v2346_v23 }
 0xd17   :  { %v6229_v53 = vsel %vm2308_vm0, %v2310_v49, %v2306_v33  ;;  %v2351_v8 = vsel %vm2350_vm14, %v6190_v57, %v2347_v19  ;;  %vm2353_vm0 = vcmp.eq.f32.partialorder %v2352_v44, 8.507059e+37 }
 0xd18   :  { %v2417_v37 = vpop.permute.xlu2 %2416  ;;  %v2394_v16 = vmul.f32 %v2378_v47, %v6229_v53 }
 0xd19   :  { %v2435_v59 = vmul.f32 %v2417_v37, %v6186_v40  ;;  %v2355_v37 = vor.u32 1.1754944e-38, %v2354_v2 }
 0xd1b   :  { %2456 = vrot.lane.b32.xlu1 %v2435_v59, %s4978_s7  ;;  %v6240_v35 = vsel %vm2353_vm0, %v2355_v37, %v2351_v8 }
 0xd1c   :  { %v2397_v48 = vmul.f32 %v2381_v42, %v6240_v35 }
 0xd1e   :  { %v2411_v39 = vpop.permute.xlu1 %2410 }
 0xd1f   :  { %v2432_v30 = vmul.f32 %v2411_v39, %v6205_v24  ;;  %v2409_v55 = vpop.permute.xlu0 %2408 }
 0xd20   :  { %v2431_v6 = vmul.f32 %v2409_v55, %v6209_v14 }
 0xd21   :  { %2450 = vrot.lane.b32.xlu0 %v2432_v30, %s4978_s7 }
 0xd22   :  { %2448 = vrot.lane.b32.xlu2 %v2431_v6, %s4978_s7 }
 0xd26   :  { %v2419_v5 = vpop.permute.xlu1 %2418 }
 0xd27   :  { %v2436_v61 = vmul.f32 %v2419_v5, %v6226_v11  ;;  %v2415_v12 = vpop.permute.xlu0 %2414  ;;  %v2380_v5 = vrot.slane %v6083_v25, 7 }
 0xd28   :  { %v2434_v20 = vmul.f32 %v2415_v12, %v6229_v53 }
 0xd29   :  { %2458 = vrot.lane.b32.xlu0 %v2436_v61, %s4978_s7  ;;  %v2396_v61 = vmul.f32 %v2380_v5, %v6226_v11 }
 0xd2a   :  { %2454 = vrot.lane.b32.xlu2 %v2434_v20, %s4978_s7 }
 0xd2f   :  { %v2421_v63 = vpop.permute.xlu0 %2420 }
 0xd30   :  { %v2437_v59 = vmul.f32 %v2421_v63, %v6240_v35 }
 0xd32   :  { %2460 = vrot.lane.b32.xlu2 %v2437_v59, %s4978_s7 }
 0xd7c   :  { %v2449_v3 = vpop.permute.xlu2 %2448 }
 0xd7d   :  { %v6248_v29 = vadd.f32 %v2449_v3, %v2391_v45  ;;  %v2447_v57 = vpop.permute.xlu1 %2446 }
 0xd7e   :  { %v6250_v21 = vadd.f32 %v2447_v57, %v2390_v62 }
 0xd7f   :  { %4584 = vtanh.f32 %v6248_v29 }
 0xd80   :  { %4586 = vtanh.f32 %v6250_v21 }
 0xd84   :  { %v2455_v0 = vpop.permute.xlu2 %2454 }
 0xd85   :  { %v4585_v52 = vpop.eup %4584  ;;  %v6258_v39 = vadd.f32 %v2455_v0, %v2394_v16  ;;  %v2453_v38 = vpop.permute.xlu1 %2452 }
 0xd86   :  { %v4587_v30 = vpop.eup %4586  ;;  %v6260_v55 = vadd.f32 %v2453_v38, %v2393_v10  ;;  %2496 = vrot.lane.b32.xlu1 %v4585_v52, %s4978_s7 }
 0xd87   :  { %4588 = vtanh.f32 %v6258_v39  ;;  %2494 = vrot.lane.b32.xlu0 %v4587_v30, %s4978_s7 }
 0xd88   :  { %4590 = vtanh.f32 %v6260_v55 }
 0xd8c   :  { %v2461_v6 = vpop.permute.xlu2 %2460 }
 0xd8d   :  { %v4589_v26 = vpop.eup %4588  ;;  %v6270_v13 = vadd.f32 %v2461_v6, %v2397_v48  ;;  %v2457_v56 = vpop.permute.xlu1 %2456 }
 0xd8e   :  { %v4591_v9 = vpop.eup %4590  ;;  %v6272_v15 = vadd.f32 %v2457_v56, %v2395_v34  ;;  %2502 = vrot.lane.b32.xlu1 %v4589_v26, %s4978_s7 }
 0xd8f   :  { %4592 = vtanh.f32 %v6270_v13  ;;  %2500 = vrot.lane.b32.xlu0 %v4591_v9, %s4978_s7 }
 0xd90   :  { %4594 = vtanh.f32 %v6272_v15 }
 0xd93   :  { %v2451_v54 = vpop.permute.xlu0 %2450 }
 0xd94   :  { %v6280_v33 = vadd.f32 %v2451_v54, %v2392_v1 }
 0xd95   :  { %v4593_v23 = vpop.eup %4592 }
 0xd96   :  { %v4595_v49 = vpop.eup %4594  ;;  %4596 = vtanh.f32 %v6280_v33  ;;  %2508 = vrot.lane.b32.xlu1 %v4593_v23, %s4978_s7 }
 0xd97   :  { %2504 = vrot.lane.b32.xlu0 %v4595_v49, %s4978_s7 }
 0xd9b   :  { %v2459_v50 = vpop.permute.xlu0 %2458 }
 0xd9c   :  { %v4597_v12 = vpop.eup %4596  ;;  %v6287_v20 = vadd.f32 %v2459_v50, %v2396_v61 }
 0xd9d   :  { %2498 = vrot.lane.b32.xlu2 %v4597_v12, %s4978_s7 }
 0xd9e   :  { %4598 = vtanh.f32 %v6287_v20 }
 0xda4   :  { %v4599_v19 = vpop.eup %4598 }
 0xda5   :  { %2506 = vrot.lane.b32.xlu2 %v4599_v19, %s4978_s7 }
 0xdf7   :  { %v2499_v8 = vpop.permute.xlu2 %2498 }
 0xdf8   :  { %v2497_v2 = vpop.permute.xlu1 %2496  ;;  %v2520_v63 = vmul.f32 %v2499_v8, %v6205_v24 }
 0xdf9   :  { %v2495_v44 = vpop.permute.xlu0 %2494  ;;  %v2519_v37 = vmul.f32 %v2497_v2, %v6209_v14 }
 0xdfa   :  { %v2518_v25 = vmul.f32 %v2495_v44, %v6144_v60  ;;  %v2537_v62 = vrot.slane %v2520_v63, 3 }
 0xdfb   :  { %v2535_v59 = vrot.slane %v2519_v37, 4 }
 0xdfc   :  { %v2534_v58 = vrot.slane %v2518_v25, 5 }
 0xdfe   :  { %v2536_v47 = vsel %vm578_vm3, %v2535_v59, %v2534_v58 }
 0xdff   :  { %v2507_v4 = vpop.permute.xlu2 %2506  ;;  %v2538_v60 = vsel %vm581_vm4, %v2537_v62, %v2536_v47 }
 0xe00   :  { %v2503_v31 = vpop.permute.xlu1 %2502  ;;  %v2524_v0 = vmul.f32 %v2507_v4, %v6226_v11 }
 0xe01   :  { %v2501_v45 = vpop.permute.xlu0 %2500  ;;  %v2522_v57 = vmul.f32 %v2503_v31, %v6229_v53 }
 0xe02   :  { %v2521_v3 = vmul.f32 %v2501_v45, %v6164_v18  ;;  %v2544_v30 = vrot.slane %v2524_v0, 7 }
 0xe03   :  { %v2541_v14 = vrot.slane %v2522_v57, 1 }
 0xe04   :  { %v2539_v16 = vrot.slane %v2521_v3, 2 }
 0xe06   :  { %v2540_v24 = vsel %vm584_vm5, %v2539_v16, %v2538_v60 }
 0xe07   :  { %v2542_v53 = vsel %vm587_vm6, %v2541_v14, %v2540_v24 }
 0xe08   :  { %v2509_v10 = vpop.permute.xlu1 %2508 }
 0xe09   :  { %v2525_v52 = vmul.f32 %v2509_v10, %v6240_v35  ;;  %v2505_v38 = vpop.permute.xlu0 %2504 }
 0xe0a   :  { %v2523_v18 = vmul.f32 %v2505_v38, %v6186_v40 }
 0xe0b   :  { %v2546_v42 = vrot.slane %v2525_v52, 6 }
 0xe0c   :  { %v2543_v28 = vsel %vm590_vm7, %v2523_v18, %v2542_v53 }
 0xe0d   :  { %v2545_v48 = vsel %vm593_vm8, %v2544_v30, %v2543_v28 }
 0xe0e   :  { %v2547_v11 = vsel %vm596_vm9, %v2546_v42, %v2545_v48 }
 0xe0f   :  { %2548 = vrot.lane.b32.xlu2 %v2547_v11, %s4979_s21 }
 0xe69   :  { %v2549_v6 = vpop.permute.xlu2 %2548 }
 0xe6a   :  { %4154 = vmatmul.msk.f32.vlgmr.msra.gmra.mxu1 %vm225_vm10, %v2549_v6 }
 0xee7   :  { %v2569_v34 = vpop.f32.mrf.mxu1 }
 0xee8   :  { %v2573_v35 = vrot.slane %v2569_v34, 2  ;;  %v2574_v26 = vrot.slane %v2569_v34, 3  ;;  %v2575_v56 = vrot.slane %v2569_v34, 4  ;;  %v2576_v1 = vrot.slane %v2569_v34, 5 }
 0xee9   :  { %v2577_v54 = vrot.slane %v2569_v34, 6  ;;  %v2578_v23 = vrot.slane %v2569_v34, 7  ;;  %v2579_v2 = vrot.slane %v2569_v34, 1  ;;  %v2594_v8 = vadd.f32 %v2569_v34, %v5147_v46 }
 0xeea   :  { %v2588_v40 = vadd.f32 %v2573_v35, %v5124_v17  ;;  %v2589_v9 = vadd.f32 %v2574_v26, %v5127_v22  ;;  %v2590_v43 = vadd.f32 %v2575_v56, %v5131_v27  ;;  %v2591_v49 = vadd.f32 %v2576_v1, %v5135_v32 }
 0xeeb   :  { %v2592_v5 = vadd.f32 %v2577_v54, %v5139_v36  ;;  %v2593_v50 = vadd.f32 %v2578_v23, %v5143_v41  ;;  %v2595_v44 = vadd.f32 %v2579_v2, %v5154_v51  ;;  %v4161_v35 = vmul.f32 -1.442695, %v2594_v8 }
 0xeec   :  { %4600 = vtanh.f32 %v2588_v40  ;;  %v4157_v31 = vmul.f32 -1.442695, %v2590_v43  ;;  %v4155_v4 = vmul.f32 -1.442695, %v2588_v40  ;;  %v4156_v0 = vmul.f32 -1.442695, %v2589_v9 }
 0xeed   :  { %4602 = vtanh.f32 %v2589_v9  ;;  %v4160_v45 = vmul.f32 -1.442695, %v2593_v50  ;;  %v4158_v24 = vmul.f32 -1.442695, %v2591_v49  ;;  %v4159_v52 = vmul.f32 -1.442695, %v2592_v5 }
 0xeee   :  { %4604 = vtanh.f32 %v2590_v43  ;;  %v4162_v6 = vmul.f32 -1.442695, %v2595_v44 }
 0xeef   :  { %4606 = vtanh.f32 %v2591_v49 }
 0xef0   :  { %4608 = vtanh.f32 %v2592_v5 }
 0xef1   :  { %4610 = vtanh.f32 %v2593_v50 }
 0xef2   :  { %v4601_v61 = vpop.eup %4600  ;;  %4612 = vtanh.f32 %v2595_v44 }
 0xef3   :  { %v4603_v12 = vpop.eup %4602  ;;  %2796 = vrot.lane.b32.xlu0 %v4601_v61, %s4978_s7  ;;  %4614 = vtanh.f32 %v2594_v8 }
 0xef4   :  { %v4605_v19 = vpop.eup %4604  ;;  %2798 = vrot.lane.b32.xlu1 %v4603_v12, %s4978_s7  ;;  %4616 = vpow2.f32 %v4157_v31 }
 0xef5   :  { %2800 = vrot.lane.b32.xlu2 %v4605_v19, %s4978_s7  ;;  %v4607_v37 = vpop.eup %4606  ;;  %4618 = vpow2.f32 %v4160_v45 }
 0xef6   :  { %v4609_v25 = vpop.eup %4608 }
 0xef7   :  { %v4611_v63 = vpop.eup %4610 }
 0xef8   :  { %v4613_v59 = vpop.eup %4612 }
 0xef9   :  { %v4615_v58 = vpop.eup %4614 }
 0xefa   :  { %v4617_v3 = vpop.eup %4616 }
 0xefb   :  { %2802 = vrot.lane.b32.xlu0 %v4607_v37, %s4978_s7  ;;  %v2622_v62 = vadd.f32 1.0, %v4617_v3  ;;  %v4619_v57 = vpop.eup %4618 }
 0xefc   :  { %2804 = vrot.lane.b32.xlu1 %v4609_v25, %s4978_s7  ;;  %v2625_v47 = vadd.f32 1.0, %v4619_v57 }
 0xefd   :  { %2806 = vrot.lane.b32.xlu2 %v4611_v63, %s4978_s7  ;;  %4620 = vrcp.f32 %v2622_v62  ;;  %v2669_v34 = vand.u32 2147483648, %v2622_v62  ;;  %vm2663_vm1 = vweird.f32 %v2622_v62  ;;  %v2667_v56 = vand.u32 2147483647, %v2622_v62 }
 0xefe   :  { %4622 = vrcp.f32 %v2625_v47  ;;  %v2714_v2 = vand.u32 2147483648, %v2625_v47  ;;  %vm2708_vm13 = vweird.f32 %v2625_v47  ;;  %v2712_v8 = vand.u32 2147483647, %v2625_v47 }
 0xeff   :  { %4624 = vpow2.f32 %v4155_v4  ;;  %v2670_v1 = vor.u32 1.1754944e-38, %v2669_v34  ;;  %vm2668_vm2 = vcmp.eq.f32.partialorder %v2667_v56, 8.507059e+37 }
 0xf00   :  { %4626 = vpow2.f32 %v4156_v0  ;;  %vm2713_vm0 = vcmp.eq.f32.partialorder %v2712_v8, 8.507059e+37 }
 0xf01   :  { %4628 = vpow2.f32 %v4158_v24 }
 0xf02   :  { %4630 = vpow2.f32 %v4159_v52 }
 0xf03   :  { %2810 = vrot.lane.b32.xlu0 %v4613_v59, %s4978_s7  ;;  %v4621_v16 = vpop.eup %4620 }
 0xf04   :  { %2808 = vrot.lane.b32.xlu1 %v4615_v58, %s4978_s7  ;;  %v2659_v14 = vmul.f32 %v4621_v16, %v2622_v62  ;;  %v4623_v10 = vpop.eup %4622  ;;  %vm2664_vm15 = vweird.f32 %v4621_v16  ;;  %v2715_v58 = vor.u32 1.1754944e-38, %v2714_v2 }
 0xf05   :  { %v4625_v38 = vpop.eup %4624  ;;  %v2704_v42 = vmul.f32 %v4623_v10, %v2625_v47  ;;  %vm2665_vm11 = vmor %vm2663_vm1, %vm2664_vm15  ;;  %vm2709_vm12 = vweird.f32 %v4623_v10 }
 0xf06   :  { %v2660_v60 = vsub.f32 1.0, %v2659_v14  ;;  %v4627_v18 = vpop.eup %4626  ;;  %v6325_v53 = vadd.f32 1.0, %v4625_v38  ;;  %vm2710_vm14 = vmor %vm2708_vm13, %vm2709_vm12 }
 0xf07   :  { %v6327_v28 = vadd.f32 1.0, %v4627_v18  ;;  %v2705_v11 = vsub.f32 1.0, %v2704_v42  ;;  %v4629_v26 = vpop.eup %4628 }
 0xf08   :  { %v2661_v30 = vmul.f32 %v4621_v16, %v2660_v60  ;;  %4632 = vrcp.f32 %v6325_v53  ;;  %v4631_v40 = vpop.eup %4630  ;;  %v6331_v54 = vadd.f32 1.0, %v4629_v26  ;;  %v2639_v42 = vand.u32 2147483648, %v6325_v53 }
 0xf09   :  { %4634 = vrcp.f32 %v6327_v28  ;;  %v2706_v43 = vmul.f32 %v4623_v10, %v2705_v11  ;;  %v6333_v23 = vadd.f32 1.0, %v4631_v40  ;;  %v2637_v34 = vand.u32 2147483647, %v6325_v53 }
 0xf0a   :  { %v2662_v48 = vadd.f32 %v4621_v16, %v2661_v30  ;;  %4636 = vpow2.f32 %v4162_v6  ;;  %v2654_v6 = vand.u32 2147483648, %v6327_v28 }
 0xf0b   :  { %4638 = vpow2.f32 %v4161_v35  ;;  %v2707_v19 = vadd.f32 %v4623_v10, %v2706_v43  ;;  %v2652_v35 = vand.u32 2147483647, %v6327_v28  ;;  %v2640_v43 = vor.u32 1.1754944e-38, %v2639_v42 }
 0xf0c   :  { %v2666_v9 = vsel %vm2665_vm11, %v4621_v16, %v2662_v48  ;;  %4640 = vrcp.f32 %v6331_v54  ;;  %vm2633_vm11 = vweird.f32 %v6325_v53 }
 0xf0d   :  { %v6337_v61 = vsel %vm2668_vm2, %v2670_v1, %v2666_v9  ;;  %4642 = vrcp.f32 %v6333_v23  ;;  %v2711_v59 = vsel %vm2710_vm14, %v4623_v10, %v2707_v19  ;;  %vm2648_vm2 = vweird.f32 %v6327_v28 }
 0xf0e   :  { %v6335_v49 = vpop.eup %4632  ;;  %v6355_v57 = vsel %vm2713_vm0, %v2715_v58, %v2711_v59  ;;  %vm2638_vm14 = vcmp.eq.f32.partialorder %v2637_v34, 8.507059e+37  ;;  %vm2653_vm0 = vcmp.eq.f32.partialorder %v2652_v35, 8.507059e+37  ;;  %v2684_v19 = vand.u32 2147483648, %v6331_v54 }
 0xf0f   :  { %v6339_v50 = vpop.eup %4634  ;;  %v2629_v37 = vmul.f32 %v6335_v49, %v6325_v53  ;;  %vm2634_vm15 = vweird.f32 %v6335_v49  ;;  %v2699_v58 = vand.u32 2147483648, %v6333_v23 }
 0xf10   :  { %v4637_v44 = vpop.eup %4636  ;;  %v2644_v63 = vmul.f32 %v6339_v50, %v6327_v28  ;;  %vm2649_vm1 = vweird.f32 %v6339_v50  ;;  %vm2635_vm12 = vmor %vm2633_vm11, %vm2634_vm15  ;;  %vm2678_vm11 = vweird.f32 %v6331_v54 }
 0xf11   :  { %v4639_v25 = vpop.eup %4638  ;;  %v6349_v31 = vadd.f32 1.0, %v4637_v44  ;;  %v2630_v45 = vsub.f32 1.0, %v2629_v37  ;;  %vm6383_vm13 = vmor %vm2648_vm2, %vm2649_vm1  ;;  %vm2693_vm2 = vweird.f32 %v6333_v23 }
 0xf12   :  { %v6351_v3 = vadd.f32 1.0, %v4639_v25  ;;  %v6353_v62 = vpop.eup %4640  ;;  %v2645_v4 = vsub.f32 1.0, %v2644_v63 }
 0xf13   :  { %v6357_v16 = vpop.eup %4642  ;;  %4644 = vrcp.f32 %v6349_v31  ;;  %v2631_v14 = vmul.f32 %v6335_v49, %v2630_v45  ;;  %v2674_v60 = vmul.f32 %v6353_v62, %v6331_v54  ;;  %vm2679_vm15 = vweird.f32 %v6353_v62 }
 0xf14   :  { %4646 = vrcp.f32 %v6351_v3  ;;  %v2646_v24 = vmul.f32 %v6339_v50, %v2645_v4  ;;  %v2689_v10 = vmul.f32 %v6357_v16, %v6333_v23  ;;  %vm2694_vm1 = vweird.f32 %v6357_v16 }
 0xf15   :  { %v2632_v52 = vadd.f32 %v6335_v49, %v2631_v14  ;;  %v2675_v38 = vsub.f32 1.0, %v2674_v60  ;;  %v2682_v45 = vand.u32 2147483647, %v6331_v54  ;;  %v2685_v60 = vor.u32 1.1754944e-38, %v2684_v19 }
 0xf16   :  { %v2647_v30 = vadd.f32 %v6339_v50, %v2646_v24  ;;  %v2690_v48 = vsub.f32 1.0, %v2689_v10  ;;  %v2700_v54 = vor.u32 1.1754944e-38, %v2699_v58  ;;  %v2742_v34 = vand.u32 2147483647, %v6349_v31 }
 0xf17   :  { %v2636_v56 = vsel %vm2635_vm12, %v6335_v49, %v2632_v52  ;;  %v2676_v40 = vmul.f32 %v6353_v62, %v2675_v38  ;;  %vm2680_vm12 = vmor %vm2678_vm11, %vm2679_vm15  ;;  %vm2738_vm11 = vweird.f32 %v6349_v31  ;;  %v2727_v35 = vand.u32 2147483647, %v6351_v3 }
 0xf18   :  { %v2651_v53 = vsel %vm6383_vm13, %v6339_v50, %v2647_v30  ;;  %v2691_v1 = vmul.f32 %v6357_v16, %v2690_v48  ;;  %v6397_v49 = vsel %vm2638_vm14, %v2640_v43, %v2636_v56  ;;  %vm2695_vm13 = vmor %vm2693_vm2, %vm2694_vm1  ;;  %vm2683_vm14 = vcmp.eq.f32.partialorder %v2682_v45, 8.507059e+37 }
 0xf19   :  { %v6371_v18 = vpop.eup %4644  ;;  %v2677_v8 = vadd.f32 %v6353_v62, %v2676_v40  ;;  %v2744_v48 = vand.u32 2147483648, %v6349_v31  ;;  %vm2723_vm2 = vweird.f32 %v6351_v3 }
 0xf1a   :  { %v6376_v11 = vpop.eup %4646  ;;  %v2734_v9 = vmul.f32 %v6371_v18, %v6349_v31  ;;  %v2692_v63 = vadd.f32 %v6357_v16, %v2691_v1  ;;  %vm2739_vm15 = vweird.f32 %v6371_v18 }
 0xf1b   :  { %v2719_v28 = vmul.f32 %v6376_v11, %v6351_v3  ;;  %v2681_v4 = vsel %vm2680_vm12, %v6353_v62, %v2677_v8  ;;  %vm2724_vm1 = vweird.f32 %v6376_v11  ;;  %vm2740_vm12 = vmor %vm2738_vm11, %vm2739_vm15  ;;  %v2745_v40 = vor.u32 1.1754944e-38, %v2744_v48 }
 0xf1c   :  { %v2735_v37 = vsub.f32 1.0, %v2734_v9  ;;  %v2696_v14 = vsel %vm2695_vm13, %v6357_v16, %v2692_v63  ;;  %v6421_v10 = vsel %vm2683_vm14, %v2685_v60, %v2681_v4  ;;  %vm2725_vm13 = vmor %vm2723_vm2, %vm2724_vm1  ;;  %vm2743_vm14 = vcmp.eq.f32.partialorder %v2742_v34, 8.507059e+37 }
 0xf1d   :  { %v2720_v59 = vsub.f32 1.0, %v2719_v28 }
 0xf1f   :  { %v2721_v24 = vmul.f32 %v6376_v11, %v2720_v59 }
 0xf21   :  { %v2722_v42 = vadd.f32 %v6376_v11, %v2721_v24 }
 0xf23   :  { %v2726_v56 = vsel %vm2725_vm13, %v6376_v11, %v2722_v42  ;;  %v2766_v11 = vrot.slane %v6280_v33, 7 }
 0xf25   :  { %v2782_v19 = vmul.f32 %v2766_v11, %v6337_v61 }
 0xf4f   :  { %v2801_v5 = vpop.permute.xlu2 %2800 }
 0xf50   :  { %v2822_v12 = vmul.f32 %v2801_v5, %v6337_v61  ;;  %v2655_v5 = vor.u32 1.1754944e-38, %v2654_v6  ;;  %v2729_v6 = vand.u32 2147483648, %v6351_v3 }
 0xf52   :  { %2840 = vrot.lane.b32.xlu1 %v2822_v12, %s4978_s7  ;;  %v6401_v44 = vsel %vm2653_vm0, %v2655_v5, %v2651_v53  ;;  %v2730_v9 = vor.u32 1.1754944e-38, %v2729_v6 }
 0xf57   :  { %v2807_v47 = vpop.permute.xlu2 %2806 }
 0xf58   :  { %v2825_v0 = vmul.f32 %v2807_v47, %v6355_v57  ;;  %v2697_v47 = vand.u32 2147483647, %v6333_v23 }
 0xf5a   :  { %2846 = vrot.lane.b32.xlu1 %v2825_v0, %s4978_s7  ;;  %v2736_v0 = vmul.f32 %v6371_v18, %v2735_v37  ;;  %vm2698_vm0 = vcmp.eq.f32.partialorder %v2697_v47, 8.507059e+37  ;;  %v2767_v37 = vrot.slane %v6260_v55, 7  ;;  %v2771_v55 = vrot.slane %v6270_v13, 7 }
 0xf5b   :  { %v6423_v23 = vsel %vm2698_vm0, %v2700_v54, %v2696_v14  ;;  %vm2728_vm0 = vcmp.eq.f32.partialorder %v2727_v35, 8.507059e+37  ;;  %v2765_v54 = vrot.slane %v6248_v29, 7  ;;  %v2770_v29 = vrot.slane %v6287_v20, 7 }
 0xf5c   :  { %v2737_v62 = vadd.f32 %v6371_v18, %v2736_v0  ;;  %v6443_v31 = vsel %vm2728_vm0, %v2730_v9, %v2726_v56  ;;  %v2783_v33 = vmul.f32 %v2767_v37, %v6421_v10 }
 0xf5d   :  { %v2786_v34 = vmul.f32 %v2770_v29, %v6443_v31 }
 0xf5e   :  { %v2741_v26 = vsel %vm2740_vm12, %v6371_v18, %v2737_v62  ;;  %v2764_v18 = vrot.slane %v6250_v21, 7  ;;  %v2769_v21 = vrot.slane %v6272_v15, 7  ;;  %v2768_v62 = vrot.slane %v6258_v39, 7 }
 0xf5f   :  { %v6441_v53 = vsel %vm2743_vm14, %v2745_v40, %v2741_v26 }
 0xf60   :  { %v2780_v5 = vmul.f32 %v2764_v18, %v6397_v49  ;;  %v2785_v59 = vmul.f32 %v2769_v21, %v6355_v57  ;;  %v2787_v15 = vmul.f32 %v2771_v55, %v6441_v53 }
 0xf65   :  { %v2797_v12 = vpop.permute.xlu0 %2796 }
 0xf66   :  { %v2799_v2 = vpop.permute.xlu1 %2798  ;;  %v2820_v50 = vmul.f32 %v2797_v12, %v6397_v49 }
 0xf67   :  { %v2821_v25 = vmul.f32 %v2799_v2, %v6401_v44 }
 0xf68   :  { %2836 = vrot.lane.b32.xlu2 %v2820_v50, %s4978_s7 }
 0xf69   :  { %2838 = vrot.lane.b32.xlu0 %v2821_v25, %s4978_s7 }
 0xf6d   :  { %v2803_v52 = vpop.permute.xlu0 %2802 }
 0xf6e   :  { %v2805_v38 = vpop.permute.xlu1 %2804  ;;  %v2823_v30 = vmul.f32 %v2803_v52, %v6421_v10  ;;  %v2781_v52 = vmul.f32 %v2765_v54, %v6401_v44 }
 0xf6f   :  { %v2824_v16 = vmul.f32 %v2805_v38, %v6423_v23 }
 0xf70   :  { %2842 = vrot.lane.b32.xlu2 %v2823_v30, %s4978_s7 }
 0xf71   :  { %2844 = vrot.lane.b32.xlu0 %v2824_v16, %s4978_s7  ;;  %v2784_v16 = vmul.f32 %v2768_v62, %v6423_v23 }
 0xf75   :  { %v2811_v43 = vpop.permute.xlu0 %2810 }
 0xf76   :  { %v2809_v1 = vpop.permute.xlu1 %2808  ;;  %v2827_v28 = vmul.f32 %v2811_v43, %v6441_v53 }
 0xf77   :  { %v2826_v3 = vmul.f32 %v2809_v1, %v6443_v31 }
 0xf78   :  { %2850 = vrot.lane.b32.xlu2 %v2827_v28, %s4978_s7 }
 0xf79   :  { %2848 = vrot.lane.b32.xlu0 %v2826_v3, %s4978_s7 }
 0xfc2   :  { %v2837_v12 = vpop.permute.xlu2 %2836 }
 0xfc3   :  { %v6453_v2 = vadd.f32 %v2837_v12, %v2780_v5 }
 0xfc4   :  { %v2841_v50 = vpop.permute.xlu1 %2840 }
 0xfc5   :  { %v6455_v8 = vadd.f32 %v2841_v50, %v2782_v19  ;;  %4648 = vtanh.f32 %v6453_v2 }
 0xfc7   :  { %4650 = vtanh.f32 %v6455_v8 }
 0xfca   :  { %v2843_v25 = vpop.permute.xlu2 %2842 }
 0xfcb   :  { %v4649_v63 = vpop.eup %4648  ;;  %v6463_v58 = vadd.f32 %v2843_v25, %v2783_v33 }
 0xfcc   :  { %v2847_v45 = vpop.permute.xlu1 %2846  ;;  %2884 = vrot.lane.b32.xlu1 %v4649_v63, %s4978_s7 }
 0xfcd   :  { %v4651_v47 = vpop.eup %4650  ;;  %v6466_v4 = vadd.f32 %v2847_v45, %v2785_v59  ;;  %4652 = vtanh.f32 %v6463_v58 }
 0xfce   :  { %2888 = vrot.lane.b32.xlu0 %v4651_v47, %s4978_s7 }
 0xfcf   :  { %4654 = vtanh.f32 %v6466_v4 }
 0xfd2   :  { %v2851_v0 = vpop.permute.xlu2 %2850 }
 0xfd3   :  { %v4653_v14 = vpop.eup %4652  ;;  %v6473_v60 = vadd.f32 %v2851_v0, %v2787_v15 }
 0xfd4   :  { %2890 = vrot.lane.b32.xlu1 %v4653_v14, %s4978_s7 }
 0xfd5   :  { %v4655_v24 = vpop.eup %4654  ;;  %4656 = vtanh.f32 %v6473_v60 }
 0xfd6   :  { %2894 = vrot.lane.b32.xlu0 %v4655_v24, %s4978_s7 }
 0xfdb   :  { %v4657_v13 = vpop.eup %4656  ;;  %v2839_v38 = vpop.permute.xlu0 %2838 }
 0xfdc   :  { %v6480_v30 = vadd.f32 %v2839_v38, %v2781_v52  ;;  %2898 = vrot.lane.b32.xlu1 %v4657_v13, %s4978_s7 }
 0xfde   :  { %4658 = vtanh.f32 %v6480_v30 }
 0xfe3   :  { %v2845_v42 = vpop.permute.xlu0 %2844 }
 0xfe4   :  { %v4659_v48 = vpop.eup %4658  ;;  %v6486_v6 = vadd.f32 %v2845_v42, %v2784_v16 }
 0xfe5   :  { %2886 = vrot.lane.b32.xlu2 %v4659_v48, %s4978_s7 }
 0xfe6   :  { %4660 = vtanh.f32 %v6486_v6 }
 0xfeb   :  { %v2849_v35 = vpop.permute.xlu0 %2848 }
 0xfec   :  { %v4661_v26 = vpop.eup %4660  ;;  %v6492_v56 = vadd.f32 %v2849_v35, %v2786_v34 }
 0xfed   :  { %2892 = vrot.lane.b32.xlu2 %v4661_v26, %s4978_s7 }
 0xfee   :  { %4662 = vtanh.f32 %v6492_v56 }
 0xff4   :  { %v4663_v39 = vpop.eup %4662 }
 0xff5   :  { %2896 = vrot.lane.b32.xlu2 %v4663_v39, %s4978_s7 }
0x103e   :  { %v2885_v40 = vpop.permute.xlu1 %2884 }
0x103f   :  { %v2887_v9 = vpop.permute.xlu2 %2886  ;;  %v2908_v43 = vmul.f32 %v2885_v40, %v6397_v49 }
0x1040   :  { %v2889_v1 = vpop.permute.xlu0 %2888  ;;  %v2909_v20 = vmul.f32 %v2887_v9, %v6401_v44 }
0x1041   :  { %v2910_v28 = vmul.f32 %v2889_v1, %v6337_v61  ;;  %v2924_v18 = vrot.slane %v2908_v43, 6 }
0x1042   :  { %v2925_v3 = vrot.slane %v2909_v20, 5 }
0x1043   :  { %v2927_v11 = vrot.slane %v2910_v28, 4 }
0x1044   :  { %v2926_v12 = vsel %vm578_vm3, %v2925_v3, %v2924_v18 }
0x1045   :  { %v2928_v49 = vsel %vm581_vm4, %v2927_v11, %v2926_v12 }
0x1046   :  { %v2891_v5 = vpop.permute.xlu1 %2890 }
0x1047   :  { %v2893_v19 = vpop.permute.xlu2 %2892  ;;  %v2911_v50 = vmul.f32 %v2891_v5, %v6421_v10 }
0x1048   :  { %v2895_v37 = vpop.permute.xlu0 %2894  ;;  %v2912_v21 = vmul.f32 %v2893_v19, %v6423_v23 }
0x1049   :  { %v2929_v33 = vrot.slane %v2911_v50, 3  ;;  %v2913_v44 = vmul.f32 %v2895_v37, %v6355_v57 }
0x104a   :  { %v2931_v25 = vrot.slane %v2912_v21, 2 }
0x104b   :  { %v2930_v61 = vsel %vm584_vm5, %v2929_v33, %v2928_v49  ;;  %v2933_v45 = vrot.slane %v2913_v44, 1 }
0x104c   :  { %v2932_v63 = vsel %vm587_vm6, %v2931_v25, %v2930_v61 }
0x104d   :  { %v2934_v15 = vsel %vm590_vm7, %v2933_v45, %v2932_v63 }
0x104e   :  { %v2899_v59 = vpop.permute.xlu1 %2898 }
0x104f   :  { %v2897_v47 = vpop.permute.xlu2 %2896  ;;  %v2915_v55 = vmul.f32 %v2899_v59, %v6441_v53 }
0x1050   :  { %v2914_v10 = vmul.f32 %v2897_v47, %v6443_v31 }
0x1051   :  { %v2936_v23 = vrot.slane %v2915_v55, 7 }
0x1052   :  { %v2935_v0 = vsel %vm593_vm8, %v2914_v10, %v2934_v15 }
0x1053   :  { %v2937_v14 = vsel %vm596_vm9, %v2936_v23, %v2935_v0 }
0x1054   :  { %2938 = vrot.lane.b32.xlu0 %v2937_v14, %s4979_s21 }
0x10c6   :  { %v2939_v57 = vpop.permute.xlu0 %2938 }
0x10c7   :  { %4163 = vmatmul.msk.f32.vlgmr.msra.gmra.mxu2 %vm225_vm10, %v2939_v57 }
0x114a   :  { %v2959_v24 = vpop.f32.mrf.mxu2 }
0x114b   :  { %v2963_v54 = vrot.slane %v2959_v24, 1  ;;  %v2964_v52 = vrot.slane %v2959_v24, 2  ;;  %v2965_v13 = vrot.slane %v2959_v24, 3  ;;  %v2966_v62 = vrot.slane %v2959_v24, 4 }
0x114c   :  { %v2967_v16 = vrot.slane %v2959_v24, 5  ;;  %v2968_v42 = vrot.slane %v2959_v24, 6 }
0x114d   :  { %v2978_v53 = vadd.f32 %v2963_v54, %v5124_v17  ;;  %v2979_v31 = vadd.f32 %v2964_v52, %v5127_v22  ;;  %v2980_v38 = vadd.f32 %v2965_v13, %v5131_v27  ;;  %v2981_v48 = vadd.f32 %v2966_v62, %v5135_v32 }
0x114e   :  { %v2982_v29 = vadd.f32 %v2967_v16, %v5139_v36  ;;  %v2983_v35 = vadd.f32 %v2968_v42, %v5143_v41  ;;  %v2969_v22 = vrot.slane %v2959_v24, 7  ;;  %v2985_v32 = vadd.f32 %v2959_v24, %v5154_v51 }
0x114f   :  { %4664 = vtanh.f32 %v2978_v53  ;;  %v4164_v11 = vmul.f32 -1.442695, %v2978_v53  ;;  %v4166_v5 = vmul.f32 -1.442695, %v2980_v38  ;;  %v4167_v33 = vmul.f32 -1.442695, %v2981_v48 }
0x1150   :  { %4666 = vtanh.f32 %v2979_v31  ;;  %v2984_v27 = vadd.f32 %v2969_v22, %v5147_v46  ;;  %v4165_v46 = vmul.f32 -1.442695, %v2979_v31  ;;  %v4168_v51 = vmul.f32 -1.442695, %v2982_v29 }
0x1151   :  { %4668 = vtanh.f32 %v2980_v38  ;;  %v4171_v20 = vmul.f32 -1.442695, %v2985_v32  ;;  %v4169_v25 = vmul.f32 -1.442695, %v2983_v35 }
0x1152   :  { %4670 = vtanh.f32 %v2981_v48  ;;  %v4170_v23 = vmul.f32 -1.442695, %v2984_v27 }
0x1153   :  { %4672 = vtanh.f32 %v2982_v29 }
0x1154   :  { %4674 = vtanh.f32 %v2983_v35 }
0x1155   :  { %v4665_v34 = vpop.eup %4664  ;;  %4676 = vtanh.f32 %v2984_v27 }
0x1156   :  { %v4667_v26 = vpop.eup %4666  ;;  %3186 = vrot.lane.b32.xlu1 %v4665_v34, %s4978_s7  ;;  %4678 = vtanh.f32 %v2985_v32 }
0x1157   :  { %v4669_v17 = vpop.eup %4668  ;;  %3188 = vrot.lane.b32.xlu2 %v4667_v26, %s4978_s7  ;;  %4680 = vpow2.f32 %v4165_v46 }
0x1158   :  { %3190 = vrot.lane.b32.xlu0 %v4669_v17, %s4978_s7  ;;  %v4671_v36 = vpop.eup %4670  ;;  %4682 = vpow2.f32 %v4168_v51 }
0x1159   :  { %v4673_v39 = vpop.eup %4672 }
0x115a   :  { %v4675_v41 = vpop.eup %4674 }
0x115b   :  { %v4677_v40 = vpop.eup %4676 }
0x115c   :  { %v4679_v9 = vpop.eup %4678 }
0x115d   :  { %v4681_v43 = vpop.eup %4680 }
0x115e   :  { %3192 = vrot.lane.b32.xlu1 %v4671_v36, %s4978_s7  ;;  %v3011_v1 = vadd.f32 1.0, %v4681_v43  ;;  %v4683_v28 = vpop.eup %4682 }
0x115f   :  { %3194 = vrot.lane.b32.xlu2 %v4673_v39, %s4978_s7  ;;  %v6530_v3 = vadd.f32 1.0, %v4683_v28 }
0x1160   :  { %3196 = vrot.lane.b32.xlu0 %v4675_v41, %s4978_s7  ;;  %4684 = vrcp.f32 %v3011_v1  ;;  %v3044_v15 = vand.u32 2147483648, %v3011_v1  ;;  %vm3038_vm1 = vweird.f32 %v3011_v1  ;;  %v3042_v0 = vand.u32 2147483647, %v3011_v1 }
0x1161   :  { %4686 = vpow2.f32 %v4171_v20  ;;  %v3089_v34 = vand.u32 2147483648, %v6530_v3  ;;  %vm3083_vm13 = vweird.f32 %v6530_v3  ;;  %v3087_v26 = vand.u32 2147483647, %v6530_v3 }
0x1162   :  { %4688 = vrcp.f32 %v6530_v3  ;;  %v3045_v13 = vor.u32 1.1754944e-38, %v3044_v15  ;;  %vm3043_vm2 = vcmp.eq.f32.partialorder %v3042_v0, 8.507059e+37 }
0x1163   :  { %4690 = vpow2.f32 %v4164_v11  ;;  %v3090_v36 = vor.u32 1.1754944e-38, %v3089_v34  ;;  %vm3088_vm0 = vcmp.eq.f32.partialorder %v3087_v26, 8.507059e+37 }
0x1164   :  { %4692 = vpow2.f32 %v4166_v5 }
0x1166   :  { %3198 = vrot.lane.b32.xlu1 %v4677_v40, %s4978_s7  ;;  %v4685_v18 = vpop.eup %4684 }
0x1167   :  { %3200 = vrot.lane.b32.xlu2 %v4679_v9, %s4978_s7  ;;  %v4687_v12 = vpop.eup %4686  ;;  %v3034_v19 = vmul.f32 %v4685_v18, %v3011_v1  ;;  %vm3039_vm15 = vweird.f32 %v4685_v18 }
0x1168   :  { %v6533_v50 = vadd.f32 1.0, %v4687_v12  ;;  %v4689_v21 = vpop.eup %4688  ;;  %vm3040_vm11 = vmor %vm3038_vm1, %vm3039_vm15 }
0x1169   :  { %v3035_v37 = vsub.f32 1.0, %v3034_v19  ;;  %v4691_v49 = vpop.eup %4690  ;;  %v3079_v61 = vmul.f32 %v4689_v21, %v6530_v3  ;;  %vm3084_vm12 = vweird.f32 %v4689_v21 }
0x116a   :  { %4694 = vrcp.f32 %v6533_v50  ;;  %v4693_v63 = vpop.eup %4692  ;;  %v6537_v59 = vadd.f32 1.0, %v4691_v49  ;;  %vm3085_vm14 = vmor %vm3083_vm13, %vm3084_vm12  ;;  %v3134_v20 = vand.u32 2147483648, %v6533_v50  ;;  %vm3128_vm1 = vweird.f32 %v6533_v50 }
0x116b   :  { %v3036_v44 = vmul.f32 %v4685_v18, %v3035_v37  ;;  %4696 = vpow2.f32 %v4167_v33  ;;  %v3080_v47 = vsub.f32 1.0, %v3079_v61  ;;  %v6539_v55 = vadd.f32 1.0, %v4693_v63 }
0x116c   :  { %4698 = vpow2.f32 %v4169_v25  ;;  %v3135_v19 = vor.u32 1.1754944e-38, %v3134_v20  ;;  %vm3023_vm13 = vweird.f32 %v6537_v59  ;;  %v3029_v63 = vand.u32 2147483648, %v6537_v59 }
0x116d   :  { %v3037_v45 = vadd.f32 %v4685_v18, %v3036_v44  ;;  %4700 = vrcp.f32 %v6537_v59  ;;  %v3081_v54 = vmul.f32 %v4689_v21, %v3080_v47  ;;  %v3027_v47 = vand.u32 2147483647, %v6537_v59 }
0x116e   :  { %4702 = vrcp.f32 %v6539_v55  ;;  %v3057_v15 = vand.u32 2147483647, %v6539_v55 }
0x116f   :  { %v3041_v24 = vsel %vm3040_vm11, %v4685_v18, %v3037_v45  ;;  %4704 = vpow2.f32 %v4170_v23  ;;  %v3082_v48 = vadd.f32 %v4689_v21, %v3081_v54  ;;  %v3132_v18 = vand.u32 2147483647, %v6533_v50 }
0x1170   :  { %v6541_v10 = vpop.eup %4694  ;;  %v6549_v38 = vsel %vm3043_vm2, %v3045_v13, %v3041_v24  ;;  %v3059_v23 = vand.u32 2147483648, %v6539_v55  ;;  %v3030_v24 = vor.u32 1.1754944e-38, %v3029_v63 }
0x1171   :  { %v4697_v14 = vpop.eup %4696  ;;  %v3124_v52 = vmul.f32 %v6541_v10, %v6533_v50  ;;  %v3086_v27 = vsel %vm3085_vm14, %v4689_v21, %v3082_v48  ;;  %vm3129_vm15 = vweird.f32 %v6541_v10  ;;  %vm3133_vm2 = vcmp.eq.f32.partialorder %v3132_v18, 8.507059e+37 }
0x1172   :  { %v4699_v57 = vpop.eup %4698  ;;  %v6547_v53 = vadd.f32 1.0, %v4697_v14  ;;  %v6571_v40 = vsel %vm3088_vm0, %v3090_v36, %v3086_v27  ;;  %vm3130_vm11 = vmor %vm3128_vm1, %vm3129_vm15  ;;  %vm3053_vm15 = vweird.f32 %v6539_v55 }
0x1173   :  { %v6551_v62 = vadd.f32 1.0, %v4699_v57  ;;  %v6553_v16 = vpop.eup %4700  ;;  %v3125_v29 = vsub.f32 1.0, %v3124_v52  ;;  %v3060_v52 = vor.u32 1.1754944e-38, %v3059_v23 }
0x1174   :  { %v6557_v35 = vpop.eup %4702  ;;  %4706 = vrcp.f32 %v6547_v53  ;;  %v3019_v22 = vmul.f32 %v6553_v16, %v6537_v59  ;;  %vm3024_vm12 = vweird.f32 %v6553_v16  ;;  %v3074_v34 = vand.u32 2147483648, %v6547_v53 }
0x1175   :  { %v4705_v17 = vpop.eup %4704  ;;  %v3126_v32 = vmul.f32 %v6541_v10, %v3125_v29  ;;  %4708 = vrcp.f32 %v6551_v62  ;;  %v3049_v39 = vmul.f32 %v6557_v35, %v6539_v55  ;;  %vm3054_vm14 = vweird.f32 %v6557_v35  ;;  %vm3025_vm0 = vmor %vm3023_vm13, %vm3024_vm12 }
0x1176   :  { %v6569_v41 = vadd.f32 1.0, %v4705_v17  ;;  %v3020_v46 = vsub.f32 1.0, %v3019_v22  ;;  %vm3055_vm1 = vmor %vm3053_vm15, %vm3054_vm14  ;;  %vm3068_vm14 = vweird.f32 %v6547_v53  ;;  %v3072_v17 = vand.u32 2147483647, %v6547_v53 }
0x1177   :  { %v3127_v1 = vadd.f32 %v6541_v10, %v3126_v32  ;;  %v3050_v28 = vsub.f32 1.0, %v3049_v39  ;;  %v3104_v22 = vand.u32 2147483648, %v6551_v62  ;;  %vm3098_vm15 = vweird.f32 %v6551_v62 }
0x1178   :  { %4710 = vrcp.f32 %v6569_v41  ;;  %v3021_v11 = vmul.f32 %v6553_v16, %v3020_v46  ;;  %v3102_v27 = vand.u32 2147483647, %v6551_v62  ;;  %v3075_v39 = vor.u32 1.1754944e-38, %v3074_v34 }
0x1179   :  { %v3131_v12 = vsel %vm3130_vm11, %v6541_v10, %v3127_v1  ;;  %v3051_v37 = vmul.f32 %v6557_v35, %v3050_v28  ;;  %vm3028_vm11 = vcmp.eq.f32.partialorder %v3027_v47, 8.507059e+37  ;;  %v3105_v46 = vor.u32 1.1754944e-38, %v3104_v22 }
0x117a   :  { %v6573_v51 = vpop.eup %4706  ;;  %v6592_v33 = vsel %vm3133_vm2, %v3135_v19, %v3131_v12  ;;  %v3022_v25 = vadd.f32 %v6553_v16, %v3021_v11  ;;  %vm3058_vm2 = vcmp.eq.f32.partialorder %v3057_v15, 8.507059e+37  ;;  %v3119_v28 = vand.u32 2147483648, %v6569_v41 }
0x117b   :  { %v6579_v3 = vpop.eup %4708  ;;  %v3064_v5 = vmul.f32 %v6573_v51, %v6547_v53  ;;  %v3052_v45 = vadd.f32 %v6557_v35, %v3051_v37  ;;  %vm3069_vm12 = vweird.f32 %v6573_v51  ;;  %v3159_v47 = vrot.slane %v6466_v4, 7 }
0x117c   :  { %v3094_v21 = vmul.f32 %v6579_v3, %v6551_v62  ;;  %v3026_v0 = vsel %vm3025_vm0, %v6553_v16, %v3022_v25  ;;  %vm3099_vm13 = vweird.f32 %v6579_v3  ;;  %vm3070_vm0 = vmor %vm3068_vm14, %vm3069_vm12 }
0x117d   :  { %v3065_v49 = vsub.f32 1.0, %v3064_v5  ;;  %v3056_v59 = vsel %vm3055_vm1, %v6557_v35, %v3052_v45  ;;  %vm3100_vm1 = vmor %vm3098_vm15, %vm3099_vm13  ;;  %vm3113_vm13 = vweird.f32 %v6569_v41  ;;  %v3120_v5 = vor.u32 1.1754944e-38, %v3119_v28 }
0x117e   :  { %v6596_v44 = vpop.eup %4710  ;;  %v3095_v10 = vsub.f32 1.0, %v3094_v21  ;;  %v6619_v29 = vsel %vm3058_vm2, %v3060_v52, %v3056_v59  ;;  %vm3103_vm2 = vcmp.eq.f32.partialorder %v3102_v27, 8.507059e+37  ;;  %v3155_v21 = vrot.slane %v6480_v30, 7 }
0x117f   :  { %v3066_v14 = vmul.f32 %v6573_v51, %v3065_v49  ;;  %v3109_v57 = vmul.f32 %v6596_v44, %v6569_v41  ;;  %vm3114_vm12 = vweird.f32 %v6596_v44  ;;  %v3158_v45 = vrot.slane %v6486_v6, 7 }
0x1180   :  { %v3096_v54 = vmul.f32 %v6579_v3, %v3095_v10  ;;  %vm3115_vm14 = vmor %vm3113_vm13, %vm3114_vm12  ;;  %v3161_v6 = vrot.slane %v6473_v60, 7  ;;  %v3157_v60 = vrot.slane %v6463_v58, 7  ;;  %v3318_v58 = vld [vmem:[#allocation9 + $0x18] sm:$0xff] }
0x1181   :  { %v3067_v16 = vadd.f32 %v6573_v51, %v3066_v14  ;;  %v3174_v10 = vmul.f32 %v3158_v45, %v6571_v40  ;;  %3361 = vmatpush.msra.mxu3 %v3318_v58  ;;  %v6723_v58 = vld [vmem:[#allocation12 + $0x18] sm:$0xff] }
0x1182   :  { %v3097_v26 = vadd.f32 %v6579_v3, %v3096_v54  ;;  %v3177_v4 = vmul.f32 %v3161_v6, %v6592_v33  ;;  %3447 = vmatpush.msrb.mxu2 %v6723_v58  ;;  %4065 = vmatpush.msrb.mxu0 %v6723_v58 }
0x1183   :  { %v3071_v32 = vsel %vm3070_vm0, %v6573_v51, %v3067_v16 }
0x11b1   :  { %v3189_v31 = vpop.permute.xlu2 %3188 }
0x11b2   :  { %v3211_v42 = vmul.f32 %v3189_v31, %v6549_v38  ;;  %v6614_v31 = vsel %vm3028_vm11, %v3030_v24, %v3026_v0  ;;  %vm3073_vm11 = vcmp.eq.f32.partialorder %v3072_v17, 8.507059e+37 }
0x11b3   :  { %v6635_v53 = vsel %vm3073_vm11, %v3075_v39, %v3071_v32 }
0x11b4   :  { %3228 = vrot.lane.b32.xlu1 %v3211_v42, %s4978_s7  ;;  %v3110_v42 = vsub.f32 1.0, %v3109_v57  ;;  %v3173_v34 = vmul.f32 %v3157_v60, %v6635_v53 }
0x11b6   :  { %v3111_v36 = vmul.f32 %v6596_v44, %v3110_v42 }
0x11b8   :  { %v3112_v20 = vadd.f32 %v6596_v44, %v3111_v36 }
0x11b9   :  { %v3195_v9 = vpop.permute.xlu2 %3194 }
0x11ba   :  { %v3214_v43 = vmul.f32 %v3195_v9, %v6571_v40  ;;  %v3101_v9 = vsel %vm3100_vm1, %v6579_v3, %v3097_v26  ;;  %v3117_v3 = vand.u32 2147483647, %v6569_v41  ;;  %v3116_v11 = vsel %vm3115_vm14, %v6596_v44, %v3112_v20 }
0x11bb   :  { %v6640_v62 = vsel %vm3103_vm2, %v3105_v46, %v3101_v9  ;;  %v3171_v41 = vmul.f32 %v3155_v21, %v6549_v38  ;;  %v3317_v9 = vld [vmem:[#allocation9 + $0x10] sm:$0xff]  ;;  %v3316_v46 = vld [vmem:[#allocation9 + $0x8] sm:$0xff] }
0x11bc   :  { %3234 = vrot.lane.b32.xlu1 %v3214_v43, %s4978_s7  ;;  %vm3118_vm0 = vcmp.eq.f32.partialorder %v3117_v3, 8.507059e+37  ;;  %v3175_v30 = vmul.f32 %v3159_v47, %v6640_v62  ;;  %3362 = vmatpush.msra.mxu3 %v3317_v9  ;;  %v6725_v9 = vld [vmem:[#allocation12 + $0x10] sm:$0xff] }
0x11bd   :  { %v6649_v12 = vsel %vm3118_vm0, %v3120_v5, %v3116_v11  ;;  %3448 = vmatpush.msrb.mxu2 %v6725_v9  ;;  %4066 = vmatpush.msrb.mxu0 %v6725_v9 }
0x11be   :  { %3363 = vmatpush.msra.mxu3 %v3316_v46  ;;  %v6729_v46 = vld [vmem:[#allocation12 + $0x8] sm:$0xff] }
0x11bf   :  { %3449 = vmatpush.msrb.mxu2 %v6729_v46  ;;  %4067 = vmatpush.msrb.mxu0 %v6729_v46 }
0x11c1   :  { %v3201_v50 = vpop.permute.xlu2 %3200 }
0x11c2   :  { %v3217_v61 = vmul.f32 %v3201_v50, %v6592_v33  ;;  %v3156_v50 = vrot.slane %v6455_v8, 7 }
0x11c4   :  { %3240 = vrot.lane.b32.xlu1 %v3217_v61, %s4978_s7  ;;  %v3172_v25 = vmul.f32 %v3156_v50, %v6619_v29 }
0x11c8   :  { %v3187_v13 = vpop.permute.xlu1 %3186 }
0x11c9   :  { %v3210_v55 = vmul.f32 %v3187_v13, %v6614_v31  ;;  %v3154_v13 = vrot.slane %v6453_v2, 7  ;;  %v3160_v2 = vrot.slane %v6492_v56, 7 }
0x11ca   :  { %v3191_v48 = vpop.permute.xlu0 %3190 }
0x11cb   :  { %v3212_v35 = vmul.f32 %v3191_v48, %v6619_v29  ;;  %3226 = vrot.lane.b32.xlu0 %v3210_v55, %s4978_s7  ;;  %v3170_v55 = vmul.f32 %v3154_v13, %v6614_v31  ;;  %v3176_v22 = vmul.f32 %v3160_v2, %v6649_v12 }
0x11cd   :  { %3230 = vrot.lane.b32.xlu2 %v3212_v35, %s4978_s7 }
0x11d0   :  { %v3193_v43 = vpop.permute.xlu1 %3192 }
0x11d1   :  { %v3213_v1 = vmul.f32 %v3193_v43, %v6635_v53  ;;  %v3315_v43 = vld [vmem:[#allocation9] sm:$0xff] }
0x11d2   :  { %v3197_v51 = vpop.permute.xlu0 %3196  ;;  %3364 = vmatpush.msra.mxu3 %v3315_v43  ;;  %v6735_v43 = vld [vmem:[#allocation12] sm:$0xff] }
0x11d3   :  { %v3215_v18 = vmul.f32 %v3197_v51, %v6640_v62  ;;  %3232 = vrot.lane.b32.xlu0 %v3213_v1, %s4978_s7  ;;  %3450 = vmatpush.msrb.mxu2 %v6735_v43 }
0x11d4   :  { %4068 = vmatpush.msrb.mxu0 %v6735_v43 }
0x11d5   :  { %3236 = vrot.lane.b32.xlu2 %v3215_v18, %s4978_s7 }
0x11d8   :  { %v3199_v19 = vpop.permute.xlu1 %3198 }
0x11d9   :  { %v3216_v37 = vmul.f32 %v3199_v19, %v6649_v12 }
0x11db   :  { %3238 = vrot.lane.b32.xlu0 %v3216_v37, %s4978_s7 }
0x1226   :  { %v3229_v49 = vpop.permute.xlu1 %3228 }
0x1227   :  { %v3231_v61 = vpop.permute.xlu2 %3230  ;;  %v3251_v44 = vadd.f32 %v3229_v49, %v3171_v41 }
0x1228   :  { %v3252_v63 = vadd.f32 %v3231_v61, %v3172_v25 }
0x1229   :  { %4712 = vtanh.f32 %v3251_v44 }
0x122a   :  { %4714 = vtanh.f32 %v3252_v63 }
0x122e   :  { %v3235_v15 = vpop.permute.xlu1 %3234 }
0x122f   :  { %v4713_v8 = vpop.eup %4712  ;;  %v3237_v23 = vpop.permute.xlu2 %3236  ;;  %v3254_v0 = vadd.f32 %v3235_v15, %v3174_v10 }
0x1230   :  { %v4715_v14 = vpop.eup %4714  ;;  %v3255_v57 = vadd.f32 %v3237_v23, %v3175_v30  ;;  %3276 = vrot.lane.b32.xlu0 %v4713_v8, %s4978_s7  ;;  %v6695_v23 = vld [vmem:[#allocation10 + $0x10] sm:$0xff] }
0x1231   :  { %4716 = vtanh.f32 %v3254_v0  ;;  %3278 = vrot.lane.b32.xlu1 %v4715_v14, %s4978_s7  ;;  %v4214_v14 = vld [vmem:[%s6900_s6] ss:$0 sm:$0xff] }
0x1232   :  { %4718 = vtanh.f32 %v3255_v57 }
0x1236   :  { %v3241_v24 = vpop.permute.xlu1 %3240 }
0x1237   :  { %v4717_v59 = vpop.eup %4716  ;;  %v3257_v54 = vadd.f32 %v3241_v24, %v3177_v4 }
0x1238   :  { %v4719_v52 = vpop.eup %4718  ;;  %3282 = vrot.lane.b32.xlu0 %v4717_v59, %s4978_s7 }
0x1239   :  { %4720 = vtanh.f32 %v3257_v54  ;;  %3284 = vrot.lane.b32.xlu1 %v4719_v52, %s4978_s7 }
0x123d   :  { %v3227_v16 = vpop.permute.xlu0 %3226 }
0x123e   :  { %v3250_v42 = vadd.f32 %v3227_v16, %v3170_v55 }
0x123f   :  { %v4721_v48 = vpop.eup %4720 }
0x1240   :  { %4722 = vtanh.f32 %v3250_v42  ;;  %3288 = vrot.lane.b32.xlu0 %v4721_v48, %s4978_s7 }
0x1245   :  { %v3233_v35 = vpop.permute.xlu0 %3232 }
0x1246   :  { %v4723_v26 = vpop.eup %4722  ;;  %v3253_v17 = vadd.f32 %v3233_v35, %v3173_v34 }
0x1247   :  { %3274 = vrot.lane.b32.xlu2 %v4723_v26, %s4978_s7 }
0x1248   :  { %4724 = vtanh.f32 %v3253_v17 }
0x124d   :  { %v3239_v27 = vpop.permute.xlu0 %3238 }
0x124e   :  { %v4725_v32 = vpop.eup %4724  ;;  %v3256_v36 = vadd.f32 %v3239_v27, %v3176_v22 }
0x124f   :  { %3280 = vrot.lane.b32.xlu2 %v4725_v32, %s4978_s7 }
0x1250   :  { %4726 = vtanh.f32 %v3256_v36 }
0x1256   :  { %v4727_v39 = vpop.eup %4726 }
0x1257   :  { %3286 = vrot.lane.b32.xlu2 %v4727_v39, %s4978_s7 }
0x12a1   :  { %v3275_v56 = vpop.permute.xlu2 %3274 }
0x12a2   :  { %v3277_v1 = vpop.permute.xlu0 %3276  ;;  %v3298_v28 = vmul.f32 %v3275_v56, %v6614_v31 }
0x12a3   :  { %v3279_v20 = vpop.permute.xlu1 %3278  ;;  %v3299_v51 = vmul.f32 %v3277_v1, %v6549_v38 }
0x12a4   :  { %v3300_v18 = vmul.f32 %v3279_v20, %v6619_v29  ;;  %v3331_v11 = vrot.slane %v3298_v28, 7 }
0x12a5   :  { %v3332_v3 = vrot.slane %v3299_v51, 6  ;;  %v6769_v51 = vld [vmem:[%s6902_s8] ss:$0 sm:$0xff]  ;;  %s4980_s8 = smov 16  }
0x12a6   :  { %v3334_v19 = vrot.slane %v3300_v18, 5 }
0x12a7   :  { %v3333_v50 = vsel %vm578_vm3, %v3332_v3, %v3331_v11 }
0x12a8   :  { %v3335_v38 = vsel %vm581_vm4, %v3334_v19, %v3333_v50 }
0x12a9   :  { %v3281_v5 = vpop.permute.xlu2 %3280 }
0x12aa   :  { %v3283_v37 = vpop.permute.xlu0 %3282  ;;  %v3301_v21 = vmul.f32 %v3281_v5, %v6635_v53 }
0x12ab   :  { %v3302_v41 = vmul.f32 %v3283_v37, %v6571_v40  ;;  %v3285_v25 = vpop.permute.xlu1 %3284 }
0x12ac   :  { %v3336_v49 = vrot.slane %v3301_v21, 4  ;;  %v3303_v31 = vmul.f32 %v3285_v25, %v6640_v62  ;;  %v6693_v62 = vld [vmem:[#allocation10 + $0x18] sm:$0xff] }
0x12ad   :  { %v3338_v61 = vrot.slane %v3302_v41, 3  ;;  %3381 = vmatpush.msrb.mxu1 %v6693_v62  ;;  %3468 = vmatpush.msrb.mxu3 %v6693_v62 }
0x12ae   :  { %v3337_v29 = vsel %vm584_vm5, %v3336_v49, %v3335_v38  ;;  %v3340_v53 = vrot.slane %v3303_v31, 2  ;;  %3557 = vmatpush.msra.mxu2 %v6693_v62 }
0x12af   :  { %v3339_v63 = vsel %vm587_vm6, %v3338_v61, %v3337_v29  ;;  %3382 = vmatpush.msrb.mxu1 %v6695_v23  ;;  %3469 = vmatpush.msrb.mxu3 %v6695_v23 }
0x12b0   :  { %v3341_v40 = vsel %vm590_vm7, %v3340_v53, %v3339_v63  ;;  %3558 = vmatpush.msra.mxu2 %v6695_v23  ;;  %vm6910_vm7 = vcmask 130048  }
0x12b1   :  { %v3287_v44 = vpop.permute.xlu2 %3286 }
0x12b2   :  { %v3289_v45 = vpop.permute.xlu0 %3288  ;;  %v3304_v47 = vmul.f32 %v3287_v44, %v6649_v12  ;;  %v6699_v12 = vld [vmem:[#allocation10 + $0x8] sm:$0xff] }
0x12b3   :  { %v3305_v30 = vmul.f32 %v3289_v45, %v6592_v33  ;;  %v6703_v33 = vld [vmem:[#allocation10] sm:$0xff]  ;;  %3383 = vmatpush.msrb.mxu1 %v6699_v12  ;;  %3470 = vmatpush.msrb.mxu3 %v6699_v12 }
0x12b4   :  { %v3342_v10 = vrot.slane %v3304_v47, 1  ;;  %3559 = vmatpush.msra.mxu2 %v6699_v12 }
0x12b5   :  { %3384 = vmatpush.msrb.mxu1 %v6703_v33  ;;  %3471 = vmatpush.msrb.mxu3 %v6703_v33 }
0x12b6   :  { %v3343_v15 = vsel %vm593_vm8, %v3342_v10, %v3341_v40  ;;  %3385 = vmatmul.f32.vlgmr.msrb.gmra.mxu1 %v4977_v7  ;;  %3560 = vmatpush.msra.mxu2 %v6703_v33 }
0x12b7   :  { %v3344_v8 = vsel %vm596_vm9, %v3305_v30, %v3343_v15  ;;  %3531 = vmatpush.msra.mxu1 %v6723_v58 }
0x12b8   :  { %3345 = vrot.lane.b32.xlu1 %v3344_v8, %s4979_s21 }
0x12b9   :  { %3532 = vmatpush.msra.mxu1 %v6725_v9 }
0x12bb   :  { %3533 = vmatpush.msra.mxu1 %v6729_v46 }
0x12bd   :  { %3534 = vmatpush.msra.mxu1 %v6735_v43 }
0x12bf   :  { %3646 = vmatpush.msrb.mxu1 %v6693_v62 }
0x12c1   :  { %3647 = vmatpush.msrb.mxu1 %v6695_v23 }
0x12c3   :  { %3648 = vmatpush.msrb.mxu1 %v6699_v12 }
0x12c5   :  { %3649 = vmatpush.msrb.mxu1 %v6703_v33 }
0x132a   :  { %v3346_v0 = vpop.permute.xlu1 %3345 }
0x132b   :  { %4172 = vmatmul.msk.f32.vlgmr.msra.gmra.mxu3 %vm225_vm10, %v3346_v0 }
0x132c   :  { %3620 = vmatpush.msra.mxu3 %v6723_v58 }
0x132e   :  { %3621 = vmatpush.msra.mxu3 %v6725_v9 }
0x1330   :  { %3622 = vmatpush.msra.mxu3 %v6729_v46 }
0x1332   :  { %3623 = vmatpush.msra.mxu3 %v6735_v43 }
0x1333   :  { %v3386_v6 = vpop.f32.mrf.mxu1 }
0x13ae   :  { %v3366_v57 = vpop.f32.mrf.mxu3 }
0x13af   :  { %v6714_v4 = vadd.f32 %v4214_v14, %v3366_v57 }
0x13b1   :  { %v3389_v24 = vadd.f32 %v3386_v6, %v6714_v4 }
0x13b3   :  { %4728 = vtanh.f32 %v3389_v24  ;;  %v4173_v54 = vmul.f32 -1.442695, %v3389_v24 }
0x13b5   :  { %4730 = vpow2.f32 %v4173_v54 }
0x13b9   :  { %v4729_v59 = vpop.eup %4728 }
0x13ba   :  { %3412 = vrot.lane.b32.xlu2 %v4729_v59, %s4978_s7 }
0x13bb   :  { %v4731_v7 = vpop.eup %4730 }
0x13bc   :  { %v3393_v52 = vadd.f32 1.0, %v4731_v7 }
0x13be   :  { %4732 = vrcp.f32 %v3393_v52  ;;  %v3405_v60 = vand.u32 2147483648, %v3393_v52  ;;  %vm3399_vm4 = vweird.f32 %v3393_v52  ;;  %v3403_v34 = vand.u32 2147483647, %v3393_v52 }
0x13c0   :  { %v3406_v26 = vor.u32 1.1754944e-38, %v3405_v60  ;;  %vm3404_vm6 = vcmp.eq.f32.partialorder %v3403_v34, 8.507059e+37 }
0x13c4   :  { %v4733_v13 = vpop.eup %4732 }
0x13c5   :  { %v3395_v55 = vmul.f32 %v4733_v13, %v3393_v52  ;;  %vm3400_vm3 = vweird.f32 %v4733_v13 }
0x13c6   :  { %vm3401_vm5 = vmor %vm3399_vm4, %vm3400_vm3 }
0x13c7   :  { %v3396_v16 = vsub.f32 1.0, %v3395_v55 }
0x13c9   :  { %v3397_v42 = vmul.f32 %v4733_v13, %v3396_v16 }
0x13cb   :  { %v3398_v48 = vadd.f32 %v4733_v13, %v3397_v42 }
0x13cd   :  { %v3402_v35 = vsel %vm3401_vm5, %v4733_v13, %v3398_v48 }
0x13ce   :  { %v3407_v2 = vsel %vm3404_vm6, %v3406_v26, %v3402_v35 }
0x13cf   :  { %v3410_v27 = vmul.f32 0.0, %v3407_v2 }
0x1414   :  { %v3413_v17 = vpop.permute.xlu2 %3412 }
0x1415   :  { %v3415_v22 = vmul.f32 %v3413_v17, %v3407_v2 }
0x1417   :  { %3417 = vrot.lane.b32.xlu0 %v3415_v22, %s4978_s7 }
0x1489   :  { %v3418_v32 = vpop.permute.xlu0 %3417 }
0x148a   :  { %v6719_v36 = vadd.f32 %v3418_v32, %v3410_v27 }
0x148c   :  { %4734 = vtanh.f32 %v6719_v36 }
0x1492   :  { %v4735_v39 = vpop.eup %4734 }
0x1493   :  { %3423 = vrot.lane.b32.xlu1 %v4735_v39, %s4978_s7 }
0x1505   :  { %v3424_v56 = vpop.permute.xlu1 %3423 }
0x1506   :  { %v3426_v1 = vmul.f32 %v3424_v56, %v3407_v2 }
0x1508   :  { %3431 = vrot.lane.b32.xlu2 %v3426_v1, %s4979_s21 }
0x1562   :  { %v3432_v20 = vpop.permute.xlu2 %3431 }
0x1563   :  { %4174 = vmatmul.msk.f32.vlgmr.msrb.gmra.mxu2 %vm225_vm10, %v3432_v20  ;;  %4175 = vmatmul.msk.f32.vlgmr.msrb.gmra.mxu3 %vm225_vm10, %v3432_v20 }
0x1564   :  { %3735 = vmatpush.msrb.mxu3 %v6693_v62  ;;  %3709 = vmatpush.msrb.mxu2 %v6723_v58 }
0x1566   :  { %3736 = vmatpush.msrb.mxu3 %v6695_v23  ;;  %3710 = vmatpush.msrb.mxu2 %v6725_v9 }
0x1568   :  { %3737 = vmatpush.msrb.mxu3 %v6699_v12  ;;  %3711 = vmatpush.msrb.mxu2 %v6729_v46 }
0x156a   :  { %3738 = vmatpush.msrb.mxu3 %v6703_v33  ;;  %3712 = vmatpush.msrb.mxu2 %v6735_v43 }
0x15e6   :  { %v3452_v28 = vpop.f32.mrf.mxu2  ;;  %v3473_v18 = vpop.f32.mrf.mxu3 }
0x15e7   :  { %v3453_v3 = vadd.f32 %v6769_v51, %v3452_v28  ;;  %v3476_v11 = vadd.f32 %v3473_v18, %v6714_v4 }
0x15e9   :  { %3455 = vst.msk [vmem:[%s6903_s9] sm:$0xff] %vm6910_vm7, %v3453_v3  ;;  %4736 = vtanh.f32 %v3476_v11  ;;  %v4176_v19 = vmul.f32 -1.442695, %v3476_v11 }
0x15eb   :  { %4738 = vpow2.f32 %v4176_v19 }
0x15ef   :  { %v4737_v5 = vpop.eup %4736 }
0x15f0   :  { %3499 = vrot.lane.b32.xlu0 %v4737_v5, %s4978_s7 }
0x15f1   :  { %v4739_v37 = vpop.eup %4738 }
0x15f2   :  { %v3480_v21 = vadd.f32 1.0, %v4739_v37 }
0x15f4   :  { %4740 = vrcp.f32 %v3480_v21  ;;  %v3492_v38 = vand.u32 2147483648, %v3480_v21  ;;  %vm3486_vm9 = vweird.f32 %v3480_v21  ;;  %v3490_v31 = vand.u32 2147483647, %v3480_v21 }
0x15f6   :  { %v3493_v44 = vor.u32 1.1754944e-38, %v3492_v38  ;;  %vm3491_vm1 = vcmp.eq.f32.partialorder %v3490_v31, 8.507059e+37 }
0x15fa   :  { %v4741_v50 = vpop.eup %4740 }
0x15fb   :  { %v3482_v41 = vmul.f32 %v4741_v50, %v3480_v21  ;;  %vm3487_vm8 = vweird.f32 %v4741_v50 }
0x15fc   :  { %vm3488_vm15 = vmor %vm3486_vm9, %vm3487_vm8 }
0x15fd   :  { %v3483_v25 = vsub.f32 1.0, %v3482_v41 }
0x15ff   :  { %v3484_v49 = vmul.f32 %v4741_v50, %v3483_v25 }
0x1601   :  { %v3485_v61 = vadd.f32 %v4741_v50, %v3484_v49 }
0x1603   :  { %v3489_v29 = vsel %vm3488_vm15, %v4741_v50, %v3485_v61 }
0x1604   :  { %v3494_v45 = vsel %vm3491_vm1, %v3493_v44, %v3489_v29 }
0x1605   :  { %v3497_v53 = vmul.f32 %v3494_v45, %v6719_v36 }
0x1662   :  { %v3500_v63 = vpop.permute.xlu0 %3499 }
0x1663   :  { %v3502_v47 = vmul.f32 %v3500_v63, %v3494_v45 }
0x1665   :  { %3504 = vrot.lane.b32.xlu1 %v3502_v47, %s4978_s7 }
0x16d7   :  { %v3505_v10 = vpop.permute.xlu1 %3504 }
0x16d8   :  { %v3507_v30 = vadd.f32 %v3505_v10, %v3497_v53 }
0x16da   :  { %4742 = vtanh.f32 %v3507_v30 }
0x16e0   :  { %v4743_v40 = vpop.eup %4742 }
0x16e1   :  { %3510 = vrot.lane.b32.xlu2 %v4743_v40, %s4978_s7 }
0x173b   :  { %v3511_v15 = vpop.permute.xlu2 %3510 }
0x173c   :  { %v3513_v8 = vmul.f32 %v3511_v15, %v3494_v45 }
0x173e   :  { %3515 = vrot.lane.b32.xlu0 %v3513_v8, %s4979_s21 }
0x17b0   :  { %v3516_v0 = vpop.permute.xlu0 %3515 }
0x17b1   :  { %4177 = vmatmul.msk.f32.vlgmr.msra.gmra.mxu1 %vm225_vm10, %v3516_v0  ;;  %4178 = vmatmul.msk.f32.vlgmr.msra.gmra.mxu2 %vm225_vm10, %v3516_v0 }
0x17b2   :  { %3824 = vmatpush.msra.mxu2 %v6693_v62  ;;  %3798 = vmatpush.msra.mxu1 %v6723_v58 }
0x17b4   :  { %3825 = vmatpush.msra.mxu2 %v6695_v23  ;;  %3799 = vmatpush.msra.mxu1 %v6725_v9 }
0x17b6   :  { %3826 = vmatpush.msra.mxu2 %v6699_v12  ;;  %3800 = vmatpush.msra.mxu1 %v6729_v46 }
0x17b8   :  { %3827 = vmatpush.msra.mxu2 %v6703_v33  ;;  %3801 = vmatpush.msra.mxu1 %v6735_v43 }
0x182e   :  { %v6807_v1 = vpop.f32.mrf.mxu1 }
0x1834   :  { %v3562_v14 = vpop.f32.mrf.mxu2 }
0x1835   :  { %v3565_v57 = vadd.f32 %v3562_v14, %v6714_v4 }
0x1837   :  { %4744 = vtanh.f32 %v3565_v57  ;;  %v4179_v24 = vmul.f32 -1.442695, %v3565_v57 }
0x1839   :  { %4746 = vpow2.f32 %v4179_v24 }
0x183d   :  { %v4745_v6 = vpop.eup %4744 }
0x183e   :  { %3588 = vrot.lane.b32.xlu1 %v4745_v6, %s4978_s7 }
0x183f   :  { %v4747_v59 = vpop.eup %4746 }
0x1840   :  { %v3569_v54 = vadd.f32 1.0, %v4747_v59 }
0x1842   :  { %4748 = vrcp.f32 %v3569_v54  ;;  %v3581_v42 = vand.u32 2147483648, %v3569_v54  ;;  %vm3575_vm2 = vweird.f32 %v3569_v54  ;;  %v3579_v48 = vand.u32 2147483647, %v3569_v54 }
0x1844   :  { %v3582_v34 = vor.u32 1.1754944e-38, %v3581_v42  ;;  %vm3580_vm13 = vcmp.eq.f32.partialorder %v3579_v48, 8.507059e+37 }
0x1848   :  { %v4749_v7 = vpop.eup %4748 }
0x1849   :  { %v3571_v52 = vmul.f32 %v4749_v7, %v3569_v54  ;;  %vm3576_vm11 = vweird.f32 %v4749_v7 }
0x184a   :  { %vm3577_vm12 = vmor %vm3575_vm2, %vm3576_vm11 }
0x184b   :  { %v3572_v13 = vsub.f32 1.0, %v3571_v52 }
0x184d   :  { %v3573_v55 = vmul.f32 %v4749_v7, %v3572_v13 }
0x184f   :  { %v3574_v16 = vadd.f32 %v4749_v7, %v3573_v55 }
0x1851   :  { %v3578_v60 = vsel %vm3577_vm12, %v4749_v7, %v3574_v16 }
0x1852   :  { %v3583_v26 = vsel %vm3580_vm13, %v3582_v34, %v3578_v60 }
0x1853   :  { %v3586_v2 = vmul.f32 %v3583_v26, %v3507_v30 }
0x18b0   :  { %v3589_v35 = vpop.permute.xlu1 %3588 }
0x18b1   :  { %v3591_v17 = vmul.f32 %v3589_v35, %v3583_v26 }
0x18b3   :  { %3593 = vrot.lane.b32.xlu2 %v3591_v17, %s4978_s7 }
0x190d   :  { %v3594_v22 = vpop.permute.xlu2 %3593 }
0x190e   :  { %v3596_v27 = vadd.f32 %v3594_v22, %v3586_v2 }
0x1910   :  { %4750 = vtanh.f32 %v3596_v27 }
0x1916   :  { %v4751_v32 = vpop.eup %4750 }
0x1917   :  { %3599 = vrot.lane.b32.xlu0 %v4751_v32, %s4978_s7 }
0x1989   :  { %v3600_v36 = vpop.permute.xlu0 %3599 }
0x198a   :  { %v3602_v39 = vmul.f32 %v3600_v36, %v3583_v26 }
0x198c   :  { %3604 = vrot.lane.b32.xlu1 %v3602_v39, %s4979_s21 }
0x19fe   :  { %v3605_v56 = vpop.permute.xlu1 %3604 }
0x19ff   :  { %4180 = vmatmul.msk.f32.vlgmr.msra.gmra.mxu3 %vm225_vm10, %v3605_v56  ;;  %4181 = vmatmul.msk.f32.vlgmr.msrb.gmra.mxu1 %vm225_vm10, %v3605_v56 }
0x1a00   :  { %3913 = vmatpush.msrb.mxu1 %v6693_v62  ;;  %3887 = vmatpush.msra.mxu3 %v6723_v58 }
0x1a02   :  { %3914 = vmatpush.msrb.mxu1 %v6695_v23  ;;  %3888 = vmatpush.msra.mxu3 %v6725_v9 }
0x1a04   :  { %3915 = vmatpush.msrb.mxu1 %v6699_v12  ;;  %3889 = vmatpush.msra.mxu3 %v6729_v46 }
0x1a06   :  { %3916 = vmatpush.msrb.mxu1 %v6703_v33  ;;  %3890 = vmatpush.msra.mxu3 %v6735_v43 }
0x1a7c   :  { %v3651_v20 = vpop.f32.mrf.mxu1 }
0x1a7d   :  { %v3654_v28 = vadd.f32 %v3651_v20, %v6714_v4 }
0x1a7f   :  { %4752 = vtanh.f32 %v3654_v28  ;;  %v4182_v3 = vmul.f32 -1.442695, %v3654_v28 }
0x1a81   :  { %4754 = vpow2.f32 %v4182_v3 }
0x1a82   :  { %v6824_v15 = vpop.f32.mrf.mxu3 }
0x1a85   :  { %v4753_v18 = vpop.eup %4752 }
0x1a86   :  { %3677 = vrot.lane.b32.xlu2 %v4753_v18, %s4978_s7 }
0x1a87   :  { %v4755_v11 = vpop.eup %4754 }
0x1a88   :  { %v3658_v5 = vadd.f32 1.0, %v4755_v11 }
0x1a8a   :  { %4756 = vrcp.f32 %v3658_v5  ;;  %v3670_v25 = vand.u32 2147483648, %v3658_v5  ;;  %vm3664_vm0 = vweird.f32 %v3658_v5  ;;  %v3668_v49 = vand.u32 2147483647, %v3658_v5 }
0x1a8c   :  { %v3671_v38 = vor.u32 1.1754944e-38, %v3670_v25  ;;  %vm3669_vm4 = vcmp.eq.f32.partialorder %v3668_v49, 8.507059e+37 }
0x1a90   :  { %v4757_v19 = vpop.eup %4756 }
0x1a91   :  { %v3660_v37 = vmul.f32 %v4757_v19, %v3658_v5  ;;  %vm3665_vm14 = vweird.f32 %v4757_v19 }
0x1a92   :  { %vm3666_vm3 = vmor %vm3664_vm0, %vm3665_vm14 }
0x1a93   :  { %v3661_v21 = vsub.f32 1.0, %v3660_v37 }
0x1a95   :  { %v3662_v50 = vmul.f32 %v4757_v19, %v3661_v21 }
0x1a97   :  { %v3663_v41 = vadd.f32 %v4757_v19, %v3662_v50 }
0x1a99   :  { %v3667_v61 = vsel %vm3666_vm3, %v4757_v19, %v3663_v41 }
0x1a9a   :  { %v3672_v29 = vsel %vm3669_vm4, %v3671_v38, %v3667_v61 }
0x1a9b   :  { %v3675_v63 = vmul.f32 %v3672_v29, %v3596_v27 }
0x1ae0   :  { %v3678_v31 = vpop.permute.xlu2 %3677 }
0x1ae1   :  { %v3680_v44 = vmul.f32 %v3678_v31, %v3672_v29 }
0x1ae3   :  { %3682 = vrot.lane.b32.xlu0 %v3680_v44, %s4978_s7 }
0x1b55   :  { %v3683_v45 = vpop.permute.xlu0 %3682 }
0x1b56   :  { %v3685_v47 = vadd.f32 %v3683_v45, %v3675_v63 }
0x1b58   :  { %4758 = vtanh.f32 %v3685_v47 }
0x1b5e   :  { %v4759_v53 = vpop.eup %4758 }
0x1b5f   :  { %3688 = vrot.lane.b32.xlu1 %v4759_v53, %s4978_s7 }
0x1bd1   :  { %v3689_v10 = vpop.permute.xlu1 %3688 }
0x1bd2   :  { %v3691_v30 = vmul.f32 %v3689_v10, %v3672_v29 }
0x1bd4   :  { %3693 = vrot.lane.b32.xlu2 %v3691_v30, %s4979_s21 }
0x1c2e   :  { %v3694_v40 = vpop.permute.xlu2 %3693 }
0x1c2f   :  { %4183 = vmatmul.msk.f32.vlgmr.msrb.gmra.mxu2 %vm225_vm10, %v3694_v40  ;;  %4184 = vmatmul.msk.f32.vlgmr.msrb.gmra.mxu3 %vm225_vm10, %v3694_v40 }
0x1c30   :  { %4002 = vmatpush.msrb.mxu3 %v6693_v62  ;;  %3976 = vmatpush.msrb.mxu2 %v6723_v58 }
0x1c32   :  { %4003 = vmatpush.msrb.mxu3 %v6695_v23  ;;  %3977 = vmatpush.msrb.mxu2 %v6725_v9 }
0x1c34   :  { %4004 = vmatpush.msrb.mxu3 %v6699_v12  ;;  %3978 = vmatpush.msrb.mxu2 %v6729_v46 }
0x1c36   :  { %4005 = vmatpush.msrb.mxu3 %v6703_v33  ;;  %3979 = vmatpush.msrb.mxu2 %v6735_v43 }
0x1cb2   :  { %v3740_v8 = vpop.f32.mrf.mxu3  ;;  %v6833_v35 = vpop.f32.mrf.mxu2 }
0x1cb3   :  { %v3743_v0 = vadd.f32 %v3740_v8, %v6714_v4 }
0x1cb5   :  { %4760 = vtanh.f32 %v3743_v0  ;;  %v4185_v23 = vmul.f32 -1.442695, %v3743_v0 }
0x1cb7   :  { %4762 = vpow2.f32 %v4185_v23 }
0x1cbb   :  { %v4761_v62 = vpop.eup %4760 }
0x1cbc   :  { %3766 = vrot.lane.b32.xlu0 %v4761_v62, %s4978_s7 }
0x1cbd   :  { %v4763_v58 = vpop.eup %4762 }
0x1cbe   :  { %v3747_v9 = vadd.f32 1.0, %v4763_v58 }
0x1cc0   :  { %4764 = vrcp.f32 %v3747_v9  ;;  %v3759_v43 = vand.u32 2147483648, %v3747_v9  ;;  %vm3753_vm6 = vweird.f32 %v3747_v9  ;;  %v3757_v6 = vand.u32 2147483647, %v3747_v9 }
0x1cc2   :  { %v3760_v59 = vor.u32 1.1754944e-38, %v3759_v43  ;;  %vm3758_vm8 = vcmp.eq.f32.partialorder %v3757_v6, 8.507059e+37 }
0x1cc6   :  { %v4765_v12 = vpop.eup %4764 }
0x1cc7   :  { %v3749_v46 = vmul.f32 %v4765_v12, %v3747_v9  ;;  %vm3754_vm5 = vweird.f32 %v4765_v12 }
0x1cc8   :  { %vm3755_vm7 = vmor %vm3753_vm6, %vm3754_vm5  ;;  %vm3543_vm6 = vcmask 261248  }
0x1cc9   :  { %v3750_v14 = vsub.f32 1.0, %v3749_v46 }
0x1ccb   :  { %v3751_v33 = vmul.f32 %v4765_v12, %v3750_v14 }
0x1ccd   :  { %v3752_v57 = vadd.f32 %v4765_v12, %v3751_v33 }
0x1ccf   :  { %v3756_v24 = vsel %vm3755_vm7, %v4765_v12, %v3752_v57  ;;  %vm3632_vm7 = vcmask 392448  }
0x1cd0   :  { %v3761_v7 = vsel %vm3758_vm8, %v3760_v59, %v3756_v24  ;;  %vm3721_vm8 = vcmask 523648  }
0x1cd1   :  { %v3764_v13 = vmul.f32 %v3761_v7, %v3685_v47 }
0x1d2e   :  { %v3767_v54 = vpop.permute.xlu0 %3766 }
0x1d2f   :  { %v3769_v52 = vmul.f32 %v3767_v54, %v3761_v7 }
0x1d31   :  { %3771 = vrot.lane.b32.xlu1 %v3769_v52, %s4978_s7 }
0x1da3   :  { %v3772_v55 = vpop.permute.xlu1 %3771 }
0x1da4   :  { %v3774_v16 = vadd.f32 %v3772_v55, %v3764_v13 }
0x1da6   :  { %4766 = vtanh.f32 %v3774_v16 }
0x1dac   :  { %v4767_v42 = vpop.eup %4766 }
0x1dad   :  { %3777 = vrot.lane.b32.xlu2 %v4767_v42, %s4978_s7 }
0x1e07   :  { %v3778_v48 = vpop.permute.xlu2 %3777 }
0x1e08   :  { %v3780_v60 = vmul.f32 %v3778_v48, %v3761_v7 }
0x1e0a   :  { %3782 = vrot.lane.b32.xlu0 %v3780_v60, %s4979_s21 }
0x1e7c   :  { %v3783_v34 = vpop.permute.xlu0 %3782 }
0x1e7d   :  { %4186 = vmatmul.msk.f32.vlgmr.msra.gmra.mxu1 %vm225_vm10, %v3783_v34  ;;  %4187 = vmatmul.msk.f32.vlgmr.msra.gmra.mxu2 %vm225_vm10, %v3783_v34 }
0x1efa   :  { %v6842_v29 = vpop.f32.mrf.mxu1 }
0x1f00   :  { %v3829_v26 = vpop.f32.mrf.mxu2 }
0x1f01   :  { %v3832_v17 = vadd.f32 %v3829_v26, %v6714_v4 }
0x1f03   :  { %4768 = vtanh.f32 %v3832_v17  ;;  %v4188_v22 = vmul.f32 -1.442695, %v3832_v17 }
0x1f05   :  { %4770 = vpow2.f32 %v4188_v22 }
0x1f09   :  { %v4769_v2 = vpop.eup %4768 }
0x1f0a   :  { %3855 = vrot.lane.b32.xlu1 %v4769_v2, %s4978_s7 }
0x1f0b   :  { %v4771_v27 = vpop.eup %4770 }
0x1f0c   :  { %v3836_v32 = vadd.f32 1.0, %v4771_v27 }
0x1f0e   :  { %4772 = vrcp.f32 %v3836_v32  ;;  %v3848_v18 = vand.u32 2147483648, %v3836_v32  ;;  %vm3842_vm15 = vweird.f32 %v3836_v32  ;;  %v3846_v3 = vand.u32 2147483647, %v3836_v32 }
0x1f10   :  { %v3849_v5 = vor.u32 1.1754944e-38, %v3848_v18  ;;  %vm3847_vm11 = vcmp.eq.f32.partialorder %v3846_v3, 8.507059e+37  ;;  %v3804_v18 = vadd.f32 %v6769_v51, %v6842_v29 }
0x1f14   :  { %v4773_v36 = vpop.eup %4772 }
0x1f15   :  { %v3838_v39 = vmul.f32 %v4773_v36, %v3836_v32  ;;  %vm3843_vm9 = vweird.f32 %v4773_v36 }
0x1f16   :  { %vm3844_vm1 = vmor %vm3842_vm15, %vm3843_vm9  ;;  %vm3810_vm9 = vcmask 654848   ;;  %vm3899_vm15 = vcmask 786048  }
0x1f17   :  { %v3839_v56 = vsub.f32 1.0, %v3838_v39 }
0x1f19   :  { %v3840_v20 = vmul.f32 %v4773_v36, %v3839_v56 }
0x1f1b   :  { %v3841_v28 = vadd.f32 %v4773_v36, %v3840_v20 }
0x1f1d   :  { %v3845_v11 = vsel %vm3844_vm1, %v4773_v36, %v3841_v28  ;;  %v3537_v28 = vadd.f32 %v6769_v51, %v6807_v1  ;;  %v3626_v1 = vadd.f32 %v6769_v51, %v6824_v15  ;;  %vm3988_vm1 = vcmask 917248  }
0x1f1e   :  { %v3850_v37 = vsel %vm3847_vm11, %v3849_v5, %v3845_v11  ;;  %vm4079_vm11 = vcmask 7168  }
0x1f1f   :  { %v3853_v50 = vmul.f32 %v3850_v37, %v3774_v16 }
0x1f7c   :  { %v3856_v19 = vpop.permute.xlu1 %3855 }
0x1f7d   :  { %v3858_v21 = vmul.f32 %v3856_v19, %v3850_v37 }
0x1f7f   :  { %3860 = vrot.lane.b32.xlu2 %v3858_v21, %s4978_s7 }
0x1fd9   :  { %v3861_v41 = vpop.permute.xlu2 %3860 }
0x1fda   :  { %v3863_v25 = vadd.f32 %v3861_v41, %v3853_v50 }
0x1fdc   :  { %4774 = vtanh.f32 %v3863_v25 }
0x1fe2   :  { %v4775_v49 = vpop.eup %4774 }
0x1fe3   :  { %3866 = vrot.lane.b32.xlu0 %v4775_v49, %s4978_s7  ;;  %v3715_v49 = vadd.f32 %v6769_v51, %v6833_v35 }
0x2055   :  { %v3867_v61 = vpop.permute.xlu0 %3866 }
0x2056   :  { %v3869_v38 = vmul.f32 %v3867_v61, %v3850_v37 }
0x2058   :  { %3871 = vrot.lane.b32.xlu1 %v3869_v38, %s4979_s21 }
0x20ca   :  { %v3872_v31 = vpop.permute.xlu1 %3871 }
0x20cb   :  { %4189 = vmatmul.msk.f32.vlgmr.msra.gmra.mxu3 %vm225_vm10, %v3872_v31  ;;  %4190 = vmatmul.msk.f32.vlgmr.msrb.gmra.mxu1 %vm225_vm10, %v3872_v31 }
0x2148   :  { %v3918_v44 = vpop.f32.mrf.mxu1 }
0x2149   :  { %v3921_v63 = vadd.f32 %v3918_v44, %v6714_v4 }
0x214b   :  { %4776 = vtanh.f32 %v3921_v63  ;;  %v4191_v47 = vmul.f32 -1.442695, %v3921_v63 }
0x214d   :  { %4778 = vpow2.f32 %v4191_v47 }
0x214e   :  { %v3892_v52 = vpop.f32.mrf.mxu3 }
0x214f   :  { %v3893_v21 = vadd.f32 %v6769_v51, %v3892_v52 }
0x2151   :  { %v4777_v45 = vpop.eup %4776 }
0x2152   :  { %3944 = vrot.lane.b32.xlu2 %v4777_v45, %s4978_s7 }
0x2153   :  { %v4779_v53 = vpop.eup %4778 }
0x2154   :  { %v3925_v10 = vadd.f32 1.0, %v4779_v53 }
0x2156   :  { %4780 = vrcp.f32 %v3925_v10  ;;  %v3937_v23 = vand.u32 2147483648, %v3925_v10  ;;  %vm3931_vm12 = vweird.f32 %v3925_v10  ;;  %v3935_v58 = vand.u32 2147483647, %v3925_v10 }
0x2158   :  { %v3938_v12 = vor.u32 1.1754944e-38, %v3937_v23  ;;  %vm3936_vm14 = vcmp.eq.f32.partialorder %v3935_v58, 8.507059e+37 }
0x215c   :  { %v4781_v30 = vpop.eup %4780 }
0x215d   :  { %v3927_v40 = vmul.f32 %v4781_v30, %v3925_v10  ;;  %vm3932_vm2 = vweird.f32 %v4781_v30 }
0x215e   :  { %vm3933_vm13 = vmor %vm3931_vm12, %vm3932_vm2 }
0x215f   :  { %v3928_v8 = vsub.f32 1.0, %v3927_v40 }
0x2161   :  { %v3929_v0 = vmul.f32 %v4781_v30, %v3928_v8 }
0x2163   :  { %v3930_v62 = vadd.f32 %v4781_v30, %v3929_v0 }
0x2165   :  { %v3934_v9 = vsel %vm3933_vm13, %v4781_v30, %v3930_v62 }
0x2166   :  { %v3939_v14 = vsel %vm3936_vm14, %v3938_v12, %v3934_v9 }
0x2167   :  { %v3942_v57 = vmul.f32 %v3939_v14, %v3863_v25 }
0x21ac   :  { %v3945_v46 = vpop.permute.xlu2 %3944 }
0x21ad   :  { %v3947_v33 = vmul.f32 %v3945_v46, %v3939_v14 }
0x21af   :  { %3949 = vrot.lane.b32.xlu0 %v3947_v33, %s4978_s7 }
0x2221   :  { %v3950_v43 = vpop.permute.xlu0 %3949 }
0x2222   :  { %v3952_v6 = vadd.f32 %v3950_v43, %v3942_v57 }
0x2224   :  { %4782 = vtanh.f32 %v3952_v6 }
0x222a   :  { %v4783_v24 = vpop.eup %4782 }
0x222b   :  { %3955 = vrot.lane.b32.xlu1 %v4783_v24, %s4978_s7 }
0x229d   :  { %v3956_v59 = vpop.permute.xlu1 %3955 }
0x229e   :  { %v3958_v54 = vmul.f32 %v3956_v59, %v3939_v14 }
0x22a0   :  { %3960 = vrot.lane.b32.xlu2 %v3958_v54, %s4979_s21 }
0x22fa   :  { %v3961_v7 = vpop.permute.xlu2 %3960 }
0x22fb   :  { %4192 = vmatmul.msk.f32.vlgmr.msrb.gmra.mxu2 %vm225_vm10, %v3961_v7  ;;  %4193 = vmatmul.msk.f32.vlgmr.msrb.gmra.mxu3 %vm225_vm10, %v3961_v7 }
0x237e   :  { %v4007_v13 = vpop.f32.mrf.mxu3  ;;  %v3981_v15 = vpop.f32.mrf.mxu2 }
0x237f   :  { %v4010_v55 = vadd.f32 %v4007_v13, %v6714_v4  ;;  %v3982_v61 = vadd.f32 %v6769_v51, %v3981_v15 }
0x2381   :  { %4784 = vtanh.f32 %v4010_v55  ;;  %v4194_v42 = vmul.f32 -1.442695, %v4010_v55 }
0x2383   :  { %4786 = vpow2.f32 %v4194_v42 }
0x2387   :  { %v4785_v16 = vpop.eup %4784 }
0x2388   :  { %4033 = vrot.lane.b32.xlu0 %v4785_v16, %s4978_s7 }
0x2389   :  { %v4787_v48 = vpop.eup %4786 }
0x238a   :  { %v4014_v60 = vadd.f32 1.0, %v4787_v48 }
0x238c   :  { %4788 = vrcp.f32 %v4014_v60  ;;  %v4026_v27 = vand.u32 2147483648, %v4014_v60  ;;  %vm4020_vm3 = vweird.f32 %v4014_v60  ;;  %v4024_v32 = vand.u32 2147483647, %v4014_v60 }
0x238e   :  { %v4027_v36 = vor.u32 1.1754944e-38, %v4026_v27  ;;  %vm4025_vm5 = vcmp.eq.f32.partialorder %v4024_v32, 8.507059e+37 }
0x2392   :  { %v4789_v34 = vpop.eup %4788 }
0x2393   :  { %v4016_v26 = vmul.f32 %v4789_v34, %v4014_v60  ;;  %vm4021_vm0 = vweird.f32 %v4789_v34 }
0x2394   :  { %vm4022_vm4 = vmor %vm4020_vm3, %vm4021_vm0 }
0x2395   :  { %v4017_v17 = vsub.f32 1.0, %v4016_v26 }
0x2397   :  { %v4018_v2 = vmul.f32 %v4789_v34, %v4017_v17 }
0x2399   :  { %v4019_v22 = vadd.f32 %v4789_v34, %v4018_v2 }
0x239b   :  { %v4023_v4 = vsel %vm4022_vm4, %v4789_v34, %v4019_v22 }
0x239c   :  { %v4028_v56 = vsel %vm4025_vm5, %v4027_v36, %v4023_v4 }
0x239d   :  { %v4031_v3 = vmul.f32 %v4028_v56, %v3952_v6 }
0x23fa   :  { %v4034_v39 = vpop.permute.xlu0 %4033 }
0x23fb   :  { %v4036_v20 = vmul.f32 %v4034_v39, %v4028_v56 }
0x23fd   :  { %4038 = vrot.lane.b32.xlu1 %v4036_v20, %s4978_s7 }
0x2405   :  { %3540 = vrot.lane.b32.xlu1 %v3537_v28, %s4980_s8 }
0x240d   :  { %3807 = vrot.lane.b32.xlu1 %v3804_v18, %s4979_s21 }
0x246f   :  { %v4039_v11 = vpop.permute.xlu1 %4038 }
0x2470   :  { %v4041_v5 = vadd.f32 %v4039_v11, %v4031_v3 }
0x2472   :  { %4790 = vtanh.f32 %v4041_v5 }
0x2477   :  { %v3541_v19 = vpop.permute.xlu1 %3540 }
0x2478   :  { %v4791_v37 = vpop.eup %4790  ;;  %3544 = vst.msk [vmem:[%s6903_s9] sm:$0xff] %vm3543_vm6, %v3541_v19 }
0x2479   :  { %4044 = vrot.lane.b32.xlu2 %v4791_v37, %s4978_s7 }
0x247f   :  { %v3808_v29 = vpop.permute.xlu1 %3807 }
0x2481   :  { %3629 = vrot.lane.b32.xlu2 %v3626_v1, %s4978_s7 }
0x2489   :  { %3896 = vrot.lane.b32.xlu2 %v3893_v21, %s4981_s30 }
0x24d3   :  { %v4045_v50 = vpop.permute.xlu2 %4044 }
0x24d4   :  { %v4047_v41 = vmul.f32 %v4045_v50, %v4028_v56 }
0x24d6   :  { %4049 = vrot.lane.b32.xlu0 %v4047_v41, %s4979_s21 }
0x24db   :  { %v3630_v25 = vpop.permute.xlu2 %3629 }
0x24dc   :  { %3633 = vst.msk [vmem:[%s6903_s9] sm:$0xff] %vm3632_vm7, %v3630_v25 }
0x24de   :  { %3718 = vrot.lane.b32.xlu0 %v3715_v49, %s4982_s13 }
0x24e3   :  { %v3897_v35 = vpop.permute.xlu2 %3896 }
0x24e6   :  { %3985 = vrot.lane.b32.xlu0 %v3982_v61, %s4983_s14 }
0x2548   :  { %v4050_v38 = vpop.permute.xlu0 %4049 }
0x2549   :  { %4195 = vmatmul.msk.f32.vlgmr.msrb.gmra.mxu0 %vm225_vm10, %v4050_v38  ;;  %vm4077_vm10 = vcmask 1048448  }
0x2550   :  { %v3719_v31 = vpop.permute.xlu0 %3718 }
0x2551   :  { %3722 = vst.msk [vmem:[%s6903_s9] sm:$0xff] %vm3721_vm8, %v3719_v31 }
0x2552   :  { %3811 = vst.msk [vmem:[%s6903_s9] sm:$0xff] %vm3810_vm9, %v3808_v29 }
0x2553   :  { %3900 = vst.msk [vmem:[%s6903_s9] sm:$0xff] %vm3899_vm15, %v3897_v35 }
0x2558   :  { %v3986_v44 = vpop.permute.xlu0 %3985 }
0x2559   :  { %3989 = vst.msk [vmem:[%s6903_s9] sm:$0xff] %vm3988_vm1, %v3986_v44 }
0x25c6   :  { %v4070_v63 = vpop.f32.mrf.mxu0 }
0x25c7   :  { %v4071_v45 = vadd.f32 %v6769_v51, %v4070_v63 }
0x25c9   :  { %4074 = vrot.lane.b32.xlu1 %v4071_v45, %s4984_s20 }
0x263b   :  { %v4075_v47 = vpop.permute.xlu1 %4074 }
0x263c   :  { %4078 = vst.msk [vmem:[%s6903_s9] sm:$0xff] %vm4077_vm10, %v4075_v47 }
0x263d   :  { %4080 = vst.msk [vmem:[%s6904_s10] sm:$0xff] %vm4079_vm11, %v4075_v47 }
0x263e   :  { %4089 = vsyncpa [#allocation3], 1 }
0x263f   :  { %4090 = vsyncpa [#allocation5], 1 }
0x2640   :  { %4091 = vsyncpa [#allocation8], 1 }
0x2641   :  { %4092 = vsyncpa [#allocation11], 1 }

</bundles_post_ra>
